<compile_context>
chip_gen: v7x
topology: tpu7x:2x2x1
jax: 0.10.0
libtpu: 0.0.40
codegen_flags: <defaults>
</compile_context>

<pallas_src>
import functools

import jax
import jax.numpy as jnp
from jax.experimental import pallas as pl
from jax.experimental.pallas import tpu as pltpu


def _round_up(x, m):
    return ((x + m - 1) // m) * m


# ---------------------------------------------------------------------------
# Kernels
# ---------------------------------------------------------------------------
def gcn_layer1_kernel(scale_ref, adj_ref, xw1_ref, b1_ref, w2_ref, xw2_ref):
    """Row tile of: h1 = relu(scale*(A_q @ XW1) + b1); out = h1 @ W2."""
    scale = scale_ref[0, 0]
    a = adj_ref[...].astype(jnp.bfloat16)            # int8 -> bf16 (VPU); MXU sees bf16
    h1 = jnp.dot(a, xw1_ref[...], preferred_element_type=jnp.float32)
    h1 = jnp.maximum(h1 * scale + b1_ref[...], 0.0)  # dequant on f32 accumulator
    xw2 = jnp.dot(h1.astype(w2_ref.dtype), w2_ref[...],
                  preferred_element_type=jnp.float32)
    xw2_ref[...] = xw2.astype(xw2_ref.dtype)


def gcn_layer2_kernel(scale_ref, adj_ref, xw2_ref, b2_ref, out_ref, *, num_classes):
    """Row tile of: out = log_softmax(scale*(A_q @ XW2) + b2) over real class cols."""
    scale = scale_ref[0, 0]
    a = adj_ref[...].astype(jnp.bfloat16)
    h2 = jnp.dot(a, xw2_ref[...], preferred_element_type=jnp.float32)
    h2 = h2 * scale + b2_ref[...]
    # Mask lane-padding class columns so they don't pollute the softmax.
    col = jax.lax.broadcasted_iota(jnp.int32, h2.shape, 1)
    h2 = jnp.where(col < num_classes, h2, jnp.float32(-1e30))
    m = jnp.max(h2, axis=1, keepdims=True)
    z = h2 - m
    lse = jnp.log(jnp.sum(jnp.exp(z), axis=1, keepdims=True))
    out_ref[...] = z - lse


# ---------------------------------------------------------------------------
# Adjacency preparation (do ONCE, cache across forward calls)
# ---------------------------------------------------------------------------
def prepare_adjacency(adj_hat, *, row_tile=512):
    """Pad A_hat to the row tile and int8-quantize with one global scale.

    Returns (adj_q [n_p, n_p] int8, scale [1, 1] f32).  Call once and reuse;
    this avoids re-reading/re-writing the O(N^2) adjacency every forward.
    """
    n = adj_hat.shape[0]
    n_p = _round_up(n, row_tile)
    adj_p = jnp.pad(adj_hat.astype(jnp.float32),
                    ((0, n_p - n), (0, n_p - n)))
    max_abs = jnp.maximum(jnp.max(jnp.abs(adj_p)), jnp.float32(1e-12))
    scale = max_abs / 127.0
    adj_q = jnp.clip(jnp.round(adj_p / scale), -127.0, 127.0).astype(jnp.int8)
    return adj_q, jnp.reshape(scale, (1, 1)).astype(jnp.float32)


# ---------------------------------------------------------------------------
# Forward wrapper
# ---------------------------------------------------------------------------
@functools.partial(jax.jit, static_argnames=("row_tile",))
def gcn_forward(adj_q, adj_scale, x, w1, b1, w2, b2, *, row_tile=512):
    n, f = x.shape
    h = w1.shape[1]
    c = w2.shape[1]
    n_p = adj_q.shape[0]
    tm = row_tile                       # 512: ~85% HBM roofline; 6 tiles at Cora (even per v7x core)
    assert n_p % tm == 0, "adjacency must be prepared with the same row_tile"
    h_p = _round_up(h, 128)             # lane-dense feature/class dims
    c_p = _round_up(c, 128)
    grid = (n_p // tm,)

    # Hoisted layer-1 feature transform: tiny vs. the A_hat stream -> plain XLA dot.
    xw1 = jnp.dot(x.astype(jnp.float32), w1.astype(jnp.float32))          # (n, h) f32
    xw1_p = jnp.pad(xw1, ((0, n_p - n), (0, h_p - h))).astype(jnp.bfloat16)

    w2_p = jnp.pad(w2.astype(jnp.float32),
                   ((0, h_p - h), (0, c_p - c))).astype(jnp.bfloat16)
    b1_p = jnp.pad(b1.reshape(1, -1).astype(jnp.float32), ((0, 0), (0, h_p - h)))
    b2_p = jnp.pad(b2.reshape(1, -1).astype(jnp.float32), ((0, 0), (0, c_p - c)))

    params = pltpu.CompilerParams(dimension_semantics=("parallel",))
    smem_scale_spec = pl.BlockSpec(memory_space=pltpu.MemorySpace.SMEM)

    # --- layer-1 aggregation + ReLU + hoisted layer-2 transform --------------
    xw2 = pl.pallas_call(
        gcn_layer1_kernel,
        out_shape=jax.ShapeDtypeStruct((n_p, c_p), jnp.bfloat16),
        grid=grid,
        in_specs=[smem_scale_spec,                                  # dequant scale (SMEM)
                  pl.BlockSpec((tm, n_p), lambda i: (i, 0)),        # A_q row strip (int8)
                  pl.BlockSpec((n_p, h_p), lambda i: (0, 0)),       # XW1, resident
                  pl.BlockSpec((1, h_p), lambda i: (0, 0)),         # b1
                  pl.BlockSpec((h_p, c_p), lambda i: (0, 0))],      # W2, resident
        out_specs=pl.BlockSpec((tm, c_p), lambda i: (i, 0)),
        compiler_params=params,
    )(adj_scale, adj_q, xw1_p, b1_p, w2_p)

    # --- layer-2 aggregation + bias + log_softmax ----------------------------
    out_p = pl.pallas_call(
        functools.partial(gcn_layer2_kernel, num_classes=c),
        out_shape=jax.ShapeDtypeStruct((n_p, c_p), jnp.float32),
        grid=grid,
        in_specs=[smem_scale_spec,                                  # dequant scale (SMEM)
                  pl.BlockSpec((tm, n_p), lambda i: (i, 0)),        # A_q row strip (int8)
                  pl.BlockSpec((n_p, c_p), lambda i: (0, 0)),       # XW2, resident
                  pl.BlockSpec((1, c_p), lambda i: (0, 0))],        # b2
        out_specs=pl.BlockSpec((tm, c_p), lambda i: (i, 0)),
        compiler_params=params,
    )(adj_scale, adj_q, xw2, b2_p)

    return out_p[:n, :c]


# ---------------------------------------------------------------------------
# Graph / parameter construction (plain-JAX glue)
# ---------------------------------------------------------------------------
def build_normalized_adjacency(edge_index, num_nodes):
    """Dense A_hat = D^-1/2 (A + I) D^-1/2, matching PyG gcn_norm (add_self_loops=True)."""
    src, dst = edge_index[0], edge_index[1]
    a = jnp.zeros((num_nodes, num_nodes), dtype=jnp.float32)
    a = a.at[dst, src].add(1.0)                    # edge j -> i: target row, source col
    a = a + jnp.eye(num_nodes, dtype=jnp.float32)  # self-loops
    deg = jnp.sum(a, axis=1)
    d_inv_sqrt = jnp.where(deg > 0, 1.0 / jnp.sqrt(deg), 0.0)
    return d_inv_sqrt[:, None] * a * d_inv_sqrt[None, :]


def glorot(key, shape):
    fan_in, fan_out = shape
    limit = jnp.sqrt(6.0 / (fan_in + fan_out))
    return jax.random.uniform(key, shape, jnp.float32, -limit, limit)


if __name__ == "__main__":
    # Small synthetic "Cora-like" graph (tune/benchmark at N~2708, F~1433).
    N = 32          # nodes
    F_IN = 16       # dataset.num_node_features
    HIDDEN = 8      # conv1 out channels
    C = 7           # dataset.num_classes

    key = jax.random.PRNGKey(0)
    k_x, k_e, k_w1, k_w2 = jax.random.split(key, 4)

    x = jax.random.normal(k_x, (N, F_IN), dtype=jnp.float32)

    # Deterministic random edge_index [2, E]
    E = 64
    edge_index = jax.random.randint(k_e, (2, E), 0, N, dtype=jnp.int32)
    adj_hat = build_normalized_adjacency(edge_index, N)

    # GCNConv parameters (PyG stores lin.weight as [out,in]; we use [in,out]; bias=zeros).
    w1 = glorot(k_w1, (F_IN, HIDDEN))
    b1 = jnp.zeros((HIDDEN,), dtype=jnp.float32)
    w2 = glorot(k_w2, (HIDDEN, C))
    b2 = jnp.zeros((C,), dtype=jnp.float32)

    # Prepare (pad + int8-quantize) the adjacency ONCE; reuse across forward calls.
    adj_q, adj_scale = prepare_adjacency(adj_hat, row_tile=512)

    out = gcn_forward(adj_q, adj_scale, x, w1, b1, w2, b2, row_tile=512)
    jax.block_until_ready(out)

    # Plain-JAX float32 reference (loose tolerance: A_hat is int8-quantized,
    # intermediates are bf16 with f32 accumulation).
    h1_ref = jnp.maximum(adj_hat @ (x @ w1) + b1[None, :], 0.0)
    h2_ref = adj_hat @ (h1_ref @ w2) + b2[None, :]
    ref = jax.nn.log_softmax(h2_ref, axis=1)

    row_sums = jnp.sum(jnp.exp(out), axis=1)
    assert out.shape == (N, C)
    assert bool(jnp.all(jnp.isfinite(out)))
    assert bool(jnp.all(jnp.abs(row_sums - 1.0) < 1e-4))
    assert bool(jnp.max(jnp.abs(out - ref)) < 0.5)

    print("KERNEL_OK")
</pallas_src>

<mosaic_0001>
module attributes {stable_mosaic.version = 11 : i64} {
  func.func @gcn_layer1_kernel(%arg0: i32, %arg1: memref<1x1xf32, #tpu.memory_space<smem>>, %arg2: memref<512x512xi8, #tpu.memory_space<vmem>>, %arg3: memref<512x128xbf16, #tpu.memory_space<vmem>>, %arg4: memref<1x128xf32, #tpu.memory_space<vmem>>, %arg5: memref<128x128xbf16, #tpu.memory_space<vmem>>, %arg6: memref<512x128xbf16, #tpu.memory_space<vmem>>) attributes {dimension_semantics = [#tpu.dimension_semantics<parallel>], iteration_bounds = array<i64: 1>, scalar_prefetch = 0 : i64, scratch_operands = 0 : i64, tpu.core_type = #tpu.core_type<tc>, window_params = [{transform_indices = @transform_0, window_bounds = array<i64: 1, 1>}, {transform_indices = @transform_1, window_bounds = array<i64: 512, 512>}, {pipeline_mode = #tpu.pipeline_mode<synchronous>, transform_indices = @transform_2, window_bounds = array<i64: 512, 128>}, {pipeline_mode = #tpu.pipeline_mode<synchronous>, transform_indices = @transform_3, window_bounds = array<i64: 1, 128>}, {pipeline_mode = #tpu.pipeline_mode<synchronous>, transform_indices = @transform_4, window_bounds = array<i64: 128, 128>}, {transform_indices = @transform_5, window_bounds = array<i64: 512, 128>}]} {
    %c0 = arith.constant 0 : index
    %c0_0 = arith.constant 0 : index
    %0 = memref.load %arg1[%c0, %c0_0] : memref<1x1xf32, #tpu.memory_space<smem>>
    %c0_1 = arith.constant 0 : index
    %c0_2 = arith.constant 0 : index
    %1 = vector.load %arg2[%c0_1, %c0_2] : memref<512x512xi8, #tpu.memory_space<vmem>>, vector<512x512xi8>
    %2 = arith.sitofp %1 : vector<512x512xi8> to vector<512x512xbf16>
    %c0_3 = arith.constant 0 : index
    %c0_4 = arith.constant 0 : index
    %3 = vector.load %arg3[%c0_3, %c0_4] : memref<512x128xbf16, #tpu.memory_space<vmem>>, vector<512x128xbf16>
    %cst = arith.constant dense<0.000000e+00> : vector<512x128xf32>
    %4 = tpu.matmul %2, %3, %cst {dimension_numbers = #tpu.dot_dimension_numbers<[1], [0], [0], [1], [0, 0, 1, 1], [], []>} : vector<512x512xbf16>, vector<512x128xbf16>, vector<512x128xf32> -> vector<512x128xf32>
    %5 = vector.broadcast %0 : f32 to vector<512x128xf32>
    %6 = arith.mulf %4, %5 : vector<512x128xf32>
    %c0_5 = arith.constant 0 : index
    %c0_6 = arith.constant 0 : index
    %7 = vector.load %arg4[%c0_5, %c0_6] : memref<1x128xf32, #tpu.memory_space<vmem>>, vector<1x128xf32>
    %8 = vector.broadcast %7 : vector<1x128xf32> to vector<512x128xf32>
    %9 = arith.addf %6, %8 : vector<512x128xf32>
    %cst_7 = arith.constant 0.000000e+00 : f32
    %10 = vector.broadcast %cst_7 : f32 to vector<512x128xf32>
    %11 = arith.maximumf %9, %10 : vector<512x128xf32>
    %12 = arith.truncf %11 : vector<512x128xf32> to vector<512x128xbf16>
    %c0_8 = arith.constant 0 : index
    %c0_9 = arith.constant 0 : index
    %13 = vector.load %arg5[%c0_8, %c0_9] : memref<128x128xbf16, #tpu.memory_space<vmem>>, vector<128x128xbf16>
    %cst_10 = arith.constant dense<0.000000e+00> : vector<512x128xf32>
    %14 = tpu.matmul %12, %13, %cst_10 {dimension_numbers = #tpu.dot_dimension_numbers<[1], [0], [0], [1], [0, 0, 1, 1], [], []>} : vector<512x128xbf16>, vector<128x128xbf16>, vector<512x128xf32> -> vector<512x128xf32>
    %15 = arith.truncf %14 : vector<512x128xf32> to vector<512x128xbf16>
    %c0_11 = arith.constant 0 : index
    %c0_12 = arith.constant 0 : index
    %16 = vector.load %arg6[%c0_11, %c0_12] : memref<512x128xbf16, #tpu.memory_space<vmem>>, vector<512x128xbf16>
    tpu.vector_store %arg6[%c0_11, %c0_12], %15 {strides = array<i32>} : memref<512x128xbf16, #tpu.memory_space<vmem>>, vector<512x128xbf16>,
    return
  }
  func.func @transform_0(%arg0: i32) -> (i32, i32) {
    %c0_i32 = arith.constant 0 : i32
    %c0_i32_0 = arith.constant 0 : i32
    %c0_i32_1 = arith.constant 0 : i32
    return %c0_i32, %c0_i32_0 : i32, i32
  }
  func.func @transform_1(%arg0: i32) -> (i32, i32) {
    %c0_i32 = arith.constant 0 : i32
    %c0_i32_0 = arith.constant 0 : i32
    return %arg0, %c0_i32 : i32, i32
  }
  func.func @transform_2(%arg0: i32) -> (i32, i32) {
    %c0_i32 = arith.constant 0 : i32
    %c0_i32_0 = arith.constant 0 : i32
    %c0_i32_1 = arith.constant 0 : i32
    return %c0_i32, %c0_i32_0 : i32, i32
  }
  func.func @transform_3(%arg0: i32) -> (i32, i32) {
    %c0_i32 = arith.constant 0 : i32
    %c0_i32_0 = arith.constant 0 : i32
    %c0_i32_1 = arith.constant 0 : i32
    return %c0_i32, %c0_i32_0 : i32, i32
  }
  func.func @transform_4(%arg0: i32) -> (i32, i32) {
    %c0_i32 = arith.constant 0 : i32
    %c0_i32_0 = arith.constant 0 : i32
    %c0_i32_1 = arith.constant 0 : i32
    return %c0_i32, %c0_i32_0 : i32, i32
  }
  func.func @transform_5(%arg0: i32) -> (i32, i32) {
    %c0_i32 = arith.constant 0 : i32
    %c0_i32_0 = arith.constant 0 : i32
    return %arg0, %c0_i32 : i32, i32
  }
}

module attributes {stable_mosaic.version = 11 : i64} {
  func.func @gcn_layer2_kernel(%arg0: i32, %arg1: memref<1x1xf32, #tpu.memory_space<smem>>, %arg2: memref<512x512xi8, #tpu.memory_space<vmem>>, %arg3: memref<512x128xbf16, #tpu.memory_space<vmem>>, %arg4: memref<1x128xf32, #tpu.memory_space<vmem>>, %arg5: memref<512x128xf32, #tpu.memory_space<vmem>>) attributes {dimension_semantics = [#tpu.dimension_semantics<parallel>], iteration_bounds = array<i64: 1>, scalar_prefetch = 0 : i64, scratch_operands = 0 : i64, tpu.core_type = #tpu.core_type<tc>, window_params = [{transform_indices = @transform_0, window_bounds = array<i64: 1, 1>}, {transform_indices = @transform_1, window_bounds = array<i64: 512, 512>}, {pipeline_mode = #tpu.pipeline_mode<synchronous>, transform_indices = @transform_2, window_bounds = array<i64: 512, 128>}, {pipeline_mode = #tpu.pipeline_mode<synchronous>, transform_indices = @transform_3, window_bounds = array<i64: 1, 128>}, {transform_indices = @transform_4, window_bounds = array<i64: 512, 128>}]} {
    %c0 = arith.constant 0 : index
    %c0_0 = arith.constant 0 : index
    %0 = memref.load %arg1[%c0, %c0_0] : memref<1x1xf32, #tpu.memory_space<smem>>
    %c0_1 = arith.constant 0 : index
    %c0_2 = arith.constant 0 : index
    %1 = vector.load %arg2[%c0_1, %c0_2] : memref<512x512xi8, #tpu.memory_space<vmem>>, vector<512x512xi8>
    %2 = arith.sitofp %1 : vector<512x512xi8> to vector<512x512xbf16>
    %c0_3 = arith.constant 0 : index
    %c0_4 = arith.constant 0 : index
    %3 = vector.load %arg3[%c0_3, %c0_4] : memref<512x128xbf16, #tpu.memory_space<vmem>>, vector<512x128xbf16>
    %cst = arith.constant dense<0.000000e+00> : vector<512x128xf32>
    %4 = tpu.matmul %2, %3, %cst {dimension_numbers = #tpu.dot_dimension_numbers<[1], [0], [0], [1], [0, 0, 1, 1], [], []>} : vector<512x512xbf16>, vector<512x128xbf16>, vector<512x128xf32> -> vector<512x128xf32>
    %5 = vector.broadcast %0 : f32 to vector<512x128xf32>
    %6 = arith.mulf %4, %5 : vector<512x128xf32>
    %c0_5 = arith.constant 0 : index
    %c0_6 = arith.constant 0 : index
    %7 = vector.load %arg4[%c0_5, %c0_6] : memref<1x128xf32, #tpu.memory_space<vmem>>, vector<1x128xf32>
    %8 = vector.broadcast %7 : vector<1x128xf32> to vector<512x128xf32>
    %9 = arith.addf %6, %8 : vector<512x128xf32>
    %10 = tpu.iota {dimensions = array<i32: 1>} : vector<512x128xi32>
    %c7_i32 = arith.constant 7 : i32
    %11 = vector.broadcast %c7_i32 : i32 to vector<512x128xi32>
    %12 = arith.cmpi slt, %10, %11 : vector<512x128xi32>
    %cst_7 = arith.constant -1.000000e+30 : f32
    %13 = vector.broadcast %cst_7 : f32 to vector<512x128xf32>
    %14 = arith.select %12, %9, %13 : vector<512x128xi1>, vector<512x128xf32>
    %cst_8 = arith.constant dense<0xFF800000> : vector<512xf32>
    %15 = vector.multi_reduction <maximumf>, %14, %cst_8 [1] : vector<512x128xf32> to vector<512xf32>
    %16 = vector.shape_cast %15 : vector<512xf32> to vector<512x1xf32>
    %17 = vector.broadcast %16 : vector<512x1xf32> to vector<512x128xf32>
    %18 = arith.subf %14, %17 : vector<512x128xf32>
    %19 = math.exp %18 : vector<512x128xf32>
    %cst_9 = arith.constant dense<0.000000e+00> : vector<512xf32>
    %20 = vector.multi_reduction <add>, %19, %cst_9 [1] : vector<512x128xf32> to vector<512xf32>
    %21 = vector.shape_cast %20 : vector<512xf32> to vector<512x1xf32>
    %22 = math.log %21 : vector<512x1xf32>
    %23 = vector.broadcast %22 : vector<512x1xf32> to vector<512x128xf32>
    %24 = arith.subf %18, %23 : vector<512x128xf32>
    %c0_10 = arith.constant 0 : index
    %c0_11 = arith.constant 0 : index
    %25 = vector.load %arg5[%c0_10, %c0_11] : memref<512x128xf32, #tpu.memory_space<vmem>>, vector<512x128xf32>
    tpu.vector_store %arg5[%c0_10, %c0_11], %24 {strides = array<i32>} : memref<512x128xf32, #tpu.memory_space<vmem>>, vector<512x128xf32>,
    return
  }
  func.func @transform_0(%arg0: i32) -> (i32, i32) {
    %c0_i32 = arith.constant 0 : i32
    %c0_i32_0 = arith.constant 0 : i32
    %c0_i32_1 = arith.constant 0 : i32
    return %c0_i32, %c0_i32_0 : i32, i32
  }
  func.func @transform_1(%arg0: i32) -> (i32, i32) {
    %c0_i32 = arith.constant 0 : i32
    %c0_i32_0 = arith.constant 0 : i32
    return %arg0, %c0_i32 : i32, i32
  }
  func.func @transform_2(%arg0: i32) -> (i32, i32) {
    %c0_i32 = arith.constant 0 : i32
    %c0_i32_0 = arith.constant 0 : i32
    %c0_i32_1 = arith.constant 0 : i32
    return %c0_i32, %c0_i32_0 : i32, i32
  }
  func.func @transform_3(%arg0: i32) -> (i32, i32) {
    %c0_i32 = arith.constant 0 : i32
    %c0_i32_0 = arith.constant 0 : i32
    %c0_i32_1 = arith.constant 0 : i32
    return %c0_i32, %c0_i32_0 : i32, i32
  }
  func.func @transform_4(%arg0: i32) -> (i32, i32) {
    %c0_i32 = arith.constant 0 : i32
    %c0_i32_0 = arith.constant 0 : i32
    return %arg0, %c0_i32 : i32, i32
  }
}

</mosaic_0001>

<bundles_post_ra>
// kernel: gcn_forward.2
= control target key start
LH: loop header
LB: loop body
LE: loop exit
PB: predicated region body
PF: predicated region fallthrough
CT: control target
= control target key end

     0   :  { %11 = vsyncpa [#allocation4], 0  ;;  %s2634_s18 = smov [#allocation3]   ;;  %s3231_s0 = inlined_call_operand.<no memory space> [shape: f32[1,1], index: 0, kind: input, shape index: {}]   ;;  %s3232_s1 = inlined_call_operand.hbm [shape: s8[512,512], index: 1, kind: input, shape index: {}]   ;;  %s3233_s2 = inlined_call_operand.vmem [shape: bf16[512,128], index: 2, kind: input, shape index: {}]   ;;  %s3234_s3 = inlined_call_operand.vmem [shape: f32[1,128], index: 3, kind: input, shape index: {}]   ;;  %s3235_s4 = inlined_call_operand.vmem [shape: bf16[128,128], index: 4, kind: input, shape index: {}]   ;;  %s3236_s5 = inlined_call_operand.vmem [shape: bf16[512,128], index: 5, kind: output, shape index: {}]  }
   0x1   :  { %s19_s19 = sshll.u32 %s2634_s18, 4  ;;  %s2610_s22 = scalar_lea.hbm %s3232_s1, 8192  ;;  %s20_s19 = int_to_ptr.vmem [resolvable:$true] %s19_s19 }
   0x2   :  { %p2611_p0 = scmp.ne.s32.totalorder %s3232_s1, %s2610_s22  ;;  %p2614_p1 = scmp.lt.u32.totalorder %s2610_s22, %s3232_s1 }
   0x4   :  { %p2616_p2 = pnand %p2614_p1, %p2611_p0 }
   0x6   :  { %2619 = shalt.err (!%p2616_p2)
}
   0x7   :  { %s2620_s27 = scalar_lea.vmem %s20_s19, 8192  ;;  %p2625_p4 = scmp.lt.s32.totalorder %s20_s19, %s20_s19 }
   0x8   :  { %p2621_p3 = scmp.ne.s32.totalorder %s20_s19, %s2620_s27  ;;  %p2626_p5 = scmp.lt.s32.totalorder %s2620_s27, %s2620_s27 }
   0xa   :  { %p2627_p6 = por %p2626_p5, %p2625_p4 }
   0xc   :  { %p2628_p7 = pnand %p2627_p6, %p2621_p3 }
   0xe   :  { %2631 = shalt.err (!%p2628_p7)
}
   0xf   :  { %s2635_s28 = smov 512   ;;  %s2636_s29 = smov 32  }
  0x10   :  { %25 = dma.hbm_to_vmem [thread:$0]  %s3232_s1, 8192, %s20_s19, [#allocation4], %s2635_s28, %s2635_s28, %s2636_s29  }
  0x11   :  { %2632 = dma.done.wait [#allocation4], 8192  }
  0x12   :  { %2633 = vsyncadd [#allocation4], 4294959104  ;;  %v2637_v0 = vmov 0   ;;  %v2569_v1 = vld [vmem:[%s3233_s2] sm:$0xff]   ;;  %v2570_v2 = vld [vmem:[%s3233_s2 + $0x8] sm:$0xff]  }
  0x13   :  { %485 = vmatprep.subr.bf16.mxu0 %v2637_v0  ;;  %2453 = vmatprep.subr.bf16.mxu1 %v2637_v0  ;;  %v2571_v3 = vld [vmem:[%s3233_s2 + $0x10] sm:$0xff]   ;;  %v2572_v4 = vld [vmem:[%s3233_s2 + $0x18] sm:$0xff]   ;;  %v2573_v5 = vld [vmem:[%s3233_s2 + $0x20] sm:$0xff]  }
  0x14   :  { %486 = vmatpush1.bf16.msra.mxu0 %v2569_v1  ;;  %2469 = vmatpush1.bf16.msra.mxu1 %v2569_v1  ;;  %v2705_v6 = vld [vmem:[#allocation3 + $0x8] sm:$0xff]  ;;  %v2575_v9 = vld [vmem:[%s3233_s2 + $0x30] sm:$0xff]   ;;  %v2576_v10 = vld [vmem:[%s3233_s2 + $0x38] sm:$0xff]  }
  0x15   :  { %487 = vmatprep.subr.bf16.mxu0 %v2637_v0  ;;  %2454 = vmatprep.subr.bf16.mxu1 %v2637_v0  ;;  %v102_v7 = vunpack.c.l.s8.bf16 %v2705_v6  ;;  %v2574_v8 = vld [vmem:[%s3233_s2 + $0x28] sm:$0xff]   ;;  %v2577_v11 = vld [vmem:[%s3233_s2 + $0x40] sm:$0xff]   ;;  %v2579_v14 = vld [vmem:[%s3233_s2 + $0x50] sm:$0xff]   ;;  %v106_v25 = vunpack.c.h.s8.bf16 %v2705_v6 }
  0x16   :  { %v2578_v12 = vld [vmem:[%s3233_s2 + $0x48] sm:$0xff]   ;;  %v2580_v16 = vld [vmem:[%s3233_s2 + $0x58] sm:$0xff]   ;;  %v2581_v17 = vld [vmem:[%s3233_s2 + $0x60] sm:$0xff]  }
  0x17   :  { %517 = vmatprep.mubr.bf16.mxu0 %v102_v7  ;;  %v54_v13 = vld [vmem:[#allocation3 + $0x88] sm:$0xff]  ;;  %v2583_v19 = vld [vmem:[%s3233_s2 + $0x70] sm:$0xff]   ;;  %v2584_v20 = vld [vmem:[%s3233_s2 + $0x78] sm:$0xff]  }
  0x18   :  { %488 = vmatpush1.bf16.msra.mxu0 %v2570_v2  ;;  %2470 = vmatpush1.bf16.msra.mxu1 %v2570_v2  ;;  %v134_v15 = vunpack.c.l.s8.bf16 %v54_v13  ;;  %v2582_v18 = vld [vmem:[%s3233_s2 + $0x68] sm:$0xff]   ;;  %v37_v21 = vld [vmem:[#allocation3] sm:$0xff]  ;;  %v138_v27 = vunpack.c.h.s8.bf16 %v54_v13  ;;  %v2587_v33 = vld [vmem:[%s3233_s2 + $0x90] sm:$0xff]  }
  0x19   :  { %489 = vmatprep.subr.bf16.mxu0 %v2637_v0  ;;  %2455 = vmatprep.subr.bf16.mxu1 %v2637_v0  ;;  %v53_v22 = vld [vmem:[#allocation3 + $0x80] sm:$0xff]  ;;  %v101_v23 = vunpack.c.l.s8.bf16 %v37_v21  ;;  %v2586_v28 = vld [vmem:[%s3233_s2 + $0x88] sm:$0xff]   ;;  %v105_v31 = vunpack.c.h.s8.bf16 %v37_v21  ;;  %v2588_v36 = vld [vmem:[%s3233_s2 + $0x98] sm:$0xff]  }
  0x1a   :  { %581 = vmatprep.mubr.bf16.mxu1 %v134_v15  ;;  %v133_v24 = vunpack.c.l.s8.bf16 %v53_v22  ;;  %v2585_v26 = vld [vmem:[%s3233_s2 + $0x80] sm:$0xff]   ;;  %v42_v29 = vld [vmem:[#allocation3 + $0x28] sm:$0xff]  ;;  %v137_v32 = vunpack.c.h.s8.bf16 %v53_v22  ;;  %v2591_v49 = vld [vmem:[%s3233_s2 + $0xb0] sm:$0xff]  }
  0x1b   :  { %v58_v30 = vld [vmem:[#allocation3 + $0xa8] sm:$0xff]  ;;  %v110_v34 = vunpack.c.l.s8.bf16 %v42_v29  ;;  %v41_v37 = vld [vmem:[#allocation3 + $0x20] sm:$0xff]  ;;  %v114_v42 = vunpack.c.h.s8.bf16 %v42_v29  ;;  %v2592_v52 = vld [vmem:[%s3233_s2 + $0xb8] sm:$0xff]  }
  0x1c   :  { %490 = vmatpush1.bf16.msra.mxu0 %v2571_v3  ;;  %2471 = vmatpush1.bf16.msra.mxu1 %v2571_v3  ;;  %v142_v35 = vunpack.c.l.s8.bf16 %v58_v30  ;;  %v57_v38 = vld [vmem:[#allocation3 + $0xa0] sm:$0xff]  ;;  %v109_v39 = vunpack.c.l.s8.bf16 %v41_v37  ;;  %v146_v43 = vunpack.c.h.s8.bf16 %v58_v30  ;;  %v2590_v44 = vld [vmem:[%s3233_s2 + $0xa8] sm:$0xff]   ;;  %v113_v47 = vunpack.c.h.s8.bf16 %v41_v37  ;;  %v2595_v2 = vld [vmem:[%s3233_s2 + $0xd0] sm:$0xff]  }
  0x1d   :  { %491 = vmatprep.subr.bf16.mxu0 %v2637_v0  ;;  %2456 = vmatprep.subr.bf16.mxu1 %v2637_v0  ;;  %v141_v40 = vunpack.c.l.s8.bf16 %v57_v38  ;;  %v2589_v41 = vld [vmem:[%s3233_s2 + $0xa0] sm:$0xff]   ;;  %v46_v45 = vld [vmem:[#allocation3 + $0x48] sm:$0xff]  ;;  %v145_v48 = vunpack.c.h.s8.bf16 %v57_v38  ;;  %v2600_v21 = vld [vmem:[%s3233_s2 + $0xf8] sm:$0xff]  }
  0x1e   :  { %v62_v46 = vld [vmem:[#allocation3 + $0xc8] sm:$0xff]  ;;  %v118_v50 = vunpack.c.l.s8.bf16 %v46_v45  ;;  %v45_v53 = vld [vmem:[#allocation3 + $0x40] sm:$0xff]  ;;  %v122_v58 = vunpack.c.h.s8.bf16 %v46_v45  ;;  %v39_v22 = vld [vmem:[#allocation3 + $0x10] sm:$0xff] }
  0x1f   :  { %v150_v51 = vunpack.c.l.s8.bf16 %v62_v46  ;;  %v61_v54 = vld [vmem:[#allocation3 + $0xc0] sm:$0xff]  ;;  %v117_v55 = vunpack.c.l.s8.bf16 %v45_v53  ;;  %v154_v59 = vunpack.c.h.s8.bf16 %v62_v46  ;;  %v2594_v60 = vld [vmem:[%s3233_s2 + $0xc8] sm:$0xff]   ;;  %v121_v63 = vunpack.c.h.s8.bf16 %v45_v53  ;;  %v47_v45 = vld [vmem:[#allocation3 + $0x50] sm:$0xff] }
  0x20   :  { %492 = vmatpush1.bf16.msra.mxu0 %v2572_v4  ;;  %2472 = vmatpush1.bf16.msra.mxu1 %v2572_v4  ;;  %v149_v56 = vunpack.c.l.s8.bf16 %v61_v54  ;;  %v2593_v57 = vld [vmem:[%s3233_s2 + $0xc0] sm:$0xff]   ;;  %v50_v61 = vld [vmem:[#allocation3 + $0x68] sm:$0xff]  ;;  %v153_v1 = vunpack.c.h.s8.bf16 %v61_v54  ;;  %v107_v30 = vunpack.c.h.s8.bf16 %v39_v22  ;;  %v123_v54 = vunpack.c.h.s8.bf16 %v47_v45 }
  0x21   :  { %493 = vmatprep.subr.bf16.mxu0 %v2637_v0  ;;  %2457 = vmatprep.subr.bf16.mxu1 %v2637_v0  ;;  %v66_v62 = vld [vmem:[#allocation3 + $0xe8] sm:$0xff]  ;;  %v126_v3 = vunpack.c.l.s8.bf16 %v50_v61  ;;  %v49_v6 = vld [vmem:[#allocation3 + $0x60] sm:$0xff] }
  0x22   :  { %v158_v4 = vunpack.c.l.s8.bf16 %v66_v62  ;;  %v65_v7 = vld [vmem:[#allocation3 + $0xe0] sm:$0xff]  ;;  %v2598_v13 = vld [vmem:[%s3233_s2 + $0xe8] sm:$0xff]  }
  0x23   :  { %v70_v15 = vld [vmem:[#allocation3 + $0x108] sm:$0xff]  ;;  %v77_v46 = vld [vmem:[#allocation3 + $0x140] sm:$0xff] }
  0x24   :  { %494 = vmatpush1.bf16.msra.mxu0 %v2573_v5  ;;  %2473 = vmatpush1.bf16.msra.mxu1 %v2573_v5  ;;  %v2596_v5 = vld [vmem:[%s3233_s2 + $0xd8] sm:$0xff]   ;;  %v74_v29 = vld [vmem:[#allocation3 + $0x128] sm:$0xff] }
  0x25   :  { %495 = vmatprep.subr.bf16.mxu0 %v2637_v0  ;;  %2458 = vmatprep.subr.bf16.mxu1 %v2637_v0  ;;  %v178_v38 = vunpack.c.h.s8.bf16 %v74_v29  ;;  %v82_v53 = vld [vmem:[#allocation3 + $0x168] sm:$0xff] }
  0x28   :  { %496 = vmatpush1.bf16.msra.mxu0 %v2574_v8  ;;  %2474 = vmatpush1.bf16.msra.mxu1 %v2574_v8  ;;  %v125_v8 = vunpack.c.l.s8.bf16 %v49_v6 }
  0x29   :  { %497 = vmatprep.subr.bf16.mxu0 %v2637_v0  ;;  %2459 = vmatprep.subr.bf16.mxu1 %v2637_v0 }
  0x2c   :  { %498 = vmatpush1.bf16.msra.mxu0 %v2575_v9  ;;  %2475 = vmatpush1.bf16.msra.mxu1 %v2575_v9  ;;  %v157_v9 = vunpack.c.l.s8.bf16 %v65_v7 }
  0x2d   :  { %499 = vmatprep.subr.bf16.mxu0 %v2637_v0  ;;  %2460 = vmatprep.subr.bf16.mxu1 %v2637_v0 }
  0x30   :  { %500 = vmatpush1.bf16.msra.mxu0 %v2576_v10  ;;  %2476 = vmatpush1.bf16.msra.mxu1 %v2576_v10  ;;  %v2597_v10 = vld [vmem:[%s3233_s2 + $0xe0] sm:$0xff]  }
  0x31   :  { %501 = vmatprep.subr.bf16.mxu0 %v2637_v0  ;;  %2461 = vmatprep.subr.bf16.mxu1 %v2637_v0 }
  0x34   :  { %502 = vmatpush1.bf16.msra.mxu0 %v2577_v11  ;;  %2477 = vmatpush1.bf16.msra.mxu1 %v2577_v11  ;;  %v130_v11 = vunpack.c.h.s8.bf16 %v50_v61 }
  0x35   :  { %503 = vmatprep.subr.bf16.mxu0 %v2637_v0  ;;  %2462 = vmatprep.subr.bf16.mxu1 %v2637_v0 }
  0x38   :  { %504 = vmatpush1.bf16.msra.mxu0 %v2578_v12  ;;  %2478 = vmatpush1.bf16.msra.mxu1 %v2578_v12  ;;  %v162_v12 = vunpack.c.h.s8.bf16 %v66_v62 }
  0x39   :  { %505 = vmatprep.subr.bf16.mxu0 %v2637_v0  ;;  %2463 = vmatprep.subr.bf16.mxu1 %v2637_v0 }
  0x3c   :  { %506 = vmatpush1.bf16.msra.mxu0 %v2579_v14  ;;  %2479 = vmatpush1.bf16.msra.mxu1 %v2579_v14  ;;  %v40_v14 = vld [vmem:[#allocation3 + $0x18] sm:$0xff] }
  0x3d   :  { %507 = vmatprep.subr.bf16.mxu0 %v2637_v0  ;;  %2464 = vmatprep.subr.bf16.mxu1 %v2637_v0 }
  0x40   :  { %508 = vmatpush1.bf16.msra.mxu0 %v2580_v16  ;;  %2480 = vmatpush1.bf16.msra.mxu1 %v2580_v16  ;;  %v129_v16 = vunpack.c.h.s8.bf16 %v49_v6 }
  0x41   :  { %509 = vmatprep.subr.bf16.mxu0 %v2637_v0  ;;  %2465 = vmatprep.subr.bf16.mxu1 %v2637_v0 }
  0x44   :  { %510 = vmatpush1.bf16.msra.mxu0 %v2581_v17  ;;  %2481 = vmatpush1.bf16.msra.mxu1 %v2581_v17  ;;  %v161_v17 = vunpack.c.h.s8.bf16 %v65_v7  ;;  %v2602_v7 = vld [vmem:[%s3235_s4 + $0x8] sm:$0xff]  }
  0x45   :  { %511 = vmatprep.subr.bf16.mxu0 %v2637_v0  ;;  %2466 = vmatprep.subr.bf16.mxu1 %v2637_v0 }
  0x48   :  { %512 = vmatpush1.bf16.msra.mxu0 %v2582_v18  ;;  %2482 = vmatpush1.bf16.msra.mxu1 %v2582_v18  ;;  %v2599_v18 = vld [vmem:[%s3233_s2 + $0xf0] sm:$0xff]  }
  0x49   :  { %513 = vmatprep.subr.bf16.mxu0 %v2637_v0  ;;  %2467 = vmatprep.subr.bf16.mxu1 %v2637_v0 }
  0x4c   :  { %514 = vmatpush1.bf16.msra.mxu0 %v2583_v19  ;;  %2483 = vmatpush1.bf16.msra.mxu1 %v2583_v19  ;;  %v104_v19 = vunpack.c.l.s8.bf16 %v40_v14 }
  0x4d   :  { %515 = vmatprep.subr.bf16.mxu0 %v2637_v0  ;;  %2468 = vmatprep.subr.bf16.mxu1 %v2637_v0 }
  0x50   :  { %516 = vmatpush1.bf16.msra.mxu0 %v2584_v20  ;;  %2484 = vmatpush1.bf16.msra.mxu1 %v2584_v20  ;;  %v166_v20 = vunpack.c.l.s8.bf16 %v70_v15 }
  0x51   :  { %774 = vmatprep.subr.bf16.mxu0 %v2637_v0 }
  0x53   :  { %518 = vmatmul.mubr.bf16.vlgmr.msra.gmra.mrb[0].mxu0 %v101_v23  ;;  %582 = vmatmul.mubr.bf16.vlgmr.msra.gmra.mrb[0].mxu1 %v133_v24  ;;  %v69_v23 = vld [vmem:[#allocation3 + $0x100] sm:$0xff]  ;;  %v103_v24 = vunpack.c.l.s8.bf16 %v39_v22 }
  0x54   :  { %775 = vmatpush1.bf16.msra.mxu0 %v2585_v26  ;;  %525 = vmatprep.mubr.bf16.mxu0 %v106_v25  ;;  %v165_v25 = vunpack.c.l.s8.bf16 %v69_v23  ;;  %v108_v26 = vunpack.c.h.s8.bf16 %v40_v14  ;;  %v60_v14 = vld [vmem:[#allocation3 + $0xb8] sm:$0xff]  ;;  %v89_v22 = vld [vmem:[#allocation3 + $0x1a0] sm:$0xff] }
  0x55   :  { %776 = vmatprep.subr.bf16.mxu0 %v2637_v0  ;;  %589 = vmatprep.mubr.bf16.mxu1 %v138_v27  ;;  %v170_v27 = vunpack.c.h.s8.bf16 %v70_v15  ;;  %v90_v15 = vld [vmem:[#allocation3 + $0x1a8] sm:$0xff] }
  0x58   :  { %777 = vmatpush1.bf16.msra.mxu0 %v2586_v28  ;;  %v44_v28 = vld [vmem:[#allocation3 + $0x38] sm:$0xff] }
  0x59   :  { %778 = vmatprep.subr.bf16.mxu0 %v2637_v0  ;;  %v116_v37 = vunpack.c.h.s8.bf16 %v44_v28 }
  0x5b   :  { %526 = vmatmul.mubr.bf16.gmra.mrb[4].mxu0 %v105_v31  ;;  %590 = vmatmul.mubr.bf16.gmra.mrb[4].mxu1 %v137_v32  ;;  %v169_v31 = vunpack.c.h.s8.bf16 %v69_v23  ;;  %v112_v32 = vunpack.c.l.s8.bf16 %v44_v28  ;;  %v64_v28 = vld [vmem:[#allocation3 + $0xd8] sm:$0xff] }
  0x5c   :  { %779 = vmatpush1.bf16.msra.mxu0 %v2587_v33  ;;  %533 = vmatprep.mubr.bf16.mxu0 %v110_v34  ;;  %v174_v33 = vunpack.c.l.s8.bf16 %v74_v29  ;;  %v73_v34 = vld [vmem:[#allocation3 + $0x120] sm:$0xff]  ;;  %v94_v29 = vld [vmem:[#allocation3 + $0x1c8] sm:$0xff] }
  0x5d   :  { %780 = vmatprep.subr.bf16.mxu0 %v2637_v0  ;;  %597 = vmatprep.mubr.bf16.mxu1 %v142_v35 }
  0x60   :  { %781 = vmatpush1.bf16.msra.mxu0 %v2588_v36  ;;  %v173_v36 = vunpack.c.l.s8.bf16 %v73_v34 }
  0x61   :  { %782 = vmatprep.subr.bf16.mxu0 %v2637_v0 }
  0x63   :  { %534 = vmatmul.mubr.bf16.gmra.mrb[8].mxu0 %v109_v39  ;;  %598 = vmatmul.mubr.bf16.gmra.mrb[8].mxu1 %v141_v40  ;;  %v48_v39 = vld [vmem:[#allocation3 + $0x58] sm:$0xff]  ;;  %v78_v40 = vld [vmem:[#allocation3 + $0x148] sm:$0xff] }
  0x64   :  { %783 = vmatpush1.bf16.msra.mxu0 %v2589_v41  ;;  %541 = vmatprep.mubr.bf16.mxu0 %v114_v42  ;;  %v177_v42 = vunpack.c.h.s8.bf16 %v73_v34  ;;  %v2606_v34 = vld [vmem:[%s3235_s4 + $0x28] sm:$0xff]  }
  0x65   :  { %784 = vmatprep.subr.bf16.mxu0 %v2637_v0  ;;  %605 = vmatprep.mubr.bf16.mxu1 %v146_v43  ;;  %v120_v43 = vunpack.c.l.s8.bf16 %v48_v39 }
  0x68   :  { %785 = vmatpush1.bf16.msra.mxu0 %v2590_v44  ;;  %v182_v44 = vunpack.c.l.s8.bf16 %v78_v40 }
  0x69   :  { %786 = vmatprep.subr.bf16.mxu0 %v2637_v0 }
  0x6b   :  { %542 = vmatmul.mubr.bf16.gmra.mrb[12].mxu0 %v113_v47  ;;  %606 = vmatmul.mubr.bf16.gmra.mrb[12].mxu1 %v145_v48  ;;  %v119_v47 = vunpack.c.l.s8.bf16 %v47_v45  ;;  %v181_v48 = vunpack.c.l.s8.bf16 %v77_v46 }
  0x6c   :  { %787 = vmatpush1.bf16.msra.mxu0 %v2591_v49  ;;  %549 = vmatprep.mubr.bf16.mxu0 %v118_v50  ;;  %v124_v49 = vunpack.c.h.s8.bf16 %v48_v39  ;;  %v186_v50 = vunpack.c.h.s8.bf16 %v78_v40  ;;  %v2607_v39 = vld [vmem:[%s3235_s4 + $0x30] sm:$0xff]   ;;  %v156_v40 = vunpack.c.h.s8.bf16 %v64_v28 }
  0x6d   :  { %788 = vmatprep.subr.bf16.mxu0 %v2637_v0  ;;  %613 = vmatprep.mubr.bf16.mxu1 %v150_v51  ;;  %v2601_v51 = vld [vmem:[%s3235_s4] sm:$0xff]  }
  0x6e   :  { %2373 = vmatprep.subr.bf16.mxu1 %v2601_v51 }
  0x6f   :  { %2374 = vmatpush3.bf16.msra.mxu1 %v2601_v51 }
  0x70   :  { %789 = vmatpush1.bf16.msra.mxu0 %v2592_v52  ;;  %v52_v52 = vld [vmem:[#allocation3 + $0x78] sm:$0xff]  ;;  %2375 = vmatprep.subr.bf16.mxu1 %v2602_v7 }
  0x71   :  { %790 = vmatprep.subr.bf16.mxu0 %v2637_v0  ;;  %v132_v62 = vunpack.c.h.s8.bf16 %v52_v52 }
  0x73   :  { %550 = vmatmul.mubr.bf16.gmra.mrb[16].mxu0 %v117_v55  ;;  %614 = vmatmul.mubr.bf16.gmra.mrb[16].mxu1 %v149_v56  ;;  %v185_v55 = vunpack.c.h.s8.bf16 %v77_v46  ;;  %v128_v56 = vunpack.c.l.s8.bf16 %v52_v52 }
  0x74   :  { %791 = vmatpush1.bf16.msra.mxu0 %v2593_v57  ;;  %557 = vmatprep.mubr.bf16.mxu0 %v122_v58  ;;  %v190_v57 = vunpack.c.l.s8.bf16 %v82_v53  ;;  %v51_v58 = vld [vmem:[#allocation3 + $0x70] sm:$0xff] }
  0x75   :  { %792 = vmatprep.subr.bf16.mxu0 %v2637_v0  ;;  %621 = vmatprep.mubr.bf16.mxu1 %v154_v59  ;;  %v81_v59 = vld [vmem:[#allocation3 + $0x160] sm:$0xff] }
  0x76   :  { %v189_v61 = vunpack.c.l.s8.bf16 %v81_v59  ;;  %2376 = vmatpush3.bf16.msra.mxu1 %v2602_v7 }
  0x78   :  { %793 = vmatpush1.bf16.msra.mxu0 %v2594_v60  ;;  %v127_v60 = vunpack.c.l.s8.bf16 %v51_v58 }
  0x79   :  { %794 = vmatprep.subr.bf16.mxu0 %v2637_v0 }
  0x7b   :  { %558 = vmatmul.mubr.bf16.gmra.mrb[20].mxu0 %v121_v63  ;;  %622 = vmatmul.mubr.bf16.gmra.mrb[20].mxu1 %v153_v1  ;;  %v194_v63 = vunpack.c.h.s8.bf16 %v82_v53  ;;  %v56_v1 = vld [vmem:[#allocation3 + $0x98] sm:$0xff] }
  0x7c   :  { %795 = vmatpush1.bf16.msra.mxu0 %v2595_v2  ;;  %565 = vmatprep.mubr.bf16.mxu0 %v126_v3  ;;  %v86_v2 = vld [vmem:[#allocation3 + $0x188] sm:$0xff]  ;;  %v131_v3 = vunpack.c.h.s8.bf16 %v51_v58 }
  0x7d   :  { %796 = vmatprep.subr.bf16.mxu0 %v2637_v0  ;;  %629 = vmatprep.mubr.bf16.mxu1 %v158_v4  ;;  %v193_v4 = vunpack.c.h.s8.bf16 %v81_v59  ;;  %v198_v6 = vunpack.c.l.s8.bf16 %v86_v2  ;;  %v71_v59 = vld [vmem:[#allocation3 + $0x110] sm:$0xff] }
  0x80   :  { %797 = vmatpush1.bf16.msra.mxu0 %v2596_v5  ;;  %v136_v5 = vunpack.c.l.s8.bf16 %v56_v1 }
  0x81   :  { %798 = vmatprep.subr.bf16.mxu0 %v2637_v0 }
  0x83   :  { %566 = vmatmul.mubr.bf16.gmra.mrb[24].mxu0 %v125_v8  ;;  %630 = vmatmul.mubr.bf16.gmra.mrb[24].mxu1 %v157_v9  ;;  %v55_v8 = vld [vmem:[#allocation3 + $0x90] sm:$0xff]  ;;  %v85_v9 = vld [vmem:[#allocation3 + $0x180] sm:$0xff] }
  0x84   :  { %799 = vmatpush1.bf16.msra.mxu0 %v2597_v10  ;;  %573 = vmatprep.mubr.bf16.mxu0 %v130_v11  ;;  %v135_v10 = vunpack.c.l.s8.bf16 %v55_v8  ;;  %v197_v11 = vunpack.c.l.s8.bf16 %v85_v9 }
  0x85   :  { %800 = vmatprep.subr.bf16.mxu0 %v2637_v0  ;;  %637 = vmatprep.mubr.bf16.mxu1 %v162_v12  ;;  %v140_v12 = vunpack.c.h.s8.bf16 %v56_v1 }
  0x88   :  { %801 = vmatpush1.bf16.msra.mxu0 %v2598_v13  ;;  %v202_v13 = vunpack.c.h.s8.bf16 %v86_v2  ;;  %v75_v2 = vld [vmem:[#allocation3 + $0x130] sm:$0xff] }
  0x89   :  { %802 = vmatprep.subr.bf16.mxu0 %v2637_v0  ;;  %v179_v7 = vunpack.c.h.s8.bf16 %v75_v2 }
  0x8b   :  { %574 = vmatmul.mubr.bf16.gmra.mrb[28].mxu0 %v129_v16  ;;  %638 = vmatmul.mubr.bf16.gmra.mrb[28].mxu1 %v161_v17  ;;  %v139_v16 = vunpack.c.h.s8.bf16 %v55_v8  ;;  %v201_v17 = vunpack.c.h.s8.bf16 %v85_v9 }
  0x8c   :  { %803 = vmatpush1.bf16.msra.mxu0 %v2599_v18  ;;  %806 = vmatprep.mubr.bf16.mxu0 %v104_v19  ;;  %v144_v18 = vunpack.c.l.s8.bf16 %v60_v14  ;;  %v206_v19 = vunpack.c.l.s8.bf16 %v90_v15 }
  0x8d   :  { %804 = vmatprep.subr.bf16.mxu0 %v2637_v0  ;;  %645 = vmatprep.mubr.bf16.mxu1 %v166_v20  ;;  %v43_v0 = vld [vmem:[#allocation3 + $0x30] sm:$0xff] }
  0x8e   :  { %v111_v35 = vunpack.c.l.s8.bf16 %v43_v0  ;;  %v115_v41 = vunpack.c.h.s8.bf16 %v43_v0  ;;  %v2603_v20 = vld [vmem:[%s3235_s4 + $0x10] sm:$0xff]   ;;  %v214_v0 = vunpack.c.l.s8.bf16 %v94_v29 }
  0x8f   :  { %2377 = vmatprep.subr.bf16.mxu1 %v2603_v20 }
  0x90   :  { %805 = vmatpush1.bf16.msra.mxu0 %v2600_v21  ;;  %v59_v21 = vld [vmem:[#allocation3 + $0xb0] sm:$0xff]  ;;  %2378 = vmatpush3.bf16.msra.mxu1 %v2603_v20 }
  0x91   :  { %v143_v23 = vunpack.c.l.s8.bf16 %v59_v21 }
  0x93   :  { %807 = vmatmul.mubr.bf16.vlgmr.msra.gmra.mrb[0].mxu0 %v103_v24  ;;  %646 = vmatmul.mubr.bf16.gmra.mrb[32].mxu1 %v165_v25  ;;  %v205_v24 = vunpack.c.l.s8.bf16 %v89_v22  ;;  %v148_v25 = vunpack.c.h.s8.bf16 %v60_v14 }
  0x94   :  { %814 = vmatprep.mubr.bf16.mxu0 %v108_v26  ;;  %653 = vmatprep.mubr.bf16.mxu1 %v170_v27  ;;  %v210_v26 = vunpack.c.h.s8.bf16 %v90_v15  ;;  %v2604_v27 = vld [vmem:[%s3235_s4 + $0x18] sm:$0xff]  }
  0x95   :  { %2379 = vmatprep.subr.bf16.mxu1 %v2604_v27 }
  0x96   :  { %2380 = vmatpush3.bf16.msra.mxu1 %v2604_v27 }
  0x9b   :  { %815 = vmatmul.mubr.bf16.gmra.mrb[4].mxu0 %v107_v30  ;;  %654 = vmatmul.mubr.bf16.gmra.mrb[36].mxu1 %v169_v31  ;;  %v147_v30 = vunpack.c.h.s8.bf16 %v59_v21  ;;  %v209_v31 = vunpack.c.h.s8.bf16 %v89_v22 }
  0x9c   :  { %822 = vmatprep.mubr.bf16.mxu0 %v112_v32  ;;  %661 = vmatprep.mubr.bf16.mxu1 %v174_v33  ;;  %v2605_v32 = vld [vmem:[%s3235_s4 + $0x20] sm:$0xff]   ;;  %v152_v33 = vunpack.c.l.s8.bf16 %v64_v28 }
  0x9d   :  { %2381 = vmatprep.subr.bf16.mxu1 %v2605_v32 }
  0x9e   :  { %2382 = vmatpush3.bf16.msra.mxu1 %v2605_v32 }
  0x9f   :  { %2383 = vmatprep.subr.bf16.mxu1 %v2606_v34 }
  0xa2   :  { %2384 = vmatpush3.bf16.msra.mxu1 %v2606_v34 }
  0xa3   :  { %823 = vmatmul.mubr.bf16.gmra.mrb[8].mxu0 %v111_v35  ;;  %662 = vmatmul.mubr.bf16.gmra.mrb[40].mxu1 %v173_v36  ;;  %v63_v35 = vld [vmem:[#allocation3 + $0xd0] sm:$0xff]  ;;  %v93_v36 = vld [vmem:[#allocation3 + $0x1c0] sm:$0xff] }
  0xa4   :  { %830 = vmatprep.mubr.bf16.mxu0 %v116_v37  ;;  %669 = vmatprep.mubr.bf16.mxu1 %v178_v38  ;;  %v151_v37 = vunpack.c.l.s8.bf16 %v63_v35  ;;  %v213_v38 = vunpack.c.l.s8.bf16 %v93_v36  ;;  %v155_v45 = vunpack.c.h.s8.bf16 %v63_v35  ;;  %v217_v46 = vunpack.c.h.s8.bf16 %v93_v36 }
  0xa5   :  { %2385 = vmatprep.subr.bf16.mxu1 %v2607_v39 }
  0xa6   :  { %2386 = vmatpush3.bf16.msra.mxu1 %v2607_v39  ;;  %v87_v39 = vld [vmem:[#allocation3 + $0x190] sm:$0xff] }
  0xab   :  { %831 = vmatmul.mubr.bf16.gmra.mrb[12].mxu0 %v115_v41  ;;  %670 = vmatmul.mubr.bf16.gmra.mrb[44].mxu1 %v177_v42  ;;  %v218_v41 = vunpack.c.h.s8.bf16 %v94_v29  ;;  %v2608_v42 = vld [vmem:[%s3235_s4 + $0x38] sm:$0xff]  }
  0xac   :  { %838 = vmatprep.mubr.bf16.mxu0 %v120_v43  ;;  %677 = vmatprep.mubr.bf16.mxu1 %v182_v44  ;;  %v68_v43 = vld [vmem:[#allocation3 + $0xf8] sm:$0xff]  ;;  %v98_v44 = vld [vmem:[#allocation3 + $0x1e8] sm:$0xff] }
  0xad   :  { %2387 = vmatprep.subr.bf16.mxu1 %v2608_v42  ;;  %v164_v53 = vunpack.c.h.s8.bf16 %v68_v43 }
  0xae   :  { %2388 = vmatpush3.bf16.msra.mxu1 %v2608_v42 }
  0xb3   :  { %839 = vmatmul.mubr.bf16.gmra.mrb[16].mxu0 %v119_v47  ;;  %678 = vmatmul.mubr.bf16.gmra.mrb[48].mxu1 %v181_v48  ;;  %v160_v47 = vunpack.c.l.s8.bf16 %v68_v43  ;;  %v222_v48 = vunpack.c.l.s8.bf16 %v98_v44 }
  0xb4   :  { %846 = vmatprep.mubr.bf16.mxu0 %v124_v49  ;;  %685 = vmatprep.mubr.bf16.mxu1 %v186_v50  ;;  %v67_v49 = vld [vmem:[#allocation3 + $0xf0] sm:$0xff]  ;;  %v97_v50 = vld [vmem:[#allocation3 + $0x1e0] sm:$0xff] }
  0xb5   :  { %v159_v51 = vunpack.c.l.s8.bf16 %v67_v49  ;;  %v221_v52 = vunpack.c.l.s8.bf16 %v97_v50 }
  0xbb   :  { %847 = vmatmul.mubr.bf16.gmra.mrb[20].mxu0 %v123_v54  ;;  %686 = vmatmul.mubr.bf16.gmra.mrb[52].mxu1 %v185_v55  ;;  %v226_v54 = vunpack.c.h.s8.bf16 %v98_v44  ;;  %v72_v55 = vld [vmem:[#allocation3 + $0x118] sm:$0xff] }
  0xbc   :  { %854 = vmatprep.mubr.bf16.mxu0 %v128_v56  ;;  %693 = vmatprep.mubr.bf16.mxu1 %v190_v57  ;;  %v163_v56 = vunpack.c.h.s8.bf16 %v67_v49  ;;  %v225_v57 = vunpack.c.h.s8.bf16 %v97_v50  ;;  %v168_v58 = vunpack.c.l.s8.bf16 %v72_v55 }
  0xc3   :  { %855 = vmatmul.mubr.bf16.gmra.mrb[24].mxu0 %v127_v60  ;;  %694 = vmatmul.mubr.bf16.gmra.mrb[56].mxu1 %v189_v61  ;;  %v167_v60 = vunpack.c.l.s8.bf16 %v71_v59  ;;  %v172_v61 = vunpack.c.h.s8.bf16 %v72_v55 }
  0xc4   :  { %862 = vmatprep.mubr.bf16.mxu0 %v132_v62  ;;  %701 = vmatprep.mubr.bf16.mxu1 %v194_v63  ;;  %v76_v62 = vld [vmem:[#allocation3 + $0x138] sm:$0xff]  ;;  %v171_v63 = vunpack.c.h.s8.bf16 %v71_v59 }
  0xc5   :  { %v176_v1 = vunpack.c.l.s8.bf16 %v76_v62 }
  0xcb   :  { %863 = vmatmul.mubr.bf16.gmra.mrb[28].mxu0 %v131_v3  ;;  %702 = vmatmul.mubr.bf16.gmra.mrb[60].mxu1 %v193_v4  ;;  %v175_v3 = vunpack.c.l.s8.bf16 %v75_v2  ;;  %v180_v4 = vunpack.c.h.s8.bf16 %v76_v62 }
  0xcc   :  { %870 = vmatprep.mubr.bf16.mxu0 %v136_v5  ;;  %709 = vmatprep.mubr.bf16.mxu1 %v198_v6  ;;  %v80_v5 = vld [vmem:[#allocation3 + $0x158] sm:$0xff] }
  0xcd   :  { %v184_v9 = vunpack.c.l.s8.bf16 %v80_v5 }
  0xd3   :  { %871 = vmatmul.mubr.bf16.gmra.mrb[32].mxu0 %v135_v10  ;;  %710 = vmatmul.mubr.bf16.gmra.mrb[64].mxu1 %v197_v11 }
  0xd4   :  { %878 = vmatprep.mubr.bf16.mxu0 %v140_v12  ;;  %717 = vmatprep.mubr.bf16.mxu1 %v202_v13  ;;  %v79_v12 = vld [vmem:[#allocation3 + $0x150] sm:$0xff] }
  0xd5   :  { %v183_v14 = vunpack.c.l.s8.bf16 %v79_v12  ;;  %v187_v21 = vunpack.c.h.s8.bf16 %v79_v12 }
  0xdb   :  { %879 = vmatmul.mubr.bf16.gmra.mrb[36].mxu0 %v139_v16  ;;  %718 = vmatmul.mubr.bf16.gmra.mrb[68].mxu1 %v201_v17  ;;  %v188_v16 = vunpack.c.h.s8.bf16 %v80_v5 }
  0xdc   :  { %886 = vmatprep.mubr.bf16.mxu0 %v144_v18  ;;  %725 = vmatprep.mubr.bf16.mxu1 %v206_v19  ;;  %v84_v19 = vld [vmem:[#allocation3 + $0x178] sm:$0xff] }
  0xe3   :  { %887 = vmatmul.mubr.bf16.gmra.mrb[40].mxu0 %v143_v23  ;;  %726 = vmatmul.mubr.bf16.gmra.mrb[72].mxu1 %v205_v24  ;;  %v192_v23 = vunpack.c.l.s8.bf16 %v84_v19 }
  0xe4   :  { %894 = vmatprep.mubr.bf16.mxu0 %v148_v25  ;;  %733 = vmatprep.mubr.bf16.mxu1 %v210_v26  ;;  %v83_v26 = vld [vmem:[#allocation3 + $0x170] sm:$0xff] }
  0xe5   :  { %v191_v28 = vunpack.c.l.s8.bf16 %v83_v26  ;;  %v195_v34 = vunpack.c.h.s8.bf16 %v83_v26 }
  0xeb   :  { %895 = vmatmul.mubr.bf16.gmra.mrb[44].mxu0 %v147_v30  ;;  %734 = vmatmul.mubr.bf16.gmra.mrb[76].mxu1 %v209_v31  ;;  %v196_v30 = vunpack.c.h.s8.bf16 %v84_v19 }
  0xec   :  { %902 = vmatprep.mubr.bf16.mxu0 %v152_v33  ;;  %741 = vmatprep.mubr.bf16.mxu1 %v214_v0  ;;  %v88_v33 = vld [vmem:[#allocation3 + $0x198] sm:$0xff] }
  0xed   :  { %v200_v36 = vunpack.c.l.s8.bf16 %v88_v33  ;;  %v204_v43 = vunpack.c.h.s8.bf16 %v88_v33 }
  0xf3   :  { %903 = vmatmul.mubr.bf16.gmra.mrb[48].mxu0 %v151_v37  ;;  %742 = vmatmul.mubr.bf16.gmra.mrb[80].mxu1 %v213_v38 }
  0xf4   :  { %910 = vmatprep.mubr.bf16.mxu0 %v156_v40  ;;  %749 = vmatprep.mubr.bf16.mxu1 %v218_v41  ;;  %v199_v41 = vunpack.c.l.s8.bf16 %v87_v39 }
  0xfb   :  { %911 = vmatmul.mubr.bf16.gmra.mrb[52].mxu0 %v155_v45  ;;  %750 = vmatmul.mubr.bf16.gmra.mrb[84].mxu1 %v217_v46  ;;  %v92_v46 = vld [vmem:[#allocation3 + $0x1b8] sm:$0xff] }
  0xfc   :  { %918 = vmatprep.mubr.bf16.mxu0 %v160_v47  ;;  %757 = vmatprep.mubr.bf16.mxu1 %v222_v48  ;;  %v203_v48 = vunpack.c.h.s8.bf16 %v87_v39  ;;  %v208_v50 = vunpack.c.l.s8.bf16 %v92_v46 }
 0x103   :  { %919 = vmatmul.mubr.bf16.gmra.mrb[56].mxu0 %v159_v51  ;;  %758 = vmatmul.mubr.bf16.gmra.mrb[88].mxu1 %v221_v52 }
 0x104   :  { %926 = vmatprep.mubr.bf16.mxu0 %v164_v53  ;;  %765 = vmatprep.mubr.bf16.mxu1 %v226_v54  ;;  %v91_v53 = vld [vmem:[#allocation3 + $0x1b0] sm:$0xff] }
 0x105   :  { %v207_v55 = vunpack.c.l.s8.bf16 %v91_v53 }
 0x10b   :  { %927 = vmatmul.mubr.bf16.gmra.mrb[60].mxu0 %v163_v56  ;;  %766 = vmatmul.mubr.bf16.gmra.mrb[92].mxu1 %v225_v57  ;;  %v212_v57 = vunpack.c.h.s8.bf16 %v92_v46 }
 0x10c   :  { %934 = vmatprep.mubr.bf16.mxu0 %v168_v58 }
 0x113   :  { %935 = vmatmul.mubr.bf16.gmra.mrb[64].mxu0 %v167_v60  ;;  %v2887_v60 = vstv %s3231_s0 }
 0x114   :  { %942 = vmatprep.mubr.bf16.mxu0 %v172_v61  ;;  %v96_v61 = vld [vmem:[#allocation3 + $0x1d8] sm:$0xff] }
 0x115   :  { %v220_v33 = vunpack.c.h.s8.bf16 %v96_v61 }
 0x11b   :  { %943 = vmatmul.mubr.bf16.gmra.mrb[68].mxu0 %v171_v63  ;;  %v2892_v63 = vld [vmem:[%s3234_s3] ss:$0 sm:$0xff] }
 0x11c   :  { %950 = vmatprep.mubr.bf16.mxu0 %v176_v1 }
 0x123   :  { %951 = vmatmul.mubr.bf16.gmra.mrb[72].mxu0 %v175_v3 }
 0x124   :  { %958 = vmatprep.mubr.bf16.mxu0 %v180_v4  ;;  %v211_v4 = vunpack.c.h.s8.bf16 %v91_v53 }
 0x126   :  { %v2852_v6 = vpop.f32.mrb[0].mxu1 }
 0x127   :  { %v585_v8 = vpop.f32.mrb[1].mxu1 }
 0x128   :  { %v2854_v10 = vpop.f32.mrb[2].mxu1  ;;  %v216_v8 = vunpack.c.l.s8.bf16 %v96_v61 }
 0x129   :  { %v588_v11 = vpop.f32.mrb[3].mxu1 }
 0x12b   :  { %959 = vmatmul.mubr.bf16.gmra.mrb[76].mxu0 %v179_v7 }
 0x12c   :  { %966 = vmatprep.mubr.bf16.mxu0 %v184_v9 }
 0x12e   :  { %v2856_v13 = vpop.f32.mrb[4].mxu1 }
 0x12f   :  { %v593_v15 = vpop.f32.mrb[5].mxu1 }
 0x130   :  { %v2858_v17 = vpop.f32.mrb[6].mxu1 }
 0x131   :  { %v596_v18 = vpop.f32.mrb[7].mxu1 }
 0x132   :  { %v95_v18 = vld [vmem:[#allocation3 + $0x1d0] sm:$0xff] }
 0x133   :  { %967 = vmatmul.mubr.bf16.gmra.mrb[80].mxu0 %v183_v14  ;;  %v219_v53 = vunpack.c.h.s8.bf16 %v95_v18 }
 0x134   :  { %974 = vmatprep.mubr.bf16.mxu0 %v188_v16 }
 0x136   :  { %v2860_v20 = vpop.f32.mrb[8].mxu1 }
 0x137   :  { %v601_v22 = vpop.f32.mrb[9].mxu1 }
 0x138   :  { %v2862_v24 = vpop.f32.mrb[10].mxu1 }
 0x139   :  { %v604_v25 = vpop.f32.mrb[11].mxu1 }
 0x13b   :  { %975 = vmatmul.mubr.bf16.gmra.mrb[84].mxu0 %v187_v21 }
 0x13c   :  { %982 = vmatprep.mubr.bf16.mxu0 %v192_v23 }
 0x13e   :  { %v2864_v27 = vpop.f32.mrb[12].mxu1 }
 0x13f   :  { %v609_v29 = vpop.f32.mrb[13].mxu1 }
 0x140   :  { %v2866_v31 = vpop.f32.mrb[14].mxu1  ;;  %v215_v29 = vunpack.c.l.s8.bf16 %v95_v18 }
 0x141   :  { %v612_v32 = vpop.f32.mrb[15].mxu1 }
 0x143   :  { %983 = vmatmul.mubr.bf16.gmra.mrb[88].mxu0 %v191_v28 }
 0x144   :  { %990 = vmatprep.mubr.bf16.mxu0 %v196_v30 }
 0x146   :  { %v2868_v0 = vpop.f32.mrb[16].mxu1 }
 0x147   :  { %v617_v35 = vpop.f32.mrb[17].mxu1 }
 0x148   :  { %v2870_v37 = vpop.f32.mrb[18].mxu1 }
 0x149   :  { %v620_v38 = vpop.f32.mrb[19].mxu1 }
 0x14b   :  { %991 = vmatmul.mubr.bf16.gmra.mrb[92].mxu0 %v195_v34 }
 0x14c   :  { %998 = vmatprep.mubr.bf16.mxu0 %v200_v36 }
 0x14e   :  { %v2872_v40 = vpop.f32.mrb[20].mxu1 }
 0x14f   :  { %v625_v42 = vpop.f32.mrb[21].mxu1 }
 0x150   :  { %v2874_v44 = vpop.f32.mrb[22].mxu1 }
 0x151   :  { %v628_v45 = vpop.f32.mrb[23].mxu1 }
 0x152   :  { %v100_v45 = vld [vmem:[#allocation3 + $0x1f8] sm:$0xff] }
 0x153   :  { %999 = vmatmul.mubr.bf16.gmra.mrb[96].mxu0 %v199_v41 }
 0x154   :  { %1006 = vmatprep.mubr.bf16.mxu0 %v204_v43 }
 0x156   :  { %v2876_v47 = vpop.f32.mrb[24].mxu1 }
 0x157   :  { %v633_v49 = vpop.f32.mrb[25].mxu1 }
 0x158   :  { %v2878_v51 = vpop.f32.mrb[26].mxu1 }
 0x159   :  { %v636_v52 = vpop.f32.mrb[27].mxu1 }
 0x15b   :  { %1007 = vmatmul.mubr.bf16.gmra.mrb[100].mxu0 %v203_v48 }
 0x15c   :  { %1014 = vmatprep.mubr.bf16.mxu0 %v208_v50 }
 0x15e   :  { %v2880_v54 = vpop.f32.mrb[28].mxu1 }
 0x15f   :  { %v641_v56 = vpop.f32.mrb[29].mxu1 }
 0x160   :  { %v2882_v58 = vpop.f32.mrb[30].mxu1 }
 0x161   :  { %v644_v59 = vpop.f32.mrb[31].mxu1 }
 0x163   :  { %1015 = vmatmul.mubr.bf16.gmra.mrb[104].mxu0 %v207_v55 }
 0x164   :  { %1022 = vmatprep.mubr.bf16.mxu0 %v212_v57  ;;  %v224_v57 = vunpack.c.l.s8.bf16 %v100_v45 }
 0x166   :  { %v808_v62 = vpop.f32.mrb[0].mxu0  ;;  %v2894_v1 = vpop.f32.mrb[32].mxu1 }
 0x167   :  { %v1064_v2 = vmul.f32 %v2887_v60, %v808_v62  ;;  %v810_v3 = vpop.f32.mrb[1].mxu0  ;;  %v649_v5 = vpop.f32.mrb[33].mxu1 }
 0x168   :  { %v811_v7 = vpop.f32.mrb[2].mxu0  ;;  %v2897_v9 = vpop.f32.mrb[34].mxu1  ;;  %v99_v5 = vld [vmem:[#allocation3 + $0x1f0] sm:$0xff] }
 0x169   :  { %v1135_v11 = vadd.f32 %v2892_v63, %v1064_v2  ;;  %v1065_v12 = vmul.f32 %v2887_v60, %v811_v7  ;;  %v813_v14 = vpop.f32.mrb[3].mxu0  ;;  %v652_v15 = vpop.f32.mrb[35].mxu1  ;;  %v223_v18 = vunpack.c.l.s8.bf16 %v99_v5 }
 0x16b   :  { %v1136_v16 = vadd.f32 %v2892_v63, %v1065_v12  ;;  %1023 = vmatmul.mubr.bf16.gmra.mrb[108].mxu0 %v211_v4  ;;  %v1199_v19 = vmax.f32 %v1135_v11, 0.0 }
 0x16c   :  { %1030 = vmatprep.mubr.bf16.mxu0 %v216_v8 }
 0x16d   :  { %v1200_v21 = vmax.f32 %v1136_v16, 0.0 }
 0x16e   :  { %v816_v22 = vpop.f32.mrb[4].mxu0  ;;  %v2902_v23 = vpop.f32.mrb[36].mxu1 }
 0x16f   :  { %v1066_v25 = vmul.f32 %v2887_v60, %v816_v22  ;;  %v818_v26 = vpop.f32.mrb[5].mxu0  ;;  %v1263_v28 = vpack.c.bf16 %v1200_v21, %v1199_v19  ;;  %v657_v30 = vpop.f32.mrb[37].mxu1  ;;  %v228_v22 = vunpack.c.h.s8.bf16 %v100_v45 }
 0x170   :  { %v819_v32 = vpop.f32.mrb[6].mxu0  ;;  %v2905_v34 = vpop.f32.mrb[38].mxu1 }
 0x171   :  { %v1137_v35 = vadd.f32 %v2892_v63, %v1066_v25  ;;  %v1067_v36 = vmul.f32 %v2887_v60, %v819_v32  ;;  %v821_v38 = vpop.f32.mrb[7].mxu0  ;;  %2389 = vmatprep.mubr.bf16.mxu1 %v1263_v28  ;;  %v660_v39 = vpop.f32.mrb[39].mxu1 }
 0x173   :  { %v1138_v41 = vadd.f32 %v2892_v63, %v1067_v36  ;;  %1031 = vmatmul.mubr.bf16.gmra.mrb[112].mxu0 %v215_v29  ;;  %v1201_v42 = vmax.f32 %v1137_v35, 0.0 }
 0x174   :  { %1038 = vmatprep.mubr.bf16.mxu0 %v220_v33 }
 0x175   :  { %v1202_v43 = vmax.f32 %v1138_v41, 0.0 }
 0x176   :  { %v824_v46 = vpop.f32.mrb[8].mxu0  ;;  %v2910_v48 = vpop.f32.mrb[40].mxu1 }
 0x177   :  { %v1264_v49 = vpack.c.bf16 %v1202_v43, %v1201_v42  ;;  %v1068_v50 = vmul.f32 %v2887_v60, %v824_v46  ;;  %v826_v52 = vpop.f32.mrb[9].mxu0  ;;  %v665_v55 = vpop.f32.mrb[41].mxu1  ;;  %v227_v43 = vunpack.c.h.s8.bf16 %v99_v5 }
 0x178   :  { %v827_v56 = vpop.f32.mrb[10].mxu0  ;;  %v2913_v59 = vpop.f32.mrb[42].mxu1 }
 0x179   :  { %v1139_v61 = vadd.f32 %v2892_v63, %v1068_v50  ;;  %v1069_v62 = vmul.f32 %v2887_v60, %v827_v56  ;;  %v829_v2 = vpop.f32.mrb[11].mxu0  ;;  %2390 = vmatmul.mubr.bf16.vlgmr.msra.gmra.mrb[96].mxu1 %v1264_v49  ;;  %v668_v3 = vpop.f32.mrb[43].mxu1 }
 0x17b   :  { %v1140_v4 = vadd.f32 %v2892_v63, %v1069_v62  ;;  %1039 = vmatmul.mubr.bf16.gmra.mrb[116].mxu0 %v219_v53  ;;  %v1203_v7 = vmax.f32 %v1139_v61, 0.0 }
 0x17c   :  { %1046 = vmatprep.mubr.bf16.mxu0 %v224_v57 }
 0x17d   :  { %v1204_v8 = vmax.f32 %v1140_v4, 0.0 }
 0x17e   :  { %v832_v11 = vpop.f32.mrb[12].mxu0  ;;  %v2918_v12 = vpop.f32.mrb[44].mxu1 }
 0x17f   :  { %v1070_v14 = vmul.f32 %v2887_v60, %v832_v11  ;;  %v834_v15 = vpop.f32.mrb[13].mxu0  ;;  %v1265_v16 = vpack.c.bf16 %v1204_v8, %v1203_v7  ;;  %v673_v19 = vpop.f32.mrb[45].mxu1 }
 0x180   :  { %v835_v21 = vpop.f32.mrb[14].mxu0  ;;  %v2921_v25 = vpop.f32.mrb[46].mxu1 }
 0x181   :  { %v1141_v26 = vadd.f32 %v2892_v63, %v1070_v14  ;;  %v1071_v28 = vmul.f32 %v2887_v60, %v835_v21  ;;  %v837_v29 = vpop.f32.mrb[15].mxu0  ;;  %2393 = vmatprep.mubr.bf16.mxu1 %v1265_v16  ;;  %v676_v30 = vpop.f32.mrb[47].mxu1 }
 0x183   :  { %v1142_v32 = vadd.f32 %v2892_v63, %v1071_v28  ;;  %1047 = vmatmul.mubr.bf16.gmra.mrb[120].mxu0 %v223_v18  ;;  %v1205_v33 = vmax.f32 %v1141_v26, 0.0 }
 0x184   :  { %1054 = vmatprep.mubr.bf16.mxu0 %v228_v22 }
 0x185   :  { %v1206_v35 = vmax.f32 %v1142_v32, 0.0 }
 0x186   :  { %v840_v36 = vpop.f32.mrb[16].mxu0  ;;  %v2926_v38 = vpop.f32.mrb[48].mxu1 }
 0x187   :  { %v1072_v39 = vmul.f32 %v2887_v60, %v840_v36  ;;  %v842_v41 = vpop.f32.mrb[17].mxu0  ;;  %v1266_v42 = vpack.c.bf16 %v1206_v35, %v1205_v33  ;;  %v681_v45 = vpop.f32.mrb[49].mxu1 }
 0x188   :  { %v843_v46 = vpop.f32.mrb[18].mxu0  ;;  %v2929_v49 = vpop.f32.mrb[50].mxu1 }
 0x189   :  { %v1143_v50 = vadd.f32 %v2892_v63, %v1072_v39  ;;  %v1073_v52 = vmul.f32 %v2887_v60, %v843_v46  ;;  %v845_v53 = vpop.f32.mrb[19].mxu0  ;;  %2394 = vmatmul.mubr.bf16.gmra.mrb[100].mxu1 %v1266_v42  ;;  %v684_v55 = vpop.f32.mrb[51].mxu1 }
 0x18b   :  { %v1144_v56 = vadd.f32 %v2892_v63, %v1073_v52  ;;  %1055 = vmatmul.mubr.bf16.gmra.mrb[124].mxu0 %v227_v43  ;;  %v1207_v57 = vmax.f32 %v1143_v50, 0.0 }
 0x18d   :  { %v1208_v61 = vmax.f32 %v1144_v56, 0.0 }
 0x18e   :  { %v848_v62 = vpop.f32.mrb[20].mxu0  ;;  %v2934_v2 = vpop.f32.mrb[52].mxu1 }
 0x18f   :  { %v1074_v3 = vmul.f32 %v2887_v60, %v848_v62  ;;  %v850_v4 = vpop.f32.mrb[21].mxu0  ;;  %v1267_v5 = vpack.c.bf16 %v1208_v61, %v1207_v57  ;;  %v689_v7 = vpop.f32.mrb[53].mxu1 }
 0x190   :  { %v851_v8 = vpop.f32.mrb[22].mxu0  ;;  %v2937_v11 = vpop.f32.mrb[54].mxu1 }
 0x191   :  { %v1145_v14 = vadd.f32 %v2892_v63, %v1074_v3  ;;  %v1075_v15 = vmul.f32 %v2887_v60, %v851_v8  ;;  %v853_v16 = vpop.f32.mrb[23].mxu0  ;;  %2397 = vmatprep.mubr.bf16.mxu1 %v1267_v5  ;;  %v692_v18 = vpop.f32.mrb[55].mxu1 }
 0x193   :  { %v1146_v19 = vadd.f32 %v2892_v63, %v1075_v15  ;;  %v1209_v21 = vmax.f32 %v1145_v14, 0.0 }
 0x195   :  { %v1210_v22 = vmax.f32 %v1146_v19, 0.0 }
 0x196   :  { %v856_v26 = vpop.f32.mrb[24].mxu0  ;;  %v2942_v28 = vpop.f32.mrb[56].mxu1 }
 0x197   :  { %v1076_v29 = vmul.f32 %v2887_v60, %v856_v26  ;;  %v858_v30 = vpop.f32.mrb[25].mxu0  ;;  %v1268_v32 = vpack.c.bf16 %v1210_v22, %v1209_v21  ;;  %v697_v33 = vpop.f32.mrb[57].mxu1 }
 0x198   :  { %v859_v35 = vpop.f32.mrb[26].mxu0  ;;  %v2945_v36 = vpop.f32.mrb[58].mxu1 }
 0x199   :  { %v1147_v39 = vadd.f32 %v2892_v63, %v1076_v29  ;;  %v1077_v41 = vmul.f32 %v2887_v60, %v859_v35  ;;  %v861_v42 = vpop.f32.mrb[27].mxu0  ;;  %2398 = vmatmul.mubr.bf16.gmra.mrb[104].mxu1 %v1268_v32  ;;  %v700_v43 = vpop.f32.mrb[59].mxu1 }
 0x19b   :  { %v1148_v45 = vadd.f32 %v2892_v63, %v1077_v41  ;;  %v1211_v46 = vmax.f32 %v1147_v39, 0.0 }
 0x19d   :  { %v1212_v50 = vmax.f32 %v1148_v45, 0.0 }
 0x19e   :  { %v864_v52 = vpop.f32.mrb[28].mxu0  ;;  %v2950_v53 = vpop.f32.mrb[60].mxu1 }
 0x19f   :  { %v1078_v55 = vmul.f32 %v2887_v60, %v864_v52  ;;  %v866_v56 = vpop.f32.mrb[29].mxu0  ;;  %v1269_v57 = vpack.c.bf16 %v1212_v50, %v1211_v46  ;;  %v705_v61 = vpop.f32.mrb[61].mxu1 }
 0x1a0   :  { %v867_v62 = vpop.f32.mrb[30].mxu0  ;;  %v2953_v3 = vpop.f32.mrb[62].mxu1 }
 0x1a1   :  { %v1149_v4 = vadd.f32 %v2892_v63, %v1078_v55  ;;  %v1079_v5 = vmul.f32 %v2887_v60, %v867_v62  ;;  %v869_v7 = vpop.f32.mrb[31].mxu0  ;;  %2401 = vmatprep.mubr.bf16.mxu1 %v1269_v57  ;;  %v708_v8 = vpop.f32.mrb[63].mxu1 }
 0x1a3   :  { %v1150_v14 = vadd.f32 %v2892_v63, %v1079_v5  ;;  %v1213_v15 = vmax.f32 %v1149_v4, 0.0 }
 0x1a5   :  { %v1214_v16 = vmax.f32 %v1150_v14, 0.0 }
 0x1a6   :  { %v872_v18 = vpop.f32.mrb[32].mxu0  ;;  %v2958_v19 = vpop.f32.mrb[64].mxu1 }
 0x1a7   :  { %v873_v21 = vadd.f32 %v872_v18, %v2852_v6  ;;  %v874_v22 = vpop.f32.mrb[33].mxu0  ;;  %v1270_v26 = vpack.c.bf16 %v1214_v16, %v1213_v15  ;;  %v713_v29 = vpop.f32.mrb[65].mxu1 }
 0x1a8   :  { %v875_v30 = vpop.f32.mrb[34].mxu0  ;;  %v2961_v32 = vpop.f32.mrb[66].mxu1 }
 0x1a9   :  { %v1080_v33 = vmul.f32 %v2887_v60, %v873_v21  ;;  %v876_v35 = vadd.f32 %v875_v30, %v2854_v10  ;;  %v877_v39 = vpop.f32.mrb[35].mxu0  ;;  %2402 = vmatmul.mubr.bf16.gmra.mrb[108].mxu1 %v1270_v26  ;;  %v716_v41 = vpop.f32.mrb[67].mxu1 }
 0x1ab   :  { %v1151_v42 = vadd.f32 %v2892_v63, %v1080_v33  ;;  %v1081_v43 = vmul.f32 %v2887_v60, %v876_v35 }
 0x1ad   :  { %v1152_v45 = vadd.f32 %v2892_v63, %v1081_v43  ;;  %v1215_v50 = vmax.f32 %v1151_v42, 0.0 }
 0x1ae   :  { %v880_v6 = vpop.f32.mrb[36].mxu0  ;;  %v2968_v46 = vpop.f32.mrb[68].mxu1 }
 0x1af   :  { %v1216_v52 = vmax.f32 %v1152_v45, 0.0  ;;  %v881_v55 = vadd.f32 %v880_v6, %v2856_v13  ;;  %v882_v56 = vpop.f32.mrb[37].mxu0  ;;  %v721_v57 = vpop.f32.mrb[69].mxu1 }
 0x1b0   :  { %v883_v61 = vpop.f32.mrb[38].mxu0  ;;  %v2971_v10 = vpop.f32.mrb[70].mxu1 }
 0x1b1   :  { %v1082_v62 = vmul.f32 %v2887_v60, %v881_v55  ;;  %v884_v4 = vadd.f32 %v883_v61, %v2858_v17  ;;  %v885_v5 = vpop.f32.mrb[39].mxu0  ;;  %v1271_v7 = vpack.c.bf16 %v1216_v52, %v1215_v50  ;;  %v724_v8 = vpop.f32.mrb[71].mxu1 }
 0x1b3   :  { %v1153_v14 = vadd.f32 %v2892_v63, %v1082_v62  ;;  %v1083_v15 = vmul.f32 %v2887_v60, %v884_v4  ;;  %2405 = vmatprep.mubr.bf16.mxu1 %v1271_v7 }
 0x1b5   :  { %v1154_v16 = vadd.f32 %v2892_v63, %v1083_v15  ;;  %v1217_v21 = vmax.f32 %v1153_v14, 0.0 }
 0x1b6   :  { %v888_v13 = vpop.f32.mrb[40].mxu0  ;;  %v2978_v18 = vpop.f32.mrb[72].mxu1 }
 0x1b7   :  { %v1218_v22 = vmax.f32 %v1154_v16, 0.0  ;;  %v889_v26 = vadd.f32 %v888_v13, %v2860_v20  ;;  %v890_v29 = vpop.f32.mrb[41].mxu0  ;;  %v729_v30 = vpop.f32.mrb[73].mxu1 }
 0x1b8   :  { %v891_v17 = vpop.f32.mrb[42].mxu0  ;;  %v2981_v33 = vpop.f32.mrb[74].mxu1 }
 0x1b9   :  { %v1084_v35 = vmul.f32 %v2887_v60, %v889_v26  ;;  %v892_v39 = vadd.f32 %v891_v17, %v2862_v24  ;;  %v893_v41 = vpop.f32.mrb[43].mxu0  ;;  %v1272_v42 = vpack.c.bf16 %v1218_v22, %v1217_v21  ;;  %v732_v43 = vpop.f32.mrb[75].mxu1 }
 0x1bb   :  { %v1155_v45 = vadd.f32 %v2892_v63, %v1084_v35  ;;  %v1085_v6 = vmul.f32 %v2887_v60, %v892_v39  ;;  %2406 = vmatmul.mubr.bf16.gmra.mrb[112].mxu1 %v1272_v42 }
 0x1bd   :  { %v1156_v50 = vadd.f32 %v2892_v63, %v1085_v6  ;;  %v1219_v55 = vmax.f32 %v1155_v45, 0.0 }
 0x1be   :  { %v896_v20 = vpop.f32.mrb[44].mxu0  ;;  %v2988_v52 = vpop.f32.mrb[76].mxu1 }
 0x1bf   :  { %v1220_v56 = vmax.f32 %v1156_v50, 0.0  ;;  %v897_v57 = vadd.f32 %v896_v20, %v2864_v27  ;;  %v898_v61 = vpop.f32.mrb[45].mxu0  ;;  %v737_v62 = vpop.f32.mrb[77].mxu1 }
 0x1c0   :  { %v899_v24 = vpop.f32.mrb[46].mxu0  ;;  %v2991_v4 = vpop.f32.mrb[78].mxu1 }
 0x1c1   :  { %v1086_v5 = vmul.f32 %v2887_v60, %v897_v57  ;;  %v900_v7 = vadd.f32 %v899_v24, %v2866_v31  ;;  %v901_v8 = vpop.f32.mrb[47].mxu0  ;;  %v1273_v14 = vpack.c.bf16 %v1220_v56, %v1219_v55  ;;  %v740_v15 = vpop.f32.mrb[79].mxu1 }
 0x1c3   :  { %v1157_v16 = vadd.f32 %v2892_v63, %v1086_v5  ;;  %v1087_v13 = vmul.f32 %v2887_v60, %v900_v7  ;;  %2409 = vmatprep.mubr.bf16.mxu1 %v1273_v14 }
 0x1c5   :  { %v1158_v21 = vadd.f32 %v2892_v63, %v1087_v13  ;;  %v1221_v26 = vmax.f32 %v1157_v16, 0.0 }
 0x1c6   :  { %v904_v27 = vpop.f32.mrb[48].mxu0  ;;  %v2998_v22 = vpop.f32.mrb[80].mxu1 }
 0x1c7   :  { %v1222_v29 = vmax.f32 %v1158_v21, 0.0  ;;  %v905_v30 = vadd.f32 %v904_v27, %v2868_v0  ;;  %v906_v17 = vpop.f32.mrb[49].mxu0  ;;  %v745_v35 = vpop.f32.mrb[81].mxu1 }
 0x1c8   :  { %v907_v31 = vpop.f32.mrb[50].mxu0  ;;  %v3001_v39 = vpop.f32.mrb[82].mxu1 }
 0x1c9   :  { %v1088_v41 = vmul.f32 %v2887_v60, %v905_v30  ;;  %v908_v42 = vadd.f32 %v907_v31, %v2870_v37  ;;  %v909_v43 = vpop.f32.mrb[51].mxu0  ;;  %v1274_v45 = vpack.c.bf16 %v1222_v29, %v1221_v26  ;;  %v748_v6 = vpop.f32.mrb[83].mxu1 }
 0x1cb   :  { %v1159_v50 = vadd.f32 %v2892_v63, %v1088_v41  ;;  %v1089_v20 = vmul.f32 %v2887_v60, %v908_v42  ;;  %2410 = vmatmul.mubr.bf16.gmra.mrb[116].mxu1 %v1274_v45 }
 0x1cd   :  { %v1160_v55 = vadd.f32 %v2892_v63, %v1089_v20  ;;  %v1223_v57 = vmax.f32 %v1159_v50, 0.0 }
 0x1ce   :  { %v912_v0 = vpop.f32.mrb[52].mxu0  ;;  %v3008_v56 = vpop.f32.mrb[84].mxu1 }
 0x1cf   :  { %v1224_v61 = vmax.f32 %v1160_v55, 0.0  ;;  %v913_v62 = vadd.f32 %v912_v0, %v2872_v40  ;;  %v914_v24 = vpop.f32.mrb[53].mxu0  ;;  %v753_v5 = vpop.f32.mrb[85].mxu1 }
 0x1d0   :  { %v915_v37 = vpop.f32.mrb[54].mxu0  ;;  %v3011_v7 = vpop.f32.mrb[86].mxu1 }
 0x1d1   :  { %v1090_v8 = vmul.f32 %v2887_v60, %v913_v62  ;;  %v916_v14 = vadd.f32 %v915_v37, %v2874_v44  ;;  %v917_v15 = vpop.f32.mrb[55].mxu0  ;;  %v1275_v16 = vpack.c.bf16 %v1224_v61, %v1223_v57  ;;  %v756_v13 = vpop.f32.mrb[87].mxu1 }
 0x1d3   :  { %v1161_v21 = vadd.f32 %v2892_v63, %v1090_v8  ;;  %v1091_v27 = vmul.f32 %v2887_v60, %v916_v14  ;;  %2413 = vmatprep.mubr.bf16.mxu1 %v1275_v16 }
 0x1d5   :  { %v1162_v26 = vadd.f32 %v2892_v63, %v1091_v27  ;;  %v1225_v30 = vmax.f32 %v1161_v21, 0.0 }
 0x1d6   :  { %v920_v40 = vpop.f32.mrb[56].mxu0  ;;  %v3018_v29 = vpop.f32.mrb[88].mxu1 }
 0x1d7   :  { %v1226_v17 = vmax.f32 %v1162_v26, 0.0  ;;  %v921_v35 = vadd.f32 %v920_v40, %v2876_v47  ;;  %v922_v31 = vpop.f32.mrb[57].mxu0  ;;  %v761_v41 = vpop.f32.mrb[89].mxu1 }
 0x1d8   :  { %v923_v44 = vpop.f32.mrb[58].mxu0  ;;  %v3021_v42 = vpop.f32.mrb[90].mxu1 }
 0x1d9   :  { %v1092_v43 = vmul.f32 %v2887_v60, %v921_v35  ;;  %v924_v45 = vadd.f32 %v923_v44, %v2878_v51  ;;  %v925_v6 = vpop.f32.mrb[59].mxu0  ;;  %v1276_v50 = vpack.c.bf16 %v1226_v17, %v1225_v30  ;;  %v764_v20 = vpop.f32.mrb[91].mxu1 }
 0x1db   :  { %v1163_v55 = vadd.f32 %v2892_v63, %v1092_v43  ;;  %v1093_v0 = vmul.f32 %v2887_v60, %v924_v45  ;;  %2414 = vmatmul.mubr.bf16.gmra.mrb[120].mxu1 %v1276_v50 }
 0x1dd   :  { %v1164_v57 = vadd.f32 %v2892_v63, %v1093_v0  ;;  %v1227_v62 = vmax.f32 %v1163_v55, 0.0 }
 0x1de   :  { %v928_v47 = vpop.f32.mrb[60].mxu0  ;;  %v3028_v61 = vpop.f32.mrb[92].mxu1 }
 0x1df   :  { %v1228_v24 = vmax.f32 %v1164_v57, 0.0  ;;  %v929_v5 = vadd.f32 %v928_v47, %v2880_v54  ;;  %v930_v37 = vpop.f32.mrb[61].mxu0  ;;  %v769_v8 = vpop.f32.mrb[93].mxu1 }
 0x1e0   :  { %v931_v51 = vpop.f32.mrb[62].mxu0  ;;  %v3031_v14 = vpop.f32.mrb[94].mxu1 }
 0x1e1   :  { %v1094_v15 = vmul.f32 %v2887_v60, %v929_v5  ;;  %v932_v16 = vadd.f32 %v931_v51, %v2882_v58  ;;  %v933_v13 = vpop.f32.mrb[63].mxu0  ;;  %v1277_v21 = vpack.c.bf16 %v1228_v24, %v1227_v62  ;;  %v772_v27 = vpop.f32.mrb[95].mxu1 }
 0x1e3   :  { %v1165_v26 = vadd.f32 %v2892_v63, %v1094_v15  ;;  %v1095_v40 = vmul.f32 %v2887_v60, %v932_v16  ;;  %2417 = vmatprep.mubr.bf16.mxu1 %v1277_v21 }
 0x1e5   :  { %v1166_v30 = vadd.f32 %v2892_v63, %v1095_v40  ;;  %v1229_v17 = vmax.f32 %v1165_v26, 0.0 }
 0x1e6   :  { %v936_v54 = vpop.f32.mrb[64].mxu0 }
 0x1e7   :  { %v1230_v35 = vmax.f32 %v1166_v30, 0.0  ;;  %v937_v31 = vadd.f32 %v936_v54, %v2894_v1  ;;  %v938_v41 = vpop.f32.mrb[65].mxu0 }
 0x1e8   :  { %v939_v44 = vpop.f32.mrb[66].mxu0 }
 0x1e9   :  { %v1096_v43 = vmul.f32 %v2887_v60, %v937_v31  ;;  %v940_v58 = vadd.f32 %v939_v44, %v2897_v9  ;;  %v941_v45 = vpop.f32.mrb[67].mxu0  ;;  %v1278_v6 = vpack.c.bf16 %v1230_v35, %v1229_v17 }
 0x1eb   :  { %v1167_v50 = vadd.f32 %v2892_v63, %v1096_v43  ;;  %v1097_v20 = vmul.f32 %v2887_v60, %v940_v58  ;;  %2418 = vmatmul.mubr.bf16.gmra.mrb[124].mxu1 %v1278_v6 }
 0x1ed   :  { %v1168_v55 = vadd.f32 %v2892_v63, %v1097_v20  ;;  %v1231_v57 = vmax.f32 %v1167_v50, 0.0 }
 0x1ee   :  { %v944_v0 = vpop.f32.mrb[68].mxu0 }
 0x1ef   :  { %v1232_v47 = vmax.f32 %v1168_v55, 0.0  ;;  %v945_v1 = vadd.f32 %v944_v0, %v2902_v23  ;;  %v946_v62 = vpop.f32.mrb[69].mxu0 }
 0x1f0   :  { %v947_v24 = vpop.f32.mrb[70].mxu0 }
 0x1f1   :  { %v1098_v5 = vmul.f32 %v2887_v60, %v945_v1  ;;  %v948_v9 = vadd.f32 %v947_v24, %v2905_v34  ;;  %v949_v37 = vpop.f32.mrb[71].mxu0  ;;  %v1279_v8 = vpack.c.bf16 %v1232_v47, %v1231_v57 }
 0x1f3   :  { %v1169_v51 = vadd.f32 %v2892_v63, %v1098_v5  ;;  %v1099_v15 = vmul.f32 %v2887_v60, %v948_v9  ;;  %2421 = vmatprep.mubr.bf16.mxu1 %v1279_v8 }
 0x1f5   :  { %v1170_v16 = vadd.f32 %v2892_v63, %v1099_v15  ;;  %v1233_v21 = vmax.f32 %v1169_v51, 0.0 }
 0x1f6   :  { %v952_v13 = vpop.f32.mrb[72].mxu0 }
 0x1f7   :  { %v1234_v27 = vmax.f32 %v1170_v16, 0.0  ;;  %v953_v23 = vadd.f32 %v952_v13, %v2910_v48  ;;  %v954_v26 = vpop.f32.mrb[73].mxu0 }
 0x1f8   :  { %v955_v40 = vpop.f32.mrb[74].mxu0 }
 0x1f9   :  { %v1100_v30 = vmul.f32 %v2887_v60, %v953_v23  ;;  %v956_v34 = vadd.f32 %v955_v40, %v2913_v59  ;;  %v957_v54 = vpop.f32.mrb[75].mxu0  ;;  %v1280_v17 = vpack.c.bf16 %v1234_v27, %v1233_v21 }
 0x1fb   :  { %v1171_v35 = vadd.f32 %v2892_v63, %v1100_v30  ;;  %v1101_v31 = vmul.f32 %v2887_v60, %v956_v34  ;;  %2422 = vmatmul.mubr.bf16.gmra.mrb[128].mxu1 %v1280_v17 }
 0x1fd   :  { %v1172_v41 = vadd.f32 %v2892_v63, %v1101_v31  ;;  %v1235_v43 = vmax.f32 %v1171_v35, 0.0 }
 0x1fe   :  { %v960_v44 = vpop.f32.mrb[76].mxu0 }
 0x1ff   :  { %v1236_v58 = vmax.f32 %v1172_v41, 0.0  ;;  %v961_v48 = vadd.f32 %v960_v44, %v2918_v12  ;;  %v962_v45 = vpop.f32.mrb[77].mxu0 }
 0x200   :  { %v963_v6 = vpop.f32.mrb[78].mxu0 }
 0x201   :  { %v1102_v50 = vmul.f32 %v2887_v60, %v961_v48  ;;  %v964_v59 = vadd.f32 %v963_v6, %v2921_v25  ;;  %v965_v20 = vpop.f32.mrb[79].mxu0  ;;  %v1281_v55 = vpack.c.bf16 %v1236_v58, %v1235_v43 }
 0x203   :  { %v1173_v0 = vadd.f32 %v2892_v63, %v1102_v50  ;;  %v1103_v57 = vmul.f32 %v2887_v60, %v964_v59  ;;  %2425 = vmatprep.mubr.bf16.mxu1 %v1281_v55 }
 0x205   :  { %v1174_v47 = vadd.f32 %v2892_v63, %v1103_v57  ;;  %v1237_v62 = vmax.f32 %v1173_v0, 0.0 }
 0x206   :  { %v968_v1 = vpop.f32.mrb[80].mxu0 }
 0x207   :  { %v1238_v24 = vmax.f32 %v1174_v47, 0.0  ;;  %v969_v12 = vadd.f32 %v968_v1, %v2926_v38  ;;  %v970_v5 = vpop.f32.mrb[81].mxu0 }
 0x208   :  { %v971_v9 = vpop.f32.mrb[82].mxu0 }
 0x209   :  { %v1104_v37 = vmul.f32 %v2887_v60, %v969_v12  ;;  %v972_v25 = vadd.f32 %v971_v9, %v2929_v49  ;;  %v973_v8 = vpop.f32.mrb[83].mxu0  ;;  %v1282_v51 = vpack.c.bf16 %v1238_v24, %v1237_v62 }
 0x20b   :  { %v1175_v15 = vadd.f32 %v2892_v63, %v1104_v37  ;;  %v1105_v16 = vmul.f32 %v2887_v60, %v972_v25  ;;  %2426 = vmatmul.mubr.bf16.gmra.mrb[132].mxu1 %v1282_v51 }
 0x20d   :  { %v1176_v13 = vadd.f32 %v2892_v63, %v1105_v16  ;;  %v1239_v27 = vmax.f32 %v1175_v15, 0.0 }
 0x20e   :  { %v976_v21 = vpop.f32.mrb[84].mxu0 }
 0x20f   :  { %v1240_v23 = vmax.f32 %v1176_v13, 0.0  ;;  %v977_v38 = vadd.f32 %v976_v21, %v2934_v2  ;;  %v978_v26 = vpop.f32.mrb[85].mxu0 }
 0x210   :  { %v979_v40 = vpop.f32.mrb[86].mxu0 }
 0x211   :  { %v1106_v30 = vmul.f32 %v2887_v60, %v977_v38  ;;  %v980_v49 = vadd.f32 %v979_v40, %v2937_v11  ;;  %v981_v34 = vpop.f32.mrb[87].mxu0  ;;  %v1283_v54 = vpack.c.bf16 %v1240_v23, %v1239_v27 }
 0x213   :  { %v1177_v17 = vadd.f32 %v2892_v63, %v1106_v30  ;;  %v1107_v35 = vmul.f32 %v2887_v60, %v980_v49  ;;  %2429 = vmatprep.mubr.bf16.mxu1 %v1283_v54 }
 0x215   :  { %v1178_v31 = vadd.f32 %v2892_v63, %v1107_v35  ;;  %v1241_v44 = vmax.f32 %v1177_v17, 0.0 }
 0x216   :  { %v984_v41 = vpop.f32.mrb[88].mxu0 }
 0x217   :  { %v1242_v43 = vmax.f32 %v1178_v31, 0.0  ;;  %v985_v2 = vadd.f32 %v984_v41, %v2942_v28  ;;  %v986_v58 = vpop.f32.mrb[89].mxu0 }
 0x218   :  { %v987_v48 = vpop.f32.mrb[90].mxu0 }
 0x219   :  { %v1108_v45 = vmul.f32 %v2887_v60, %v985_v2  ;;  %v988_v11 = vadd.f32 %v987_v48, %v2945_v36  ;;  %v989_v6 = vpop.f32.mrb[91].mxu0  ;;  %v1284_v50 = vpack.c.bf16 %v1242_v43, %v1241_v44 }
 0x21b   :  { %v1179_v59 = vadd.f32 %v2892_v63, %v1108_v45  ;;  %v1109_v20 = vmul.f32 %v2887_v60, %v988_v11  ;;  %2430 = vmatmul.mubr.bf16.gmra.mrb[136].mxu1 %v1284_v50 }
 0x21d   :  { %v1180_v55 = vadd.f32 %v2892_v63, %v1109_v20  ;;  %v1243_v57 = vmax.f32 %v1179_v59, 0.0 }
 0x21e   :  { %v992_v0 = vpop.f32.mrb[92].mxu0 }
 0x21f   :  { %v1244_v47 = vmax.f32 %v1180_v55, 0.0  ;;  %v993_v28 = vadd.f32 %v992_v0, %v2950_v53  ;;  %v994_v1 = vpop.f32.mrb[93].mxu0 }
 0x220   :  { %v995_v62 = vpop.f32.mrb[94].mxu0 }
 0x221   :  { %v1110_v24 = vmul.f32 %v2887_v60, %v993_v28  ;;  %v996_v36 = vadd.f32 %v995_v62, %v2953_v3  ;;  %v997_v12 = vpop.f32.mrb[95].mxu0  ;;  %v1285_v5 = vpack.c.bf16 %v1244_v47, %v1243_v57 }
 0x223   :  { %v1181_v9 = vadd.f32 %v2892_v63, %v1110_v24  ;;  %v1111_v37 = vmul.f32 %v2887_v60, %v996_v36  ;;  %2433 = vmatprep.mubr.bf16.mxu1 %v1285_v5 }
 0x225   :  { %v1182_v25 = vadd.f32 %v2892_v63, %v1111_v37  ;;  %v1245_v51 = vmax.f32 %v1181_v9, 0.0 }
 0x226   :  { %v1000_v8 = vpop.f32.mrb[96].mxu0 }
 0x227   :  { %v1246_v15 = vmax.f32 %v1182_v25, 0.0  ;;  %v1001_v53 = vadd.f32 %v1000_v8, %v2958_v19  ;;  %v1002_v16 = vpop.f32.mrb[97].mxu0 }
 0x228   :  { %v1003_v13 = vpop.f32.mrb[98].mxu0 }
 0x229   :  { %v1112_v21 = vmul.f32 %v2887_v60, %v1001_v53  ;;  %v1004_v3 = vadd.f32 %v1003_v13, %v2961_v32  ;;  %v1005_v27 = vpop.f32.mrb[99].mxu0  ;;  %v1286_v23 = vpack.c.bf16 %v1246_v15, %v1245_v51 }
 0x22b   :  { %v1183_v38 = vadd.f32 %v2892_v63, %v1112_v21  ;;  %v1113_v26 = vmul.f32 %v2887_v60, %v1004_v3  ;;  %2434 = vmatmul.mubr.bf16.gmra.mrb[140].mxu1 %v1286_v23 }
 0x22d   :  { %v1184_v40 = vadd.f32 %v2892_v63, %v1113_v26  ;;  %v1247_v49 = vmax.f32 %v1183_v38, 0.0 }
 0x22e   :  { %v1008_v30 = vpop.f32.mrb[100].mxu0 }
 0x22f   :  { %v1248_v34 = vmax.f32 %v1184_v40, 0.0  ;;  %v1009_v19 = vadd.f32 %v1008_v30, %v2968_v46  ;;  %v1010_v54 = vpop.f32.mrb[101].mxu0 }
 0x230   :  { %v1011_v17 = vpop.f32.mrb[102].mxu0 }
 0x231   :  { %v1114_v35 = vmul.f32 %v2887_v60, %v1009_v19  ;;  %v1012_v32 = vadd.f32 %v1011_v17, %v2971_v10  ;;  %v1013_v31 = vpop.f32.mrb[103].mxu0  ;;  %v1287_v41 = vpack.c.bf16 %v1248_v34, %v1247_v49 }
 0x233   :  { %v1185_v44 = vadd.f32 %v2892_v63, %v1114_v35  ;;  %v1115_v43 = vmul.f32 %v2887_v60, %v1012_v32  ;;  %2437 = vmatprep.mubr.bf16.mxu1 %v1287_v41 }
 0x235   :  { %v1186_v2 = vadd.f32 %v2892_v63, %v1115_v43  ;;  %v1249_v48 = vmax.f32 %v1185_v44, 0.0 }
 0x236   :  { %v1016_v58 = vpop.f32.mrb[104].mxu0 }
 0x237   :  { %v1250_v45 = vmax.f32 %v1186_v2, 0.0  ;;  %v1017_v46 = vadd.f32 %v1016_v58, %v2978_v18  ;;  %v1018_v11 = vpop.f32.mrb[105].mxu0 }
 0x238   :  { %v1019_v6 = vpop.f32.mrb[106].mxu0 }
 0x239   :  { %v1116_v50 = vmul.f32 %v2887_v60, %v1017_v46  ;;  %v1020_v10 = vadd.f32 %v1019_v6, %v2981_v33  ;;  %v1021_v59 = vpop.f32.mrb[107].mxu0  ;;  %v1288_v20 = vpack.c.bf16 %v1250_v45, %v1249_v48 }
 0x23b   :  { %v1187_v55 = vadd.f32 %v2892_v63, %v1116_v50  ;;  %v1117_v0 = vmul.f32 %v2887_v60, %v1020_v10  ;;  %2438 = vmatmul.mubr.bf16.gmra.mrb[144].mxu1 %v1288_v20 }
 0x23d   :  { %v1188_v57 = vadd.f32 %v2892_v63, %v1117_v0  ;;  %v1251_v28 = vmax.f32 %v1187_v55, 0.0 }
 0x23e   :  { %v1024_v47 = vpop.f32.mrb[108].mxu0 }
 0x23f   :  { %v1252_v1 = vmax.f32 %v1188_v57, 0.0  ;;  %v1025_v18 = vadd.f32 %v1024_v47, %v2988_v52  ;;  %v1026_v62 = vpop.f32.mrb[109].mxu0 }
 0x240   :  { %v1027_v24 = vpop.f32.mrb[110].mxu0 }
 0x241   :  { %v1118_v36 = vmul.f32 %v2887_v60, %v1025_v18  ;;  %v1028_v33 = vadd.f32 %v1027_v24, %v2991_v4  ;;  %v1029_v12 = vpop.f32.mrb[111].mxu0  ;;  %v1289_v5 = vpack.c.bf16 %v1252_v1, %v1251_v28 }
 0x243   :  { %v1189_v9 = vadd.f32 %v2892_v63, %v1118_v36  ;;  %v1119_v37 = vmul.f32 %v2887_v60, %v1028_v33  ;;  %2441 = vmatprep.mubr.bf16.mxu1 %v1289_v5 }
 0x245   :  { %v1190_v25 = vadd.f32 %v2892_v63, %v1119_v37  ;;  %v1253_v51 = vmax.f32 %v1189_v9, 0.0 }
 0x246   :  { %v1032_v8 = vpop.f32.mrb[112].mxu0 }
 0x247   :  { %v1254_v15 = vmax.f32 %v1190_v25, 0.0  ;;  %v1033_v52 = vadd.f32 %v1032_v8, %v2998_v22  ;;  %v1034_v53 = vpop.f32.mrb[113].mxu0 }
 0x248   :  { %v1035_v16 = vpop.f32.mrb[114].mxu0 }
 0x249   :  { %v1120_v13 = vmul.f32 %v2887_v60, %v1033_v52  ;;  %v1036_v4 = vadd.f32 %v1035_v16, %v3001_v39  ;;  %v1037_v21 = vpop.f32.mrb[115].mxu0  ;;  %v1290_v3 = vpack.c.bf16 %v1254_v15, %v1253_v51 }
 0x24b   :  { %v1191_v27 = vadd.f32 %v2892_v63, %v1120_v13  ;;  %v1121_v23 = vmul.f32 %v2887_v60, %v1036_v4  ;;  %2442 = vmatmul.mubr.bf16.gmra.mrb[148].mxu1 %v1290_v3 }
 0x24c   :  { %v2391_v38 = vpop.f32.mrb[96].mxu1 }
 0x24d   :  { %v1192_v26 = vadd.f32 %v2892_v63, %v1121_v23  ;;  %v1393_v40 = vpop.f32.mrb[97].mxu1  ;;  %v1255_v22 = vmax.f32 %v1191_v27, 0.0 }
 0x24e   :  { %v1040_v30 = vpop.f32.mrb[116].mxu0  ;;  %v2392_v49 = vpop.f32.mrb[98].mxu1 }
 0x24f   :  { %v1256_v34 = vmax.f32 %v1192_v26, 0.0  ;;  %v1041_v19 = vadd.f32 %v1040_v30, %v3008_v56  ;;  %v2150_v54 = vpack.c.bf16 %v2392_v49, %v2391_v38  ;;  %v1042_v17 = vpop.f32.mrb[117].mxu0  ;;  %v1396_v39 = vpop.f32.mrb[99].mxu1 }
 0x250   :  { %v2145_v35 = vpack.c.bf16 %v1396_v39, %v1393_v40  ;;  %v1043_v32 = vpop.f32.mrb[118].mxu0 }
 0x251   :  { %v1122_v31 = vmul.f32 %v2887_v60, %v1041_v19  ;;  %2302 = vst [vmem:[%s3236_s5 + $0x8] sm:$0xff] %v2150_v54   ;;  %v1044_v41 = vadd.f32 %v1043_v32, %v3011_v7  ;;  %v1045_v44 = vpop.f32.mrb[119].mxu0  ;;  %v1291_v43 = vpack.c.bf16 %v1256_v34, %v1255_v22 }
 0x252   :  { %2146 = vst [vmem:[%s3236_s5] sm:$0xff] %v2145_v35  }
 0x253   :  { %v1193_v56 = vadd.f32 %v2892_v63, %v1122_v31  ;;  %v1123_v2 = vmul.f32 %v2887_v60, %v1044_v41  ;;  %2445 = vmatprep.mubr.bf16.mxu1 %v1291_v43 }
 0x255   :  { %v1194_v58 = vadd.f32 %v2892_v63, %v1123_v2  ;;  %v1257_v45 = vmax.f32 %v1193_v56, 0.0 }
 0x256   :  { %v1048_v48 = vpop.f32.mrb[120].mxu0 }
 0x257   :  { %v1258_v46 = vmax.f32 %v1194_v58, 0.0  ;;  %v1049_v11 = vadd.f32 %v1048_v48, %v3018_v29  ;;  %v1050_v6 = vpop.f32.mrb[121].mxu0 }
 0x258   :  { %v1051_v7 = vpop.f32.mrb[122].mxu0 }
 0x259   :  { %v1124_v50 = vmul.f32 %v2887_v60, %v1049_v11  ;;  %v1052_v10 = vadd.f32 %v1051_v7, %v3021_v42  ;;  %v1053_v59 = vpop.f32.mrb[123].mxu0  ;;  %v1292_v20 = vpack.c.bf16 %v1258_v46, %v1257_v45 }
 0x25b   :  { %v1195_v55 = vadd.f32 %v2892_v63, %v1124_v50  ;;  %v1125_v0 = vmul.f32 %v2887_v60, %v1052_v10  ;;  %2446 = vmatmul.mubr.bf16.gmra.mrb[152].mxu1 %v1292_v20 }
 0x25c   :  { %v2395_v57 = vpop.f32.mrb[100].mxu1 }
 0x25d   :  { %v1196_v47 = vadd.f32 %v2892_v63, %v1125_v0  ;;  %v1409_v28 = vpop.f32.mrb[101].mxu1  ;;  %v1259_v29 = vmax.f32 %v1195_v55, 0.0 }
 0x25e   :  { %v1056_v1 = vpop.f32.mrb[124].mxu0  ;;  %v2396_v18 = vpop.f32.mrb[102].mxu1 }
 0x25f   :  { %v1260_v62 = vmax.f32 %v1196_v47, 0.0  ;;  %v1057_v24 = vadd.f32 %v1056_v1, %v3028_v61  ;;  %v2160_v36 = vpack.c.bf16 %v2396_v18, %v2395_v57  ;;  %v1058_v33 = vpop.f32.mrb[125].mxu0  ;;  %v1412_v42 = vpop.f32.mrb[103].mxu1  ;;  %v2609_v61 = vld [vmem:[%s3234_s3] ss:$0 sm:$0xff] }
 0x260   :  { %v2155_v12 = vpack.c.bf16 %v1412_v42, %v1409_v28  ;;  %v1059_v5 = vpop.f32.mrb[126].mxu0 }
 0x261   :  { %v1126_v9 = vmul.f32 %v2887_v60, %v1057_v24  ;;  %2304 = vst [vmem:[%s3236_s5 + $0x18] sm:$0xff] %v2160_v36   ;;  %v1060_v63 = vadd.f32 %v1059_v5, %v3031_v14  ;;  %v1061_v37 = vpop.f32.mrb[127].mxu0  ;;  %v1293_v25 = vpack.c.bf16 %v1260_v62, %v1259_v29 }
 0x262   :  { %2303 = vst [vmem:[%s3236_s5 + $0x10] sm:$0xff] %v2155_v12  }
 0x263   :  { %v1197_v8 = vadd.f32 %v2609_v61, %v1126_v9  ;;  %v1127_v51 = vmul.f32 %v2887_v60, %v1060_v63  ;;  %2449 = vmatprep.mubr.bf16.mxu1 %v1293_v25 }
 0x265   :  { %v1198_v15 = vadd.f32 %v2609_v61, %v1127_v51  ;;  %v1261_v52 = vmax.f32 %v1197_v8, 0.0 }
 0x267   :  { %v1262_v53 = vmax.f32 %v1198_v15, 0.0 }
 0x269   :  { %v1294_v16 = vpack.c.bf16 %v1262_v53, %v1261_v52 }
 0x26b   :  { %2450 = vmatmul.mubr.bf16.gmra.mrb[156].mxu1 %v1294_v16 }
 0x26c   :  { %v2399_v14 = vpop.f32.mrb[104].mxu1 }
 0x26d   :  { %v1425_v13 = vpop.f32.mrb[105].mxu1 }
 0x26e   :  { %v2400_v4 = vpop.f32.mrb[106].mxu1 }
 0x26f   :  { %v2170_v21 = vpack.c.bf16 %v2400_v4, %v2399_v14  ;;  %v1428_v3 = vpop.f32.mrb[107].mxu1 }
 0x270   :  { %v2165_v27 = vpack.c.bf16 %v1428_v3, %v1425_v13 }
 0x271   :  { %2306 = vst [vmem:[%s3236_s5 + $0x28] sm:$0xff] %v2170_v21  }
 0x272   :  { %2305 = vst [vmem:[%s3236_s5 + $0x20] sm:$0xff] %v2165_v27  }
 0x27c   :  { %v2403_v60 = vpop.f32.mrb[108].mxu1 }
 0x27d   :  { %v1441_v23 = vpop.f32.mrb[109].mxu1 }
 0x27e   :  { %v2404_v38 = vpop.f32.mrb[110].mxu1 }
 0x27f   :  { %v2180_v26 = vpack.c.bf16 %v2404_v38, %v2403_v60  ;;  %v1444_v40 = vpop.f32.mrb[111].mxu1 }
 0x280   :  { %v2175_v30 = vpack.c.bf16 %v1444_v40, %v1441_v23 }
 0x281   :  { %2308 = vst [vmem:[%s3236_s5 + $0x38] sm:$0xff] %v2180_v26  }
 0x282   :  { %2307 = vst [vmem:[%s3236_s5 + $0x30] sm:$0xff] %v2175_v30  }
 0x28e   :  { %v2407_v49 = vpop.f32.mrb[112].mxu1 }
 0x28f   :  { %v1457_v22 = vpop.f32.mrb[113].mxu1 }
 0x290   :  { %v2408_v34 = vpop.f32.mrb[114].mxu1 }
 0x291   :  { %v2190_v19 = vpack.c.bf16 %v2408_v34, %v2407_v49  ;;  %v1460_v54 = vpop.f32.mrb[115].mxu1 }
 0x292   :  { %v2185_v17 = vpack.c.bf16 %v1460_v54, %v1457_v22 }
 0x293   :  { %2310 = vst [vmem:[%s3236_s5 + $0x48] sm:$0xff] %v2190_v19  }
 0x294   :  { %2309 = vst [vmem:[%s3236_s5 + $0x40] sm:$0xff] %v2185_v17  }
 0x29e   :  { %v2411_v39 = vpop.f32.mrb[116].mxu1 }
 0x29f   :  { %v1473_v35 = vpop.f32.mrb[117].mxu1 }
 0x2a0   :  { %v2412_v32 = vpop.f32.mrb[118].mxu1 }
 0x2a1   :  { %v2200_v31 = vpack.c.bf16 %v2412_v32, %v2411_v39  ;;  %v1476_v41 = vpop.f32.mrb[119].mxu1 }
 0x2a2   :  { %v2195_v44 = vpack.c.bf16 %v1476_v41, %v1473_v35 }
 0x2a3   :  { %2312 = vst [vmem:[%s3236_s5 + $0x58] sm:$0xff] %v2200_v31  }
 0x2a4   :  { %2311 = vst [vmem:[%s3236_s5 + $0x50] sm:$0xff] %v2195_v44  }
 0x2ae   :  { %v2415_v43 = vpop.f32.mrb[120].mxu1 }
 0x2af   :  { %v1489_v56 = vpop.f32.mrb[121].mxu1 }
 0x2b0   :  { %v2416_v2 = vpop.f32.mrb[122].mxu1 }
 0x2b1   :  { %v2210_v58 = vpack.c.bf16 %v2416_v2, %v2415_v43  ;;  %v1492_v48 = vpop.f32.mrb[123].mxu1 }
 0x2b2   :  { %v2205_v45 = vpack.c.bf16 %v1492_v48, %v1489_v56 }
 0x2b3   :  { %2314 = vst [vmem:[%s3236_s5 + $0x68] sm:$0xff] %v2210_v58  }
 0x2b4   :  { %2313 = vst [vmem:[%s3236_s5 + $0x60] sm:$0xff] %v2205_v45  }
 0x2be   :  { %v2419_v46 = vpop.f32.mrb[124].mxu1 }
 0x2bf   :  { %v1505_v11 = vpop.f32.mrb[125].mxu1 }
 0x2c0   :  { %v2420_v6 = vpop.f32.mrb[126].mxu1 }
 0x2c1   :  { %v2220_v7 = vpack.c.bf16 %v2420_v6, %v2419_v46  ;;  %v1508_v50 = vpop.f32.mrb[127].mxu1 }
 0x2c2   :  { %v2215_v10 = vpack.c.bf16 %v1508_v50, %v1505_v11 }
 0x2c3   :  { %2316 = vst [vmem:[%s3236_s5 + $0x78] sm:$0xff] %v2220_v7  }
 0x2c4   :  { %2315 = vst [vmem:[%s3236_s5 + $0x70] sm:$0xff] %v2215_v10  }
 0x2ce   :  { %v2423_v59 = vpop.f32.mrb[128].mxu1 }
 0x2cf   :  { %v1521_v20 = vpop.f32.mrb[129].mxu1 }
 0x2d0   :  { %v2424_v55 = vpop.f32.mrb[130].mxu1 }
 0x2d1   :  { %v2230_v0 = vpack.c.bf16 %v2424_v55, %v2423_v59  ;;  %v1524_v57 = vpop.f32.mrb[131].mxu1 }
 0x2d2   :  { %v2225_v47 = vpack.c.bf16 %v1524_v57, %v1521_v20 }
 0x2d3   :  { %2318 = vst [vmem:[%s3236_s5 + $0x88] sm:$0xff] %v2230_v0  }
 0x2d4   :  { %2317 = vst [vmem:[%s3236_s5 + $0x80] sm:$0xff] %v2225_v47  }
 0x2de   :  { %v2427_v28 = vpop.f32.mrb[132].mxu1 }
 0x2df   :  { %v1537_v1 = vpop.f32.mrb[133].mxu1 }
 0x2e0   :  { %v2428_v18 = vpop.f32.mrb[134].mxu1 }
 0x2e1   :  { %v2240_v29 = vpack.c.bf16 %v2428_v18, %v2427_v28  ;;  %v1540_v62 = vpop.f32.mrb[135].mxu1 }
 0x2e2   :  { %v2235_v24 = vpack.c.bf16 %v1540_v62, %v1537_v1 }
 0x2e3   :  { %2320 = vst [vmem:[%s3236_s5 + $0x98] sm:$0xff] %v2240_v29  }
 0x2e4   :  { %2319 = vst [vmem:[%s3236_s5 + $0x90] sm:$0xff] %v2235_v24  }
 0x2ee   :  { %v2431_v36 = vpop.f32.mrb[136].mxu1 }
 0x2ef   :  { %v1553_v33 = vpop.f32.mrb[137].mxu1 }
 0x2f0   :  { %v2432_v42 = vpop.f32.mrb[138].mxu1 }
 0x2f1   :  { %v2250_v12 = vpack.c.bf16 %v2432_v42, %v2431_v36  ;;  %v1556_v5 = vpop.f32.mrb[139].mxu1 }
 0x2f2   :  { %v2245_v9 = vpack.c.bf16 %v1556_v5, %v1553_v33 }
 0x2f3   :  { %2322 = vst [vmem:[%s3236_s5 + $0xa8] sm:$0xff] %v2250_v12  }
 0x2f4   :  { %2321 = vst [vmem:[%s3236_s5 + $0xa0] sm:$0xff] %v2245_v9  }
 0x2fe   :  { %v2435_v63 = vpop.f32.mrb[140].mxu1 }
 0x2ff   :  { %v1569_v37 = vpop.f32.mrb[141].mxu1 }
 0x300   :  { %v2436_v25 = vpop.f32.mrb[142].mxu1 }
 0x301   :  { %v2260_v61 = vpack.c.bf16 %v2436_v25, %v2435_v63  ;;  %v1572_v8 = vpop.f32.mrb[143].mxu1 }
 0x302   :  { %v2255_v51 = vpack.c.bf16 %v1572_v8, %v1569_v37 }
 0x303   :  { %2324 = vst [vmem:[%s3236_s5 + $0xb8] sm:$0xff] %v2260_v61  }
 0x304   :  { %2323 = vst [vmem:[%s3236_s5 + $0xb0] sm:$0xff] %v2255_v51  }
 0x30e   :  { %v2439_v15 = vpop.f32.mrb[144].mxu1 }
 0x30f   :  { %v1585_v52 = vpop.f32.mrb[145].mxu1 }
 0x310   :  { %v2440_v53 = vpop.f32.mrb[146].mxu1 }
 0x311   :  { %v2270_v16 = vpack.c.bf16 %v2440_v53, %v2439_v15  ;;  %v1588_v14 = vpop.f32.mrb[147].mxu1 }
 0x312   :  { %v2265_v13 = vpack.c.bf16 %v1588_v14, %v1585_v52 }
 0x313   :  { %2326 = vst [vmem:[%s3236_s5 + $0xc8] sm:$0xff] %v2270_v16  }
 0x314   :  { %2325 = vst [vmem:[%s3236_s5 + $0xc0] sm:$0xff] %v2265_v13  }
 0x31e   :  { %v2443_v4 = vpop.f32.mrb[148].mxu1 }
 0x31f   :  { %v1601_v21 = vpop.f32.mrb[149].mxu1 }
 0x320   :  { %v2444_v3 = vpop.f32.mrb[150].mxu1 }
 0x321   :  { %v2280_v27 = vpack.c.bf16 %v2444_v3, %v2443_v4  ;;  %v1604_v60 = vpop.f32.mrb[151].mxu1 }
 0x322   :  { %v2275_v23 = vpack.c.bf16 %v1604_v60, %v1601_v21 }
 0x323   :  { %2328 = vst [vmem:[%s3236_s5 + $0xd8] sm:$0xff] %v2280_v27  }
 0x324   :  { %2327 = vst [vmem:[%s3236_s5 + $0xd0] sm:$0xff] %v2275_v23  }
 0x32e   :  { %v2447_v38 = vpop.f32.mrb[152].mxu1 }
 0x32f   :  { %v1617_v26 = vpop.f32.mrb[153].mxu1 }
 0x330   :  { %v2448_v40 = vpop.f32.mrb[154].mxu1 }
 0x331   :  { %v2290_v30 = vpack.c.bf16 %v2448_v40, %v2447_v38  ;;  %v1620_v49 = vpop.f32.mrb[155].mxu1 }
 0x332   :  { %v2285_v22 = vpack.c.bf16 %v1620_v49, %v1617_v26 }
 0x333   :  { %2330 = vst [vmem:[%s3236_s5 + $0xe8] sm:$0xff] %v2290_v30  }
 0x334   :  { %2329 = vst [vmem:[%s3236_s5 + $0xe0] sm:$0xff] %v2285_v22  }
 0x33e   :  { %v2451_v34 = vpop.f32.mrb[156].mxu1 }
 0x33f   :  { %v1633_v19 = vpop.f32.mrb[157].mxu1 }
 0x340   :  { %v2452_v54 = vpop.f32.mrb[158].mxu1 }
 0x341   :  { %v2300_v17 = vpack.c.bf16 %v2452_v54, %v2451_v34  ;;  %v1636_v39 = vpop.f32.mrb[159].mxu1 }
 0x342   :  { %v2295_v35 = vpack.c.bf16 %v1636_v39, %v1633_v19 }
 0x343   :  { %2332 = vst [vmem:[%s3236_s5 + $0xf8] sm:$0xff] %v2300_v17  }
 0x344   :  { %2331 = vst [vmem:[%s3236_s5 + $0xf0] sm:$0xff] %v2295_v35  }
 0x345   :  { %1972 = vsyncpa [#allocation4], 1 }

// kernel: gcn_forward.3
= control target key start
LH: loop header
LB: loop body
LE: loop exit
PB: predicated region body
PF: predicated region fallthrough
CT: control target
= control target key end

     0   :  { %v2344_v0 = vmov 0   ;;  %s3668_s2 = inlined_call_operand.vmem [shape: bf16[512,128], index: 2, kind: input, shape index: {}]   ;;  %s3669_s1 = inlined_call_operand.vmem [shape: s8[512,512], index: 1, kind: input, shape index: {}]   ;;  %s3670_s0 = inlined_call_operand.<no memory space> [shape: f32[1,1], index: 0, kind: input, shape index: {}]   ;;  %s3671_s3 = inlined_call_operand.vmem [shape: f32[1,128], index: 3, kind: input, shape index: {}]   ;;  %s3672_s4 = inlined_call_operand.vmem [shape: f32[512,128], index: 4, kind: output, shape index: {}]  }
   0x1   :  { %468 = vmatprep.subr.bf16.mxu1 %v2344_v0  ;;  %757 = vmatprep.subr.bf16.mxu0 %v2344_v0  ;;  %v2055_v1 = vld [vmem:[%s3668_s2] sm:$0xff]   ;;  %v2057_v3 = vld [vmem:[%s3668_s2 + $0x8] sm:$0xff]   ;;  %v2059_v5 = vld [vmem:[%s3668_s2 + $0x10] sm:$0xff]  }
   0x2   :  { %v2056_v2 = vld [vmem:[%s3668_s2 + $0x80] sm:$0xff]   ;;  %469 = vmatpush1.bf16.msra.mxu1 %v2055_v1  ;;  %v2058_v4 = vld [vmem:[%s3668_s2 + $0x88] sm:$0xff]   ;;  %v2060_v6 = vld [vmem:[%s3668_s2 + $0x90] sm:$0xff]  }
   0x3   :  { %758 = vmatpush1.bf16.msra.mxu0 %v2056_v2  ;;  %470 = vmatprep.subr.bf16.mxu1 %v2344_v0  ;;  %v2061_v7 = vld [vmem:[%s3668_s2 + $0x18] sm:$0xff]   ;;  %v2063_v9 = vld [vmem:[%s3668_s2 + $0x20] sm:$0xff]   ;;  %v2065_v11 = vld [vmem:[%s3668_s2 + $0x28] sm:$0xff]  }
   0x4   :  { %759 = vmatprep.subr.bf16.mxu0 %v2344_v0  ;;  %v2062_v8 = vld [vmem:[%s3668_s2 + $0x98] sm:$0xff]   ;;  %v2064_v10 = vld [vmem:[%s3668_s2 + $0xa0] sm:$0xff]   ;;  %v2066_v12 = vld [vmem:[%s3668_s2 + $0xa8] sm:$0xff]  }
   0x5   :  { %v2067_v13 = vld [vmem:[%s3668_s2 + $0x30] sm:$0xff]   ;;  %v2069_v15 = vld [vmem:[%s3668_s2 + $0x38] sm:$0xff]   ;;  %v2071_v17 = vld [vmem:[%s3668_s2 + $0x40] sm:$0xff]  }
   0x6   :  { %471 = vmatpush1.bf16.msra.mxu1 %v2057_v3  ;;  %v2068_v14 = vld [vmem:[%s3668_s2 + $0xb0] sm:$0xff]   ;;  %v2070_v16 = vld [vmem:[%s3668_s2 + $0xb8] sm:$0xff]   ;;  %v2072_v18 = vld [vmem:[%s3668_s2 + $0xc0] sm:$0xff]  }
   0x7   :  { %760 = vmatpush1.bf16.msra.mxu0 %v2058_v4  ;;  %472 = vmatprep.subr.bf16.mxu1 %v2344_v0  ;;  %v21_v19 = vld [vmem:[%s3669_s1 + $0x8] sm:$0xff]  ;;  %v23_v20 = vld [vmem:[%s3669_s1 + $0x18] sm:$0xff]  ;;  %v2075_v25 = vld [vmem:[%s3668_s2 + $0x50] sm:$0xff]  }
   0x8   :  { %761 = vmatprep.subr.bf16.mxu0 %v2344_v0  ;;  %v85_v21 = vunpack.c.l.s8.bf16 %v21_v19  ;;  %v87_v22 = vunpack.c.l.s8.bf16 %v23_v20  ;;  %v2073_v23 = vld [vmem:[%s3668_s2 + $0x48] sm:$0xff]   ;;  %v2076_v26 = vld [vmem:[%s3668_s2 + $0xd0] sm:$0xff]   ;;  %v2077_v27 = vld [vmem:[%s3668_s2 + $0x58] sm:$0xff]   ;;  %v89_v40 = vunpack.c.h.s8.bf16 %v21_v19  ;;  %v91_v42 = vunpack.c.h.s8.bf16 %v23_v20 }
   0x9   :  { %v2074_v24 = vld [vmem:[%s3668_s2 + $0xc8] sm:$0xff]   ;;  %v2078_v28 = vld [vmem:[%s3668_s2 + $0xd8] sm:$0xff]   ;;  %v2079_v29 = vld [vmem:[%s3668_s2 + $0x60] sm:$0xff]  }
   0xa   :  { %473 = vmatpush1.bf16.msra.mxu1 %v2059_v5  ;;  %500 = vmatprep.mubr.bf16.mxu1 %v85_v21  ;;  %v2080_v30 = vld [vmem:[%s3668_s2 + $0xe0] sm:$0xff]   ;;  %v2081_v31 = vld [vmem:[%s3668_s2 + $0x68] sm:$0xff]   ;;  %v2083_v33 = vld [vmem:[%s3668_s2 + $0x70] sm:$0xff]  }
   0xb   :  { %762 = vmatpush1.bf16.msra.mxu0 %v2060_v6  ;;  %474 = vmatprep.subr.bf16.mxu1 %v2344_v0  ;;  %v2082_v32 = vld [vmem:[%s3668_s2 + $0xe8] sm:$0xff]   ;;  %v2084_v34 = vld [vmem:[%s3668_s2 + $0xf0] sm:$0xff]   ;;  %v2085_v35 = vld [vmem:[%s3668_s2 + $0x78] sm:$0xff]  }
   0xc   :  { %763 = vmatprep.subr.bf16.mxu0 %v2344_v0  ;;  %789 = vmatprep.mubr.bf16.mxu0 %v87_v22  ;;  %v20_v36 = vld [vmem:[%s3669_s1] sm:$0xff]  ;;  %v2086_v37 = vld [vmem:[%s3668_s2 + $0xf8] sm:$0xff]   ;;  %v22_v38 = vld [vmem:[%s3669_s1 + $0x10] sm:$0xff] }
   0xd   :  { %v84_v39 = vunpack.c.l.s8.bf16 %v20_v36  ;;  %v86_v41 = vunpack.c.l.s8.bf16 %v22_v38  ;;  %v25_v43 = vld [vmem:[%s3669_s1 + $0x28] sm:$0xff]  ;;  %v27_v44 = vld [vmem:[%s3669_s1 + $0x38] sm:$0xff]  ;;  %v88_v45 = vunpack.c.h.s8.bf16 %v20_v36  ;;  %v90_v46 = vunpack.c.h.s8.bf16 %v22_v38  ;;  %v24_v49 = vld [vmem:[%s3669_s1 + $0x20] sm:$0xff] }
   0xe   :  { %475 = vmatpush1.bf16.msra.mxu1 %v2061_v7  ;;  %v93_v47 = vunpack.c.l.s8.bf16 %v25_v43  ;;  %v95_v48 = vunpack.c.l.s8.bf16 %v27_v44  ;;  %v26_v50 = vld [vmem:[%s3669_s1 + $0x30] sm:$0xff]  ;;  %v92_v51 = vunpack.c.l.s8.bf16 %v24_v49  ;;  %v97_v53 = vunpack.c.h.s8.bf16 %v25_v43  ;;  %v29_v55 = vld [vmem:[%s3669_s1 + $0x48] sm:$0xff]  ;;  %v31_v56 = vld [vmem:[%s3669_s1 + $0x58] sm:$0xff] }
   0xf   :  { %764 = vmatpush1.bf16.msra.mxu0 %v2062_v8  ;;  %476 = vmatprep.subr.bf16.mxu1 %v2344_v0  ;;  %v94_v52 = vunpack.c.l.s8.bf16 %v26_v50  ;;  %v99_v54 = vunpack.c.h.s8.bf16 %v27_v44  ;;  %v96_v57 = vunpack.c.h.s8.bf16 %v24_v49  ;;  %v98_v58 = vunpack.c.h.s8.bf16 %v26_v50  ;;  %v28_v61 = vld [vmem:[%s3669_s1 + $0x40] sm:$0xff]  ;;  %v30_v62 = vld [vmem:[%s3669_s1 + $0x50] sm:$0xff]  ;;  %v33_v3 = vld [vmem:[%s3669_s1 + $0x68] sm:$0xff] }
  0x10   :  { %765 = vmatprep.subr.bf16.mxu0 %v2344_v0  ;;  %v101_v59 = vunpack.c.l.s8.bf16 %v29_v55  ;;  %v103_v60 = vunpack.c.l.s8.bf16 %v31_v56  ;;  %v100_v63 = vunpack.c.l.s8.bf16 %v28_v61  ;;  %v105_v1 = vunpack.c.h.s8.bf16 %v29_v55  ;;  %v35_v4 = vld [vmem:[%s3669_s1 + $0x78] sm:$0xff]  ;;  %v36_v21 = vld [vmem:[%s3669_s1 + $0x80] sm:$0xff]  ;;  %v38_v22 = vld [vmem:[%s3669_s1 + $0x90] sm:$0xff] }
  0x11   :  { %v107_v2 = vunpack.c.h.s8.bf16 %v31_v56  ;;  %v104_v5 = vunpack.c.h.s8.bf16 %v28_v61  ;;  %v106_v6 = vunpack.c.h.s8.bf16 %v30_v62  ;;  %v109_v7 = vunpack.c.l.s8.bf16 %v33_v3 }
  0x12   :  { %477 = vmatpush1.bf16.msra.mxu1 %v2063_v9  ;;  %v111_v8 = vunpack.c.l.s8.bf16 %v35_v4  ;;  %v32_v9 = vld [vmem:[%s3669_s1 + $0x60] sm:$0xff] }
  0x13   :  { %766 = vmatpush1.bf16.msra.mxu0 %v2064_v10  ;;  %478 = vmatprep.subr.bf16.mxu1 %v2344_v0  ;;  %v34_v10 = vld [vmem:[%s3669_s1 + $0x70] sm:$0xff] }
  0x14   :  { %767 = vmatprep.subr.bf16.mxu0 %v2344_v0 }
  0x16   :  { %479 = vmatpush1.bf16.msra.mxu1 %v2065_v11  ;;  %v108_v11 = vunpack.c.l.s8.bf16 %v32_v9 }
  0x17   :  { %768 = vmatpush1.bf16.msra.mxu0 %v2066_v12  ;;  %480 = vmatprep.subr.bf16.mxu1 %v2344_v0  ;;  %v110_v12 = vunpack.c.l.s8.bf16 %v34_v10 }
  0x18   :  { %769 = vmatprep.subr.bf16.mxu0 %v2344_v0 }
  0x1a   :  { %481 = vmatpush1.bf16.msra.mxu1 %v2067_v13  ;;  %v113_v13 = vunpack.c.h.s8.bf16 %v33_v3 }
  0x1b   :  { %770 = vmatpush1.bf16.msra.mxu0 %v2068_v14  ;;  %482 = vmatprep.subr.bf16.mxu1 %v2344_v0  ;;  %v115_v14 = vunpack.c.h.s8.bf16 %v35_v4 }
  0x1c   :  { %771 = vmatprep.subr.bf16.mxu0 %v2344_v0 }
  0x1e   :  { %483 = vmatpush1.bf16.msra.mxu1 %v2069_v15  ;;  %v37_v15 = vld [vmem:[%s3669_s1 + $0x88] sm:$0xff] }
  0x1f   :  { %772 = vmatpush1.bf16.msra.mxu0 %v2070_v16  ;;  %484 = vmatprep.subr.bf16.mxu1 %v2344_v0  ;;  %v39_v16 = vld [vmem:[%s3669_s1 + $0x98] sm:$0xff]  ;;  %v117_v19 = vunpack.c.l.s8.bf16 %v37_v15 }
  0x20   :  { %773 = vmatprep.subr.bf16.mxu0 %v2344_v0  ;;  %v119_v20 = vunpack.c.l.s8.bf16 %v39_v16 }
  0x22   :  { %485 = vmatpush1.bf16.msra.mxu1 %v2071_v17  ;;  %v112_v17 = vunpack.c.h.s8.bf16 %v32_v9 }
  0x23   :  { %774 = vmatpush1.bf16.msra.mxu0 %v2072_v18  ;;  %486 = vmatprep.subr.bf16.mxu1 %v2344_v0  ;;  %v114_v18 = vunpack.c.h.s8.bf16 %v34_v10 }
  0x24   :  { %775 = vmatprep.subr.bf16.mxu0 %v2344_v0 }
  0x26   :  { %487 = vmatpush1.bf16.msra.mxu1 %v2073_v23  ;;  %v116_v23 = vunpack.c.l.s8.bf16 %v36_v21 }
  0x27   :  { %776 = vmatpush1.bf16.msra.mxu0 %v2074_v24  ;;  %488 = vmatprep.subr.bf16.mxu1 %v2344_v0  ;;  %v118_v24 = vunpack.c.l.s8.bf16 %v38_v22 }
  0x28   :  { %777 = vmatprep.subr.bf16.mxu0 %v2344_v0 }
  0x2a   :  { %489 = vmatpush1.bf16.msra.mxu1 %v2075_v25  ;;  %v121_v25 = vunpack.c.h.s8.bf16 %v37_v15 }
  0x2b   :  { %778 = vmatpush1.bf16.msra.mxu0 %v2076_v26  ;;  %490 = vmatprep.subr.bf16.mxu1 %v2344_v0  ;;  %v123_v26 = vunpack.c.h.s8.bf16 %v39_v16 }
  0x2c   :  { %779 = vmatprep.subr.bf16.mxu0 %v2344_v0 }
  0x2e   :  { %491 = vmatpush1.bf16.msra.mxu1 %v2077_v27  ;;  %v41_v27 = vld [vmem:[%s3669_s1 + $0xa8] sm:$0xff] }
  0x2f   :  { %780 = vmatpush1.bf16.msra.mxu0 %v2078_v28  ;;  %492 = vmatprep.subr.bf16.mxu1 %v2344_v0  ;;  %v43_v28 = vld [vmem:[%s3669_s1 + $0xb8] sm:$0xff] }
  0x30   :  { %781 = vmatprep.subr.bf16.mxu0 %v2344_v0  ;;  %v131_v38 = vunpack.c.h.s8.bf16 %v43_v28 }
  0x32   :  { %493 = vmatpush1.bf16.msra.mxu1 %v2079_v29  ;;  %v120_v29 = vunpack.c.h.s8.bf16 %v36_v21 }
  0x33   :  { %782 = vmatpush1.bf16.msra.mxu0 %v2080_v30  ;;  %494 = vmatprep.subr.bf16.mxu1 %v2344_v0  ;;  %v122_v30 = vunpack.c.h.s8.bf16 %v38_v22 }
  0x34   :  { %783 = vmatprep.subr.bf16.mxu0 %v2344_v0 }
  0x36   :  { %495 = vmatpush1.bf16.msra.mxu1 %v2081_v31  ;;  %v125_v31 = vunpack.c.l.s8.bf16 %v41_v27 }
  0x37   :  { %784 = vmatpush1.bf16.msra.mxu0 %v2082_v32  ;;  %496 = vmatprep.subr.bf16.mxu1 %v2344_v0  ;;  %v127_v32 = vunpack.c.l.s8.bf16 %v43_v28 }
  0x38   :  { %785 = vmatprep.subr.bf16.mxu0 %v2344_v0 }
  0x3a   :  { %497 = vmatpush1.bf16.msra.mxu1 %v2083_v33  ;;  %v40_v33 = vld [vmem:[%s3669_s1 + $0xa0] sm:$0xff] }
  0x3b   :  { %786 = vmatpush1.bf16.msra.mxu0 %v2084_v34  ;;  %498 = vmatprep.subr.bf16.mxu1 %v2344_v0  ;;  %v42_v34 = vld [vmem:[%s3669_s1 + $0xb0] sm:$0xff] }
  0x3c   :  { %787 = vmatprep.subr.bf16.mxu0 %v2344_v0  ;;  %v102_v0 = vunpack.c.l.s8.bf16 %v30_v62  ;;  %v126_v36 = vunpack.c.l.s8.bf16 %v42_v34 }
  0x3e   :  { %499 = vmatpush1.bf16.msra.mxu1 %v2085_v35  ;;  %v124_v35 = vunpack.c.l.s8.bf16 %v40_v33 }
  0x3f   :  { %788 = vmatpush1.bf16.msra.mxu0 %v2086_v37  ;;  %v129_v37 = vunpack.c.h.s8.bf16 %v41_v27 }
  0x41   :  { %501 = vmatmul.mubr.bf16.vlgmr.msra.gmra.mrb[0].mxu1 %v84_v39  ;;  %v45_v39 = vld [vmem:[%s3669_s1 + $0xc8] sm:$0xff] }
  0x42   :  { %790 = vmatmul.mubr.bf16.vlgmr.msra.gmra.mrb[0].mxu0 %v86_v41  ;;  %508 = vmatprep.mubr.bf16.mxu1 %v89_v40  ;;  %v47_v40 = vld [vmem:[%s3669_s1 + $0xd8] sm:$0xff]  ;;  %v128_v41 = vunpack.c.h.s8.bf16 %v40_v33  ;;  %v133_v43 = vunpack.c.l.s8.bf16 %v45_v39  ;;  %v137_v49 = vunpack.c.h.s8.bf16 %v45_v39 }
  0x43   :  { %797 = vmatprep.mubr.bf16.mxu0 %v91_v42  ;;  %v130_v42 = vunpack.c.h.s8.bf16 %v42_v34  ;;  %v135_v44 = vunpack.c.l.s8.bf16 %v47_v40  ;;  %v139_v50 = vunpack.c.h.s8.bf16 %v47_v40 }
  0x49   :  { %509 = vmatmul.mubr.bf16.gmra.mrb[4].mxu1 %v88_v45  ;;  %v44_v45 = vld [vmem:[%s3669_s1 + $0xc0] sm:$0xff] }
  0x4a   :  { %798 = vmatmul.mubr.bf16.gmra.mrb[4].mxu0 %v90_v46  ;;  %516 = vmatprep.mubr.bf16.mxu1 %v93_v47  ;;  %v46_v46 = vld [vmem:[%s3669_s1 + $0xd0] sm:$0xff]  ;;  %v132_v47 = vunpack.c.l.s8.bf16 %v44_v45 }
  0x4b   :  { %805 = vmatprep.mubr.bf16.mxu0 %v95_v48  ;;  %v134_v48 = vunpack.c.l.s8.bf16 %v46_v46 }
  0x51   :  { %517 = vmatmul.mubr.bf16.gmra.mrb[8].mxu1 %v92_v51  ;;  %v49_v51 = vld [vmem:[%s3669_s1 + $0xe8] sm:$0xff] }
  0x52   :  { %806 = vmatmul.mubr.bf16.gmra.mrb[8].mxu0 %v94_v52  ;;  %524 = vmatprep.mubr.bf16.mxu1 %v97_v53  ;;  %v51_v52 = vld [vmem:[%s3669_s1 + $0xf8] sm:$0xff]  ;;  %v136_v53 = vunpack.c.h.s8.bf16 %v44_v45  ;;  %v141_v55 = vunpack.c.l.s8.bf16 %v49_v51  ;;  %v145_v61 = vunpack.c.h.s8.bf16 %v49_v51 }
  0x53   :  { %813 = vmatprep.mubr.bf16.mxu0 %v99_v54  ;;  %v138_v54 = vunpack.c.h.s8.bf16 %v46_v46  ;;  %v143_v56 = vunpack.c.l.s8.bf16 %v51_v52  ;;  %v147_v62 = vunpack.c.h.s8.bf16 %v51_v52 }
  0x59   :  { %525 = vmatmul.mubr.bf16.gmra.mrb[12].mxu1 %v96_v57  ;;  %v48_v57 = vld [vmem:[%s3669_s1 + $0xe0] sm:$0xff] }
  0x5a   :  { %814 = vmatmul.mubr.bf16.gmra.mrb[12].mxu0 %v98_v58  ;;  %532 = vmatprep.mubr.bf16.mxu1 %v101_v59  ;;  %v50_v58 = vld [vmem:[%s3669_s1 + $0xf0] sm:$0xff]  ;;  %v140_v59 = vunpack.c.l.s8.bf16 %v48_v57 }
  0x5b   :  { %821 = vmatprep.mubr.bf16.mxu0 %v103_v60  ;;  %v142_v60 = vunpack.c.l.s8.bf16 %v50_v58 }
  0x61   :  { %533 = vmatmul.mubr.bf16.gmra.mrb[16].mxu1 %v100_v63  ;;  %v53_v63 = vld [vmem:[%s3669_s1 + $0x108] sm:$0xff] }
  0x62   :  { %822 = vmatmul.mubr.bf16.gmra.mrb[16].mxu0 %v102_v0  ;;  %540 = vmatprep.mubr.bf16.mxu1 %v105_v1  ;;  %v55_v0 = vld [vmem:[%s3669_s1 + $0x118] sm:$0xff]  ;;  %v144_v1 = vunpack.c.h.s8.bf16 %v48_v57  ;;  %v149_v3 = vunpack.c.l.s8.bf16 %v53_v63  ;;  %v153_v9 = vunpack.c.h.s8.bf16 %v53_v63 }
  0x63   :  { %829 = vmatprep.mubr.bf16.mxu0 %v107_v2  ;;  %v146_v2 = vunpack.c.h.s8.bf16 %v50_v58  ;;  %v151_v4 = vunpack.c.l.s8.bf16 %v55_v0  ;;  %v155_v10 = vunpack.c.h.s8.bf16 %v55_v0 }
  0x69   :  { %541 = vmatmul.mubr.bf16.gmra.mrb[20].mxu1 %v104_v5  ;;  %v52_v5 = vld [vmem:[%s3669_s1 + $0x100] sm:$0xff] }
  0x6a   :  { %830 = vmatmul.mubr.bf16.gmra.mrb[20].mxu0 %v106_v6  ;;  %548 = vmatprep.mubr.bf16.mxu1 %v109_v7  ;;  %v54_v6 = vld [vmem:[%s3669_s1 + $0x110] sm:$0xff]  ;;  %v148_v7 = vunpack.c.l.s8.bf16 %v52_v5 }
  0x6b   :  { %837 = vmatprep.mubr.bf16.mxu0 %v111_v8  ;;  %v150_v8 = vunpack.c.l.s8.bf16 %v54_v6 }
  0x71   :  { %549 = vmatmul.mubr.bf16.gmra.mrb[24].mxu1 %v108_v11  ;;  %v57_v11 = vld [vmem:[%s3669_s1 + $0x128] sm:$0xff] }
  0x72   :  { %838 = vmatmul.mubr.bf16.gmra.mrb[24].mxu0 %v110_v12  ;;  %556 = vmatprep.mubr.bf16.mxu1 %v113_v13  ;;  %v59_v12 = vld [vmem:[%s3669_s1 + $0x138] sm:$0xff]  ;;  %v152_v13 = vunpack.c.h.s8.bf16 %v52_v5  ;;  %v157_v15 = vunpack.c.l.s8.bf16 %v57_v11  ;;  %v161_v21 = vunpack.c.h.s8.bf16 %v57_v11 }
  0x73   :  { %845 = vmatprep.mubr.bf16.mxu0 %v115_v14  ;;  %v154_v14 = vunpack.c.h.s8.bf16 %v54_v6  ;;  %v159_v16 = vunpack.c.l.s8.bf16 %v59_v12  ;;  %v163_v22 = vunpack.c.h.s8.bf16 %v59_v12  ;;  %v2675_v12 = vstv %s3670_s0 }
  0x79   :  { %557 = vmatmul.mubr.bf16.gmra.mrb[28].mxu1 %v112_v17  ;;  %v56_v17 = vld [vmem:[%s3669_s1 + $0x120] sm:$0xff] }
  0x7a   :  { %846 = vmatmul.mubr.bf16.gmra.mrb[28].mxu0 %v114_v18  ;;  %564 = vmatprep.mubr.bf16.mxu1 %v117_v19  ;;  %v58_v18 = vld [vmem:[%s3669_s1 + $0x130] sm:$0xff]  ;;  %v156_v19 = vunpack.c.l.s8.bf16 %v56_v17 }
  0x7b   :  { %853 = vmatprep.mubr.bf16.mxu0 %v119_v20  ;;  %v158_v20 = vunpack.c.l.s8.bf16 %v58_v18 }
  0x81   :  { %565 = vmatmul.mubr.bf16.gmra.mrb[32].mxu1 %v116_v23  ;;  %v61_v23 = vld [vmem:[%s3669_s1 + $0x148] sm:$0xff] }
  0x82   :  { %854 = vmatmul.mubr.bf16.gmra.mrb[32].mxu0 %v118_v24  ;;  %572 = vmatprep.mubr.bf16.mxu1 %v121_v25  ;;  %v63_v24 = vld [vmem:[%s3669_s1 + $0x158] sm:$0xff]  ;;  %v160_v25 = vunpack.c.h.s8.bf16 %v56_v17  ;;  %v165_v27 = vunpack.c.l.s8.bf16 %v61_v23  ;;  %v169_v33 = vunpack.c.h.s8.bf16 %v61_v23  ;;  %v2682_v23 = vld [vmem:[%s3671_s3] ss:$0 sm:$0xff] }
  0x83   :  { %861 = vmatprep.mubr.bf16.mxu0 %v123_v26  ;;  %v162_v26 = vunpack.c.h.s8.bf16 %v58_v18  ;;  %v167_v28 = vunpack.c.l.s8.bf16 %v63_v24  ;;  %v171_v34 = vunpack.c.h.s8.bf16 %v63_v24 }
  0x89   :  { %573 = vmatmul.mubr.bf16.gmra.mrb[36].mxu1 %v120_v29  ;;  %v60_v29 = vld [vmem:[%s3669_s1 + $0x140] sm:$0xff] }
  0x8a   :  { %862 = vmatmul.mubr.bf16.gmra.mrb[36].mxu0 %v122_v30  ;;  %580 = vmatprep.mubr.bf16.mxu1 %v125_v31  ;;  %v62_v30 = vld [vmem:[%s3669_s1 + $0x150] sm:$0xff]  ;;  %v164_v31 = vunpack.c.l.s8.bf16 %v60_v29 }
  0x8b   :  { %869 = vmatprep.mubr.bf16.mxu0 %v127_v32  ;;  %v166_v32 = vunpack.c.l.s8.bf16 %v62_v30 }
  0x91   :  { %581 = vmatmul.mubr.bf16.gmra.mrb[40].mxu1 %v124_v35  ;;  %v65_v35 = vld [vmem:[%s3669_s1 + $0x168] sm:$0xff] }
  0x92   :  { %870 = vmatmul.mubr.bf16.gmra.mrb[40].mxu0 %v126_v36  ;;  %588 = vmatprep.mubr.bf16.mxu1 %v129_v37  ;;  %v67_v36 = vld [vmem:[%s3669_s1 + $0x178] sm:$0xff]  ;;  %v168_v37 = vunpack.c.h.s8.bf16 %v60_v29  ;;  %v173_v39 = vunpack.c.l.s8.bf16 %v65_v35  ;;  %v177_v45 = vunpack.c.h.s8.bf16 %v65_v35 }
  0x93   :  { %877 = vmatprep.mubr.bf16.mxu0 %v131_v38  ;;  %v170_v38 = vunpack.c.h.s8.bf16 %v62_v30  ;;  %v175_v40 = vunpack.c.l.s8.bf16 %v67_v36  ;;  %v179_v46 = vunpack.c.h.s8.bf16 %v67_v36  ;;  %v76_v30 = vld [vmem:[%s3669_s1 + $0x1c0] sm:$0xff] }
  0x99   :  { %589 = vmatmul.mubr.bf16.gmra.mrb[44].mxu1 %v128_v41  ;;  %v64_v41 = vld [vmem:[%s3669_s1 + $0x160] sm:$0xff] }
  0x9a   :  { %878 = vmatmul.mubr.bf16.gmra.mrb[44].mxu0 %v130_v42  ;;  %596 = vmatprep.mubr.bf16.mxu1 %v133_v43  ;;  %v66_v42 = vld [vmem:[%s3669_s1 + $0x170] sm:$0xff]  ;;  %v172_v43 = vunpack.c.l.s8.bf16 %v64_v41 }
  0x9b   :  { %885 = vmatprep.mubr.bf16.mxu0 %v135_v44  ;;  %v174_v44 = vunpack.c.l.s8.bf16 %v66_v42 }
  0xa1   :  { %597 = vmatmul.mubr.bf16.gmra.mrb[48].mxu1 %v132_v47  ;;  %v69_v47 = vld [vmem:[%s3669_s1 + $0x188] sm:$0xff] }
  0xa2   :  { %886 = vmatmul.mubr.bf16.gmra.mrb[48].mxu0 %v134_v48  ;;  %604 = vmatprep.mubr.bf16.mxu1 %v137_v49  ;;  %v71_v48 = vld [vmem:[%s3669_s1 + $0x198] sm:$0xff]  ;;  %v176_v49 = vunpack.c.h.s8.bf16 %v64_v41  ;;  %v181_v51 = vunpack.c.l.s8.bf16 %v69_v47  ;;  %v185_v57 = vunpack.c.h.s8.bf16 %v69_v47 }
  0xa3   :  { %893 = vmatprep.mubr.bf16.mxu0 %v139_v50  ;;  %v178_v50 = vunpack.c.h.s8.bf16 %v66_v42  ;;  %v183_v52 = vunpack.c.l.s8.bf16 %v71_v48  ;;  %v187_v58 = vunpack.c.h.s8.bf16 %v71_v48 }
  0xa9   :  { %605 = vmatmul.mubr.bf16.gmra.mrb[52].mxu1 %v136_v53  ;;  %v68_v53 = vld [vmem:[%s3669_s1 + $0x180] sm:$0xff] }
  0xaa   :  { %894 = vmatmul.mubr.bf16.gmra.mrb[52].mxu0 %v138_v54  ;;  %612 = vmatprep.mubr.bf16.mxu1 %v141_v55  ;;  %v70_v54 = vld [vmem:[%s3669_s1 + $0x190] sm:$0xff]  ;;  %v180_v55 = vunpack.c.l.s8.bf16 %v68_v53 }
  0xab   :  { %901 = vmatprep.mubr.bf16.mxu0 %v143_v56  ;;  %v182_v56 = vunpack.c.l.s8.bf16 %v70_v54 }
  0xb1   :  { %613 = vmatmul.mubr.bf16.gmra.mrb[56].mxu1 %v140_v59  ;;  %v73_v59 = vld [vmem:[%s3669_s1 + $0x1a8] sm:$0xff] }
  0xb2   :  { %902 = vmatmul.mubr.bf16.gmra.mrb[56].mxu0 %v142_v60  ;;  %620 = vmatprep.mubr.bf16.mxu1 %v145_v61  ;;  %v75_v60 = vld [vmem:[%s3669_s1 + $0x1b8] sm:$0xff]  ;;  %v184_v61 = vunpack.c.h.s8.bf16 %v68_v53  ;;  %v189_v63 = vunpack.c.l.s8.bf16 %v73_v59  ;;  %v193_v5 = vunpack.c.h.s8.bf16 %v73_v59  ;;  %v200_v59 = vunpack.c.h.s8.bf16 %v76_v30 }
  0xb3   :  { %909 = vmatprep.mubr.bf16.mxu0 %v147_v62  ;;  %v186_v62 = vunpack.c.h.s8.bf16 %v70_v54  ;;  %v191_v0 = vunpack.c.l.s8.bf16 %v75_v60  ;;  %v195_v6 = vunpack.c.h.s8.bf16 %v75_v60 }
  0xb9   :  { %621 = vmatmul.mubr.bf16.gmra.mrb[60].mxu1 %v144_v1  ;;  %v72_v1 = vld [vmem:[%s3669_s1 + $0x1a0] sm:$0xff] }
  0xba   :  { %910 = vmatmul.mubr.bf16.gmra.mrb[60].mxu0 %v146_v2  ;;  %628 = vmatprep.mubr.bf16.mxu1 %v149_v3  ;;  %v74_v2 = vld [vmem:[%s3669_s1 + $0x1b0] sm:$0xff]  ;;  %v188_v3 = vunpack.c.l.s8.bf16 %v72_v1 }
  0xbb   :  { %917 = vmatprep.mubr.bf16.mxu0 %v151_v4  ;;  %v190_v4 = vunpack.c.l.s8.bf16 %v74_v2 }
  0xc1   :  { %629 = vmatmul.mubr.bf16.gmra.mrb[64].mxu1 %v148_v7  ;;  %v1182_v7 = vlaneseq }
  0xc2   :  { %918 = vmatmul.mubr.bf16.gmra.mrb[64].mxu0 %v150_v8  ;;  %636 = vmatprep.mubr.bf16.mxu1 %v153_v9  ;;  %v77_v8 = vld [vmem:[%s3669_s1 + $0x1c8] sm:$0xff] }
  0xc3   :  { %925 = vmatprep.mubr.bf16.mxu0 %v155_v10  ;;  %v79_v10 = vld [vmem:[%s3669_s1 + $0x1d8] sm:$0xff]  ;;  %v201_v42 = vunpack.c.h.s8.bf16 %v77_v8 }
  0xc4   :  { %v199_v24 = vunpack.c.l.s8.bf16 %v79_v10 }
  0xc9   :  { %637 = vmatmul.mubr.bf16.gmra.mrb[68].mxu1 %v152_v13 }
  0xca   :  { %926 = vmatmul.mubr.bf16.gmra.mrb[68].mxu0 %v154_v14  ;;  %644 = vmatprep.mubr.bf16.mxu1 %v157_v15  ;;  %v192_v14 = vunpack.c.h.s8.bf16 %v72_v1  ;;  %v2677_v15 = vand.u32 127, %v1182_v7 }
  0xcb   :  { %933 = vmatprep.mubr.bf16.mxu0 %v159_v16 }
  0xcc   :  { %vm1184_vm0 = vcmp.lt.s32.totalorder %v2677_v15, 7 }
  0xd1   :  { %645 = vmatmul.mubr.bf16.gmra.mrb[72].mxu1 %v156_v19  ;;  %v194_v19 = vunpack.c.h.s8.bf16 %v74_v2 }
  0xd2   :  { %934 = vmatmul.mubr.bf16.gmra.mrb[72].mxu0 %v158_v20  ;;  %652 = vmatprep.mubr.bf16.mxu1 %v161_v21  ;;  %v197_v20 = vunpack.c.l.s8.bf16 %v77_v8 }
  0xd3   :  { %941 = vmatprep.mubr.bf16.mxu0 %v163_v22 }
  0xd9   :  { %653 = vmatmul.mubr.bf16.gmra.mrb[76].mxu1 %v160_v25 }
  0xda   :  { %942 = vmatmul.mubr.bf16.gmra.mrb[76].mxu0 %v162_v26  ;;  %660 = vmatprep.mubr.bf16.mxu1 %v165_v27 }
  0xdb   :  { %949 = vmatprep.mubr.bf16.mxu0 %v167_v28 }
  0xe1   :  { %661 = vmatmul.mubr.bf16.gmra.mrb[80].mxu1 %v164_v31  ;;  %v78_v31 = vld [vmem:[%s3669_s1 + $0x1d0] sm:$0xff] }
  0xe2   :  { %950 = vmatmul.mubr.bf16.gmra.mrb[80].mxu0 %v166_v32  ;;  %668 = vmatprep.mubr.bf16.mxu1 %v169_v33  ;;  %v198_v41 = vunpack.c.l.s8.bf16 %v78_v31 }
  0xe3   :  { %957 = vmatprep.mubr.bf16.mxu0 %v171_v34 }
  0xe9   :  { %669 = vmatmul.mubr.bf16.gmra.mrb[84].mxu1 %v168_v37  ;;  %v196_v37 = vunpack.c.l.s8.bf16 %v76_v30 }
  0xea   :  { %958 = vmatmul.mubr.bf16.gmra.mrb[84].mxu0 %v170_v38  ;;  %676 = vmatprep.mubr.bf16.mxu1 %v173_v39 }
  0xeb   :  { %965 = vmatprep.mubr.bf16.mxu0 %v175_v40 }
  0xf1   :  { %677 = vmatmul.mubr.bf16.gmra.mrb[88].mxu1 %v172_v43 }
  0xf2   :  { %966 = vmatmul.mubr.bf16.gmra.mrb[88].mxu0 %v174_v44  ;;  %684 = vmatprep.mubr.bf16.mxu1 %v177_v45  ;;  %v203_v45 = vunpack.c.h.s8.bf16 %v79_v10  ;;  %v80_v10 = vld [vmem:[%s3669_s1 + $0x1e0] sm:$0xff] }
  0xf3   :  { %973 = vmatprep.mubr.bf16.mxu0 %v179_v46 }
  0xf9   :  { %685 = vmatmul.mubr.bf16.gmra.mrb[92].mxu1 %v176_v49 }
  0xfa   :  { %974 = vmatmul.mubr.bf16.gmra.mrb[92].mxu0 %v178_v50  ;;  %692 = vmatprep.mubr.bf16.mxu1 %v181_v51 }
  0xfb   :  { %981 = vmatprep.mubr.bf16.mxu0 %v183_v52  ;;  %v81_v52 = vld [vmem:[%s3669_s1 + $0x1e8] sm:$0xff] }
 0x101   :  { %693 = vmatmul.mubr.bf16.gmra.mrb[96].mxu1 %v180_v55 }
 0x102   :  { %982 = vmatmul.mubr.bf16.gmra.mrb[96].mxu0 %v182_v56  ;;  %700 = vmatprep.mubr.bf16.mxu1 %v185_v57  ;;  %v83_v56 = vld [vmem:[%s3669_s1 + $0x1f8] sm:$0xff] }
 0x103   :  { %989 = vmatprep.mubr.bf16.mxu0 %v187_v58 }
 0x109   :  { %701 = vmatmul.mubr.bf16.gmra.mrb[100].mxu1 %v184_v61 }
 0x10a   :  { %990 = vmatmul.mubr.bf16.gmra.mrb[100].mxu0 %v186_v62  ;;  %708 = vmatprep.mubr.bf16.mxu1 %v189_v63  ;;  %v202_v63 = vunpack.c.h.s8.bf16 %v78_v31 }
 0x10b   :  { %997 = vmatprep.mubr.bf16.mxu0 %v191_v0  ;;  %v205_v0 = vunpack.c.l.s8.bf16 %v81_v52 }
 0x111   :  { %709 = vmatmul.mubr.bf16.gmra.mrb[104].mxu1 %v188_v3  ;;  %v207_v3 = vunpack.c.l.s8.bf16 %v83_v56 }
 0x112   :  { %998 = vmatmul.mubr.bf16.gmra.mrb[104].mxu0 %v190_v4  ;;  %716 = vmatprep.mubr.bf16.mxu1 %v193_v5 }
 0x113   :  { %1005 = vmatprep.mubr.bf16.mxu0 %v195_v6 }
 0x114   :  { %v502_v9 = vpop.f32.mrb[0].mxu1 }
 0x115   :  { %v791_v11 = vpop.f32.mrb[0].mxu0  ;;  %v504_v13 = vpop.f32.mrb[1].mxu1 }
 0x116   :  { %v792_v16 = vadd.f32 %v791_v11, %v502_v9  ;;  %v793_v17 = vpop.f32.mrb[1].mxu0  ;;  %v505_v18 = vpop.f32.mrb[2].mxu1  ;;  %v82_v11 = vld [vmem:[%s3669_s1 + $0x1f0] sm:$0xff] }
 0x117   :  { %v794_v21 = vpop.f32.mrb[2].mxu0  ;;  %v507_v22 = vpop.f32.mrb[3].mxu1 }
 0x118   :  { %v1047_v25 = vmul.f32 %v2675_v12, %v792_v16  ;;  %v795_v26 = vadd.f32 %v794_v21, %v505_v18  ;;  %v796_v27 = vpop.f32.mrb[3].mxu0 }
 0x119   :  { %717 = vmatmul.mubr.bf16.gmra.mrb[108].mxu1 %v192_v14 }
 0x11a   :  { %v1048_v28 = vmul.f32 %v2675_v12, %v795_v26  ;;  %1006 = vmatmul.mubr.bf16.gmra.mrb[108].mxu0 %v194_v19  ;;  %v1118_v29 = vadd.f32 %v2682_v23, %v1047_v25  ;;  %724 = vmatprep.mubr.bf16.mxu1 %v197_v20  ;;  %v204_v19 = vunpack.c.l.s8.bf16 %v80_v10  ;;  %v206_v25 = vunpack.c.l.s8.bf16 %v82_v11 }
 0x11b   :  { %1013 = vmatprep.mubr.bf16.mxu0 %v199_v24  ;;  %v209_v26 = vunpack.c.h.s8.bf16 %v81_v52 }
 0x11c   :  { %v510_v32 = vpop.f32.mrb[4].mxu1  ;;  %v2696_v33 = vsel %vm1184_vm0, %v1118_v29, -1e+30  ;;  %v1119_v34 = vadd.f32 %v2682_v23, %v1048_v28  ;;  %v211_v29 = vunpack.c.h.s8.bf16 %v83_v56 }
 0x11d   :  { %v799_v35 = vpop.f32.mrb[4].mxu0  ;;  %1249 = vmax.xlane.f32.xlu0 %v2696_v33  ;;  %v512_v36 = vpop.f32.mrb[5].mxu1 }
 0x11e   :  { %v800_v38 = vadd.f32 %v799_v35, %v510_v32  ;;  %v801_v39 = vpop.f32.mrb[5].mxu0  ;;  %v513_v40 = vpop.f32.mrb[6].mxu1  ;;  %v2703_v49 = vsel %vm1184_vm0, %v1119_v34, -1e+30 }
 0x11f   :  { %v802_v43 = vpop.f32.mrb[6].mxu0  ;;  %v515_v44 = vpop.f32.mrb[7].mxu1 }
 0x120   :  { %v1049_v46 = vmul.f32 %v2675_v12, %v800_v38  ;;  %v803_v47 = vadd.f32 %v802_v43, %v513_v40  ;;  %v804_v48 = vpop.f32.mrb[7].mxu0 }
 0x121   :  { %1251 = vmax.xlane.f32.xlu0 %v2703_v49  ;;  %725 = vmatmul.mubr.bf16.gmra.mrb[112].mxu1 %v196_v37 }
 0x122   :  { %v1050_v50 = vmul.f32 %v2675_v12, %v803_v47  ;;  %1014 = vmatmul.mubr.bf16.gmra.mrb[112].mxu0 %v198_v41  ;;  %v1120_v51 = vadd.f32 %v2682_v23, %v1049_v46  ;;  %732 = vmatprep.mubr.bf16.mxu1 %v201_v42  ;;  %v208_v41 = vunpack.c.h.s8.bf16 %v80_v10  ;;  %v210_v46 = vunpack.c.h.s8.bf16 %v82_v11 }
 0x123   :  { %1021 = vmatprep.mubr.bf16.mxu0 %v203_v45 }
 0x124   :  { %v518_v53 = vpop.f32.mrb[8].mxu1  ;;  %v2713_v54 = vsel %vm1184_vm0, %v1120_v51, -1e+30  ;;  %v1121_v55 = vadd.f32 %v2682_v23, %v1050_v50 }
 0x125   :  { %v807_v57 = vpop.f32.mrb[8].mxu0  ;;  %1253 = vmax.xlane.f32.xlu1 %v2713_v54  ;;  %v520_v58 = vpop.f32.mrb[9].mxu1 }
 0x126   :  { %v808_v60 = vadd.f32 %v807_v57, %v518_v53  ;;  %v809_v61 = vpop.f32.mrb[9].mxu0  ;;  %v521_v62 = vpop.f32.mrb[10].mxu1  ;;  %v2723_v7 = vsel %vm1184_vm0, %v1121_v55, -1e+30 }
 0x127   :  { %v810_v1 = vpop.f32.mrb[10].mxu0  ;;  %v523_v2 = vpop.f32.mrb[11].mxu1 }
 0x128   :  { %v1051_v4 = vmul.f32 %v2675_v12, %v808_v60  ;;  %v811_v5 = vadd.f32 %v810_v1, %v521_v62  ;;  %v812_v6 = vpop.f32.mrb[11].mxu0 }
 0x129   :  { %1255 = vmax.xlane.f32.xlu1 %v2723_v7  ;;  %733 = vmatmul.mubr.bf16.gmra.mrb[116].mxu1 %v200_v59 }
 0x12a   :  { %v1052_v8 = vmul.f32 %v2675_v12, %v811_v5  ;;  %1022 = vmatmul.mubr.bf16.gmra.mrb[116].mxu0 %v202_v63  ;;  %v1122_v9 = vadd.f32 %v2682_v23, %v1051_v4  ;;  %740 = vmatprep.mubr.bf16.mxu1 %v205_v0 }
 0x12b   :  { %1029 = vmatprep.mubr.bf16.mxu0 %v207_v3 }
 0x12c   :  { %v526_v13 = vpop.f32.mrb[12].mxu1  ;;  %v2736_v14 = vsel %vm1184_vm0, %v1122_v9, -1e+30  ;;  %v1123_v16 = vadd.f32 %v2682_v23, %v1052_v8 }
 0x12d   :  { %v815_v17 = vpop.f32.mrb[12].mxu0  ;;  %1257 = vmax.xlane.f32.xlu0 %v2736_v14  ;;  %v528_v18 = vpop.f32.mrb[13].mxu1 }
 0x12e   :  { %v816_v20 = vadd.f32 %v815_v17, %v526_v13  ;;  %v817_v21 = vpop.f32.mrb[13].mxu0  ;;  %v529_v22 = vpop.f32.mrb[14].mxu1  ;;  %v2742_v24 = vsel %vm1184_vm0, %v1123_v16, -1e+30 }
 0x12f   :  { %v818_v27 = vpop.f32.mrb[14].mxu0  ;;  %1259 = vmax.xlane.f32.xlu1 %v2742_v24  ;;  %v531_v28 = vpop.f32.mrb[15].mxu1 }
 0x130   :  { %v1053_v30 = vmul.f32 %v2675_v12, %v816_v20  ;;  %v819_v31 = vadd.f32 %v818_v27, %v529_v22  ;;  %v820_v32 = vpop.f32.mrb[15].mxu0 }
 0x131   :  { %741 = vmatmul.mubr.bf16.gmra.mrb[120].mxu1 %v204_v19 }
 0x132   :  { %v1054_v34 = vmul.f32 %v2675_v12, %v819_v31  ;;  %1030 = vmatmul.mubr.bf16.gmra.mrb[120].mxu0 %v206_v25  ;;  %v1124_v35 = vadd.f32 %v2682_v23, %v1053_v30  ;;  %748 = vmatprep.mubr.bf16.mxu1 %v209_v26 }
 0x133   :  { %1037 = vmatprep.mubr.bf16.mxu0 %v211_v29 }
 0x134   :  { %v534_v36 = vpop.f32.mrb[16].mxu1  ;;  %v2750_v37 = vsel %vm1184_vm0, %v1124_v35, -1e+30  ;;  %v1125_v38 = vadd.f32 %v2682_v23, %v1054_v34 }
 0x135   :  { %v823_v39 = vpop.f32.mrb[16].mxu0  ;;  %1261 = vmax.xlane.f32.xlu0 %v2750_v37  ;;  %v536_v40 = vpop.f32.mrb[17].mxu1 }
 0x136   :  { %v824_v42 = vadd.f32 %v823_v39, %v534_v36  ;;  %v825_v43 = vpop.f32.mrb[17].mxu0  ;;  %v537_v44 = vpop.f32.mrb[18].mxu1  ;;  %v2756_v45 = vsel %vm1184_vm0, %v1125_v38, -1e+30 }
 0x137   :  { %v826_v47 = vpop.f32.mrb[18].mxu0  ;;  %1263 = vmax.xlane.f32.xlu1 %v2756_v45  ;;  %v539_v48 = vpop.f32.mrb[19].mxu1 }
 0x138   :  { %v1055_v50 = vmul.f32 %v2675_v12, %v824_v42  ;;  %v827_v51 = vadd.f32 %v826_v47, %v537_v44  ;;  %v828_v52 = vpop.f32.mrb[19].mxu0 }
 0x139   :  { %749 = vmatmul.mubr.bf16.gmra.mrb[124].mxu1 %v208_v41 }
 0x13a   :  { %v1056_v53 = vmul.f32 %v2675_v12, %v827_v51  ;;  %1038 = vmatmul.mubr.bf16.gmra.mrb[124].mxu0 %v210_v46  ;;  %v1126_v55 = vadd.f32 %v2682_v23, %v1055_v50 }
 0x13c   :  { %v542_v56 = vpop.f32.mrb[20].mxu1  ;;  %v2764_v57 = vsel %vm1184_vm0, %v1126_v55, -1e+30  ;;  %v1127_v58 = vadd.f32 %v2682_v23, %v1056_v53 }
 0x13d   :  { %v831_v59 = vpop.f32.mrb[20].mxu0  ;;  %1265 = vmax.xlane.f32.xlu0 %v2764_v57  ;;  %v544_v60 = vpop.f32.mrb[21].mxu1 }
 0x13e   :  { %v832_v61 = vadd.f32 %v831_v59, %v542_v56  ;;  %v833_v62 = vpop.f32.mrb[21].mxu0  ;;  %v545_v63 = vpop.f32.mrb[22].mxu1  ;;  %v2770_v0 = vsel %vm1184_vm0, %v1127_v58, -1e+30 }
 0x13f   :  { %v834_v1 = vpop.f32.mrb[22].mxu0  ;;  %1267 = vmax.xlane.f32.xlu1 %v2770_v0  ;;  %v547_v2 = vpop.f32.mrb[23].mxu1 }
 0x140   :  { %v1057_v3 = vmul.f32 %v2675_v12, %v832_v61  ;;  %v835_v4 = vadd.f32 %v834_v1, %v545_v63  ;;  %v836_v5 = vpop.f32.mrb[23].mxu0 }
 0x142   :  { %v1058_v6 = vmul.f32 %v2675_v12, %v835_v4  ;;  %v1128_v8 = vadd.f32 %v2682_v23, %v1057_v3 }
 0x144   :  { %v550_v9 = vpop.f32.mrb[24].mxu1  ;;  %v2778_v10 = vsel %vm1184_vm0, %v1128_v8, -1e+30  ;;  %v1129_v11 = vadd.f32 %v2682_v23, %v1058_v6 }
 0x145   :  { %v839_v13 = vpop.f32.mrb[24].mxu0  ;;  %1269 = vmax.xlane.f32.xlu0 %v2778_v10  ;;  %v552_v16 = vpop.f32.mrb[25].mxu1 }
 0x146   :  { %v840_v17 = vadd.f32 %v839_v13, %v550_v9  ;;  %v841_v18 = vpop.f32.mrb[25].mxu0  ;;  %v553_v19 = vpop.f32.mrb[26].mxu1  ;;  %v2784_v20 = vsel %vm1184_vm0, %v1129_v11, -1e+30 }
 0x147   :  { %v842_v21 = vpop.f32.mrb[26].mxu0  ;;  %1271 = vmax.xlane.f32.xlu1 %v2784_v20  ;;  %v555_v22 = vpop.f32.mrb[27].mxu1 }
 0x148   :  { %v1059_v25 = vmul.f32 %v2675_v12, %v840_v17  ;;  %v843_v26 = vadd.f32 %v842_v21, %v553_v19  ;;  %v844_v27 = vpop.f32.mrb[27].mxu0 }
 0x14a   :  { %v1060_v28 = vmul.f32 %v2675_v12, %v843_v26  ;;  %v1130_v29 = vadd.f32 %v2682_v23, %v1059_v25 }
 0x14c   :  { %v558_v30 = vpop.f32.mrb[28].mxu1  ;;  %v2792_v31 = vsel %vm1184_vm0, %v1130_v29, -1e+30  ;;  %v1131_v32 = vadd.f32 %v2682_v23, %v1060_v28 }
 0x14d   :  { %v847_v34 = vpop.f32.mrb[28].mxu0  ;;  %1273 = vmax.xlane.f32.xlu0 %v2792_v31  ;;  %v560_v35 = vpop.f32.mrb[29].mxu1 }
 0x14e   :  { %v848_v36 = vadd.f32 %v847_v34, %v558_v30  ;;  %v849_v38 = vpop.f32.mrb[29].mxu0  ;;  %v561_v39 = vpop.f32.mrb[30].mxu1  ;;  %v2798_v40 = vsel %vm1184_vm0, %v1131_v32, -1e+30 }
 0x14f   :  { %v850_v41 = vpop.f32.mrb[30].mxu0  ;;  %1275 = vmax.xlane.f32.xlu1 %v2798_v40  ;;  %v563_v42 = vpop.f32.mrb[31].mxu1 }
 0x150   :  { %v1061_v43 = vmul.f32 %v2675_v12, %v848_v36  ;;  %v851_v44 = vadd.f32 %v850_v41, %v561_v39  ;;  %v852_v46 = vpop.f32.mrb[31].mxu0 }
 0x152   :  { %v1062_v47 = vmul.f32 %v2675_v12, %v851_v44  ;;  %v1132_v48 = vadd.f32 %v2682_v23, %v1061_v43 }
 0x154   :  { %v566_v50 = vpop.f32.mrb[32].mxu1  ;;  %v2806_v51 = vsel %vm1184_vm0, %v1132_v48, -1e+30  ;;  %v1133_v52 = vadd.f32 %v2682_v23, %v1062_v47 }
 0x155   :  { %v855_v53 = vpop.f32.mrb[32].mxu0  ;;  %1277 = vmax.xlane.f32.xlu0 %v2806_v51  ;;  %v568_v55 = vpop.f32.mrb[33].mxu1 }
 0x156   :  { %v856_v56 = vadd.f32 %v855_v53, %v566_v50  ;;  %v857_v58 = vpop.f32.mrb[33].mxu0  ;;  %v569_v59 = vpop.f32.mrb[34].mxu1  ;;  %v2812_v60 = vsel %vm1184_vm0, %v1133_v52, -1e+30 }
 0x157   :  { %v858_v61 = vpop.f32.mrb[34].mxu0  ;;  %1279 = vmax.xlane.f32.xlu1 %v2812_v60  ;;  %v571_v62 = vpop.f32.mrb[35].mxu1 }
 0x158   :  { %v1063_v63 = vmul.f32 %v2675_v12, %v856_v56  ;;  %v859_v1 = vadd.f32 %v858_v61, %v569_v59  ;;  %v860_v2 = vpop.f32.mrb[35].mxu0 }
 0x15a   :  { %v1064_v3 = vmul.f32 %v2675_v12, %v859_v1  ;;  %v1134_v4 = vadd.f32 %v2682_v23, %v1063_v63 }
 0x15c   :  { %v574_v5 = vpop.f32.mrb[36].mxu1  ;;  %v2820_v6 = vsel %vm1184_vm0, %v1134_v4, -1e+30  ;;  %v1135_v8 = vadd.f32 %v2682_v23, %v1064_v3 }
 0x15d   :  { %v863_v9 = vpop.f32.mrb[36].mxu0  ;;  %1281 = vmax.xlane.f32.xlu0 %v2820_v6  ;;  %v576_v11 = vpop.f32.mrb[37].mxu1 }
 0x15e   :  { %v864_v13 = vadd.f32 %v863_v9, %v574_v5  ;;  %v865_v16 = vpop.f32.mrb[37].mxu0  ;;  %v577_v17 = vpop.f32.mrb[38].mxu1  ;;  %v2826_v18 = vsel %vm1184_vm0, %v1135_v8, -1e+30 }
 0x15f   :  { %v866_v19 = vpop.f32.mrb[38].mxu0  ;;  %1283 = vmax.xlane.f32.xlu1 %v2826_v18  ;;  %v579_v21 = vpop.f32.mrb[39].mxu1 }
 0x160   :  { %v1065_v22 = vmul.f32 %v2675_v12, %v864_v13  ;;  %v867_v25 = vadd.f32 %v866_v19, %v577_v17  ;;  %v868_v26 = vpop.f32.mrb[39].mxu0 }
 0x162   :  { %v1066_v27 = vmul.f32 %v2675_v12, %v867_v25  ;;  %v1136_v28 = vadd.f32 %v2682_v23, %v1065_v22 }
 0x164   :  { %v582_v29 = vpop.f32.mrb[40].mxu1  ;;  %v2834_v30 = vsel %vm1184_vm0, %v1136_v28, -1e+30  ;;  %v1137_v32 = vadd.f32 %v2682_v23, %v1066_v27 }
 0x165   :  { %v871_v34 = vpop.f32.mrb[40].mxu0  ;;  %1285 = vmax.xlane.f32.xlu0 %v2834_v30  ;;  %v584_v35 = vpop.f32.mrb[41].mxu1 }
 0x166   :  { %v872_v36 = vadd.f32 %v871_v34, %v582_v29  ;;  %v873_v38 = vpop.f32.mrb[41].mxu0  ;;  %v585_v39 = vpop.f32.mrb[42].mxu1  ;;  %v2840_v41 = vsel %vm1184_vm0, %v1137_v32, -1e+30 }
 0x167   :  { %v874_v42 = vpop.f32.mrb[42].mxu0  ;;  %1287 = vmax.xlane.f32.xlu1 %v2840_v41  ;;  %v587_v43 = vpop.f32.mrb[43].mxu1 }
 0x168   :  { %v1067_v44 = vmul.f32 %v2675_v12, %v872_v36  ;;  %v875_v46 = vadd.f32 %v874_v42, %v585_v39  ;;  %v876_v47 = vpop.f32.mrb[43].mxu0 }
 0x16a   :  { %v1068_v48 = vmul.f32 %v2675_v12, %v875_v46  ;;  %v1138_v50 = vadd.f32 %v2682_v23, %v1067_v44 }
 0x16c   :  { %v590_v52 = vpop.f32.mrb[44].mxu1  ;;  %v2848_v53 = vsel %vm1184_vm0, %v1138_v50, -1e+30  ;;  %v1139_v55 = vadd.f32 %v2682_v23, %v1068_v48 }
 0x16d   :  { %v879_v56 = vpop.f32.mrb[44].mxu0  ;;  %1289 = vmax.xlane.f32.xlu0 %v2848_v53  ;;  %v592_v58 = vpop.f32.mrb[45].mxu1 }
 0x16e   :  { %v880_v59 = vadd.f32 %v879_v56, %v590_v52  ;;  %v881_v61 = vpop.f32.mrb[45].mxu0  ;;  %v593_v62 = vpop.f32.mrb[46].mxu1  ;;  %v2854_v63 = vsel %vm1184_vm0, %v1139_v55, -1e+30 }
 0x16f   :  { %v882_v1 = vpop.f32.mrb[46].mxu0  ;;  %1291 = vmax.xlane.f32.xlu1 %v2854_v63  ;;  %v595_v2 = vpop.f32.mrb[47].mxu1 }
 0x170   :  { %v1069_v3 = vmul.f32 %v2675_v12, %v880_v59  ;;  %v883_v4 = vadd.f32 %v882_v1, %v593_v62  ;;  %v884_v5 = vpop.f32.mrb[47].mxu0 }
 0x172   :  { %v1070_v8 = vmul.f32 %v2675_v12, %v883_v4  ;;  %v1140_v9 = vadd.f32 %v2682_v23, %v1069_v3 }
 0x174   :  { %v598_v11 = vpop.f32.mrb[48].mxu1  ;;  %v2862_v13 = vsel %vm1184_vm0, %v1140_v9, -1e+30  ;;  %v1141_v16 = vadd.f32 %v2682_v23, %v1070_v8 }
 0x175   :  { %v887_v17 = vpop.f32.mrb[48].mxu0  ;;  %1293 = vmax.xlane.f32.xlu0 %v2862_v13  ;;  %v600_v19 = vpop.f32.mrb[49].mxu1 }
 0x176   :  { %v888_v21 = vadd.f32 %v887_v17, %v598_v11  ;;  %v889_v22 = vpop.f32.mrb[49].mxu0  ;;  %v601_v25 = vpop.f32.mrb[50].mxu1  ;;  %v2868_v26 = vsel %vm1184_vm0, %v1141_v16, -1e+30 }
 0x177   :  { %v890_v27 = vpop.f32.mrb[50].mxu0  ;;  %1295 = vmax.xlane.f32.xlu1 %v2868_v26  ;;  %v603_v28 = vpop.f32.mrb[51].mxu1 }
 0x178   :  { %v1071_v29 = vmul.f32 %v2675_v12, %v888_v21  ;;  %v891_v32 = vadd.f32 %v890_v27, %v601_v25  ;;  %v892_v34 = vpop.f32.mrb[51].mxu0 }
 0x17a   :  { %v1072_v35 = vmul.f32 %v2675_v12, %v891_v32  ;;  %v1142_v36 = vadd.f32 %v2682_v23, %v1071_v29 }
 0x17c   :  { %v606_v38 = vpop.f32.mrb[52].mxu1  ;;  %v2876_v39 = vsel %vm1184_vm0, %v1142_v36, -1e+30  ;;  %v1143_v42 = vadd.f32 %v2682_v23, %v1072_v35 }
 0x17d   :  { %v895_v43 = vpop.f32.mrb[52].mxu0  ;;  %1297 = vmax.xlane.f32.xlu0 %v2876_v39  ;;  %v608_v44 = vpop.f32.mrb[53].mxu1 }
 0x17e   :  { %v896_v46 = vadd.f32 %v895_v43, %v606_v38  ;;  %v897_v47 = vpop.f32.mrb[53].mxu0  ;;  %v609_v48 = vpop.f32.mrb[54].mxu1  ;;  %v2882_v50 = vsel %vm1184_vm0, %v1143_v42, -1e+30 }
 0x17f   :  { %v898_v52 = vpop.f32.mrb[54].mxu0  ;;  %1299 = vmax.xlane.f32.xlu1 %v2882_v50  ;;  %v611_v55 = vpop.f32.mrb[55].mxu1 }
 0x180   :  { %v1073_v56 = vmul.f32 %v2675_v12, %v896_v46  ;;  %v899_v58 = vadd.f32 %v898_v52, %v609_v48  ;;  %v900_v59 = vpop.f32.mrb[55].mxu0 }
 0x182   :  { %v1074_v61 = vmul.f32 %v2675_v12, %v899_v58  ;;  %v1144_v62 = vadd.f32 %v2682_v23, %v1073_v56 }
 0x184   :  { %v614_v1 = vpop.f32.mrb[56].mxu1  ;;  %v2890_v2 = vsel %vm1184_vm0, %v1144_v62, -1e+30  ;;  %v1145_v3 = vadd.f32 %v2682_v23, %v1074_v61 }
 0x185   :  { %v903_v4 = vpop.f32.mrb[56].mxu0  ;;  %1301 = vmax.xlane.f32.xlu0 %v2890_v2  ;;  %v616_v5 = vpop.f32.mrb[57].mxu1 }
 0x186   :  { %v904_v8 = vadd.f32 %v903_v4, %v614_v1  ;;  %v905_v9 = vpop.f32.mrb[57].mxu0  ;;  %v617_v11 = vpop.f32.mrb[58].mxu1  ;;  %v2896_v16 = vsel %vm1184_vm0, %v1145_v3, -1e+30 }
 0x187   :  { %v906_v17 = vpop.f32.mrb[58].mxu0  ;;  %1303 = vmax.xlane.f32.xlu1 %v2896_v16  ;;  %v619_v19 = vpop.f32.mrb[59].mxu1 }
 0x188   :  { %v1075_v21 = vmul.f32 %v2675_v12, %v904_v8  ;;  %v907_v22 = vadd.f32 %v906_v17, %v617_v11  ;;  %v908_v25 = vpop.f32.mrb[59].mxu0 }
 0x18a   :  { %v1076_v27 = vmul.f32 %v2675_v12, %v907_v22  ;;  %v1146_v28 = vadd.f32 %v2682_v23, %v1075_v21 }
 0x18c   :  { %v622_v29 = vpop.f32.mrb[60].mxu1  ;;  %v2904_v32 = vsel %vm1184_vm0, %v1146_v28, -1e+30  ;;  %v1147_v34 = vadd.f32 %v2682_v23, %v1076_v27 }
 0x18d   :  { %v911_v35 = vpop.f32.mrb[60].mxu0  ;;  %1305 = vmax.xlane.f32.xlu0 %v2904_v32  ;;  %v624_v36 = vpop.f32.mrb[61].mxu1 }
 0x18e   :  { %v912_v38 = vadd.f32 %v911_v35, %v622_v29  ;;  %v913_v42 = vpop.f32.mrb[61].mxu0  ;;  %v625_v43 = vpop.f32.mrb[62].mxu1  ;;  %v2910_v44 = vsel %vm1184_vm0, %v1147_v34, -1e+30 }
 0x18f   :  { %v914_v46 = vpop.f32.mrb[62].mxu0  ;;  %1307 = vmax.xlane.f32.xlu1 %v2910_v44  ;;  %v627_v47 = vpop.f32.mrb[63].mxu1 }
 0x190   :  { %v1077_v48 = vmul.f32 %v2675_v12, %v912_v38  ;;  %v915_v52 = vadd.f32 %v914_v46, %v625_v43  ;;  %v916_v55 = vpop.f32.mrb[63].mxu0 }
 0x192   :  { %v1078_v56 = vmul.f32 %v2675_v12, %v915_v52  ;;  %v1148_v58 = vadd.f32 %v2682_v23, %v1077_v48 }
 0x194   :  { %v630_v59 = vpop.f32.mrb[64].mxu1  ;;  %v2918_v61 = vsel %vm1184_vm0, %v1148_v58, -1e+30  ;;  %v1149_v62 = vadd.f32 %v2682_v23, %v1078_v56 }
 0x195   :  { %v919_v1 = vpop.f32.mrb[64].mxu0  ;;  %1309 = vmax.xlane.f32.xlu0 %v2918_v61  ;;  %v632_v3 = vpop.f32.mrb[65].mxu1 }
 0x196   :  { %v920_v4 = vadd.f32 %v919_v1, %v630_v59  ;;  %v921_v5 = vpop.f32.mrb[65].mxu0  ;;  %v633_v8 = vpop.f32.mrb[66].mxu1  ;;  %v2924_v9 = vsel %vm1184_vm0, %v1149_v62, -1e+30 }
 0x197   :  { %v922_v11 = vpop.f32.mrb[66].mxu0  ;;  %1311 = vmax.xlane.f32.xlu1 %v2924_v9  ;;  %v635_v17 = vpop.f32.mrb[67].mxu1 }
 0x198   :  { %v1079_v19 = vmul.f32 %v2675_v12, %v920_v4  ;;  %v923_v21 = vadd.f32 %v922_v11, %v633_v8  ;;  %v924_v22 = vpop.f32.mrb[67].mxu0 }
 0x19a   :  { %v1080_v25 = vmul.f32 %v2675_v12, %v923_v21  ;;  %v1150_v27 = vadd.f32 %v2682_v23, %v1079_v19 }
 0x19c   :  { %v638_v28 = vpop.f32.mrb[68].mxu1  ;;  %v2932_v29 = vsel %vm1184_vm0, %v1150_v27, -1e+30  ;;  %v1151_v34 = vadd.f32 %v2682_v23, %v1080_v25 }
 0x19d   :  { %v927_v35 = vpop.f32.mrb[68].mxu0  ;;  %1313 = vmax.xlane.f32.xlu0 %v2932_v29  ;;  %v640_v36 = vpop.f32.mrb[69].mxu1 }
 0x19e   :  { %v928_v38 = vadd.f32 %v927_v35, %v638_v28  ;;  %v929_v42 = vpop.f32.mrb[69].mxu0  ;;  %v641_v43 = vpop.f32.mrb[70].mxu1  ;;  %v2938_v46 = vsel %vm1184_vm0, %v1151_v34, -1e+30 }
 0x19f   :  { %v930_v47 = vpop.f32.mrb[70].mxu0  ;;  %1315 = vmax.xlane.f32.xlu1 %v2938_v46  ;;  %v643_v48 = vpop.f32.mrb[71].mxu1 }
 0x1a0   :  { %v1081_v52 = vmul.f32 %v2675_v12, %v928_v38  ;;  %v931_v55 = vadd.f32 %v930_v47, %v641_v43  ;;  %v932_v56 = vpop.f32.mrb[71].mxu0 }
 0x1a2   :  { %v1082_v58 = vmul.f32 %v2675_v12, %v931_v55  ;;  %v1152_v59 = vadd.f32 %v2682_v23, %v1081_v52 }
 0x1a4   :  { %v646_v62 = vpop.f32.mrb[72].mxu1  ;;  %v2946_v1 = vsel %vm1184_vm0, %v1152_v59, -1e+30  ;;  %v1153_v3 = vadd.f32 %v2682_v23, %v1082_v58 }
 0x1a5   :  { %v935_v4 = vpop.f32.mrb[72].mxu0  ;;  %1317 = vmax.xlane.f32.xlu0 %v2946_v1  ;;  %v648_v5 = vpop.f32.mrb[73].mxu1 }
 0x1a6   :  { %v936_v8 = vadd.f32 %v935_v4, %v646_v62  ;;  %v937_v11 = vpop.f32.mrb[73].mxu0  ;;  %v649_v17 = vpop.f32.mrb[74].mxu1  ;;  %v2952_v19 = vsel %vm1184_vm0, %v1153_v3, -1e+30 }
 0x1a7   :  { %v938_v21 = vpop.f32.mrb[74].mxu0  ;;  %1319 = vmax.xlane.f32.xlu1 %v2952_v19  ;;  %v651_v22 = vpop.f32.mrb[75].mxu1 }
 0x1a8   :  { %v1083_v25 = vmul.f32 %v2675_v12, %v936_v8  ;;  %v939_v27 = vadd.f32 %v938_v21, %v649_v17  ;;  %v940_v28 = vpop.f32.mrb[75].mxu0 }
 0x1aa   :  { %v1084_v34 = vmul.f32 %v2675_v12, %v939_v27  ;;  %v1250_v35 = vpop.xlane.xlu0 %1249  ;;  %v1154_v36 = vadd.f32 %v2682_v23, %v1083_v25 }
 0x1ab   :  { %v2959_v38 = vsub.f32 %v2696_v33, %v1250_v35 }
 0x1ac   :  { %v654_v42 = vpop.f32.mrb[76].mxu1  ;;  %v2963_v43 = vsel %vm1184_vm0, %v1154_v36, -1e+30  ;;  %v1155_v47 = vadd.f32 %v2682_v23, %v1084_v34 }
 0x1ad   :  { %v1441_v48 = vmul.f32 1.442695, %v2959_v38  ;;  %v943_v52 = vpop.f32.mrb[76].mxu0  ;;  %1321 = vmax.xlane.f32.xlu0 %v2963_v43  ;;  %v656_v55 = vpop.f32.mrb[77].mxu1 }
 0x1ae   :  { %v944_v56 = vadd.f32 %v943_v52, %v654_v42  ;;  %v945_v58 = vpop.f32.mrb[77].mxu0  ;;  %v1252_v59 = vpop.xlane.xlu0 %1251  ;;  %v2970_v33 = vsel %vm1184_vm0, %v1155_v47, -1e+30 }
 0x1af   :  { %2087 = vpow2.f32 %v1441_v48  ;;  %v2973_v62 = vsub.f32 %v2703_v49, %v1252_v59  ;;  %v657_v3 = vpop.f32.mrb[78].mxu1  ;;  %v946_v4 = vpop.f32.mrb[78].mxu0  ;;  %1323 = vmax.xlane.f32.xlu1 %v2970_v33 }
 0x1b0   :  { %v1085_v5 = vmul.f32 %v2675_v12, %v944_v56  ;;  %v947_v8 = vadd.f32 %v946_v4, %v657_v3  ;;  %v659_v11 = vpop.f32.mrb[79].mxu1  ;;  %v948_v17 = vpop.f32.mrb[79].mxu0 }
 0x1b1   :  { %v1443_v21 = vmul.f32 1.442695, %v2973_v62 }
 0x1b2   :  { %v1086_v22 = vmul.f32 %v2675_v12, %v947_v8  ;;  %v1254_v25 = vpop.xlane.xlu1 %1253  ;;  %v1156_v27 = vadd.f32 %v2682_v23, %v1085_v5 }
 0x1b3   :  { %2089 = vpow2.f32 %v1443_v21  ;;  %v2981_v49 = vsub.f32 %v2713_v54, %v1254_v25 }
 0x1b4   :  { %v662_v28 = vpop.f32.mrb[80].mxu1  ;;  %v2985_v34 = vsel %vm1184_vm0, %v1156_v27, -1e+30  ;;  %v1157_v35 = vadd.f32 %v2682_v23, %v1086_v22 }
 0x1b5   :  { %v1445_v36 = vmul.f32 1.442695, %v2981_v49  ;;  %v951_v42 = vpop.f32.mrb[80].mxu0  ;;  %1325 = vmax.xlane.f32.xlu0 %v2985_v34  ;;  %v664_v47 = vpop.f32.mrb[81].mxu1 }
 0x1b6   :  { %v952_v48 = vadd.f32 %v951_v42, %v662_v28  ;;  %v953_v52 = vpop.f32.mrb[81].mxu0  ;;  %v1256_v55 = vpop.xlane.xlu1 %1255  ;;  %v2992_v54 = vsel %vm1184_vm0, %v1157_v35, -1e+30 }
 0x1b7   :  { %2091 = vpow2.f32 %v1445_v36  ;;  %v2995_v56 = vsub.f32 %v2723_v7, %v1256_v55  ;;  %v665_v58 = vpop.f32.mrb[82].mxu1  ;;  %v954_v59 = vpop.f32.mrb[82].mxu0  ;;  %1327 = vmax.xlane.f32.xlu1 %v2992_v54 }
 0x1b8   :  { %v1087_v3 = vmul.f32 %v2675_v12, %v952_v48  ;;  %v955_v4 = vadd.f32 %v954_v59, %v665_v58  ;;  %v667_v5 = vpop.f32.mrb[83].mxu1  ;;  %v956_v8 = vpop.f32.mrb[83].mxu0 }
 0x1b9   :  { %v2088_v11 = vpop.eup %2087  ;;  %v1447_v17 = vmul.f32 1.442695, %v2995_v56 }
 0x1ba   :  { %v1088_v21 = vmul.f32 %v2675_v12, %v955_v4  ;;  %1569 = vadd.xlane.f32.xlu0 %v2088_v11  ;;  %v1258_v22 = vpop.xlane.xlu0 %1257  ;;  %v1158_v25 = vadd.f32 %v2682_v23, %v1087_v3 }
 0x1bb   :  { %2093 = vpow2.f32 %v1447_v17  ;;  %v3003_v7 = vsub.f32 %v2736_v14, %v1258_v22 }
 0x1bc   :  { %v1260_v27 = vpop.xlane.xlu1 %1259  ;;  %v670_v28 = vpop.f32.mrb[84].mxu1  ;;  %v3007_v35 = vsel %vm1184_vm0, %v1158_v25, -1e+30  ;;  %v1159_v55 = vadd.f32 %v2682_v23, %v1088_v21 }
 0x1bd   :  { %v2090_v36 = vpop.eup %2089  ;;  %v1449_v42 = vmul.f32 1.442695, %v3003_v7  ;;  %v3011_v47 = vsub.f32 %v2742_v24, %v1260_v27  ;;  %v959_v48 = vpop.f32.mrb[84].mxu0 }
 0x1be   :  { %v672_v52 = vpop.f32.mrb[85].mxu1  ;;  %v960_v58 = vadd.f32 %v959_v48, %v670_v28  ;;  %v961_v59 = vpop.f32.mrb[85].mxu0  ;;  %1329 = vmax.xlane.f32.xlu0 %v3007_v35  ;;  %1571 = vadd.xlane.f32.xlu1 %v2090_v36  ;;  %v3019_v22 = vsel %vm1184_vm0, %v1159_v55, -1e+30 }
 0x1bf   :  { %v673_v14 = vpop.f32.mrb[86].mxu1  ;;  %2095 = vpow2.f32 %v1449_v42  ;;  %v1451_v3 = vmul.f32 1.442695, %v3011_v47  ;;  %v962_v4 = vpop.f32.mrb[86].mxu0 }
 0x1c0   :  { %v675_v5 = vpop.f32.mrb[87].mxu1  ;;  %v1089_v8 = vmul.f32 %v2675_v12, %v960_v58  ;;  %v963_v11 = vadd.f32 %v962_v4, %v673_v14  ;;  %v964_v24 = vpop.f32.mrb[87].mxu0 }
 0x1c1   :  { %v2092_v17 = vpop.eup %2091  ;;  %2097 = vpow2.f32 %v1451_v3 }
 0x1c2   :  { %v1090_v21 = vmul.f32 %v2675_v12, %v963_v11  ;;  %1573 = vadd.xlane.f32.xlu0 %v2092_v17  ;;  %1331 = vmax.xlane.f32.xlu1 %v3019_v22  ;;  %v1262_v25 = vpop.xlane.xlu0 %1261  ;;  %v1160_v27 = vadd.f32 %v2682_v23, %v1089_v8 }
 0x1c3   :  { %v3025_v28 = vsub.f32 %v2750_v37, %v1262_v25 }
 0x1c4   :  { %v1264_v36 = vpop.xlane.xlu1 %1263  ;;  %v678_v42 = vpop.f32.mrb[88].mxu1  ;;  %v3029_v48 = vsel %vm1184_vm0, %v1160_v27, -1e+30  ;;  %v1161_v4 = vadd.f32 %v2682_v23, %v1090_v21 }
 0x1c5   :  { %v2094_v52 = vpop.eup %2093  ;;  %v1453_v55 = vmul.f32 1.442695, %v3025_v28  ;;  %v3033_v58 = vsub.f32 %v2756_v45, %v1264_v36  ;;  %v967_v59 = vpop.f32.mrb[88].mxu0 }
 0x1c6   :  { %v680_v14 = vpop.f32.mrb[89].mxu1  ;;  %v968_v3 = vadd.f32 %v967_v59, %v678_v42  ;;  %v969_v5 = vpop.f32.mrb[89].mxu0  ;;  %1333 = vmax.xlane.f32.xlu0 %v3029_v48  ;;  %1575 = vadd.xlane.f32.xlu1 %v2094_v52  ;;  %v3041_v36 = vsel %vm1184_vm0, %v1161_v4, -1e+30 }
 0x1c7   :  { %v681_v37 = vpop.f32.mrb[90].mxu1  ;;  %2099 = vpow2.f32 %v1453_v55  ;;  %v1455_v8 = vmul.f32 1.442695, %v3033_v58  ;;  %v970_v11 = vpop.f32.mrb[90].mxu0 }
 0x1c8   :  { %v683_v24 = vpop.f32.mrb[91].mxu1  ;;  %v1091_v17 = vmul.f32 %v2675_v12, %v968_v3  ;;  %v971_v25 = vadd.f32 %v970_v11, %v681_v37  ;;  %v972_v45 = vpop.f32.mrb[91].mxu0 }
 0x1c9   :  { %v2096_v27 = vpop.eup %2095  ;;  %2101 = vpow2.f32 %v1455_v8 }
 0x1ca   :  { %v1092_v21 = vmul.f32 %v2675_v12, %v971_v25  ;;  %1335 = vmax.xlane.f32.xlu1 %v3041_v36  ;;  %1577 = vadd.xlane.f32.xlu0 %v2096_v27  ;;  %v1266_v42 = vpop.xlane.xlu0 %1265  ;;  %v1162_v52 = vadd.f32 %v2682_v23, %v1091_v17 }
 0x1cb   :  { %v3047_v55 = vsub.f32 %v2764_v57, %v1266_v42  ;;  %v2098_v4 = vpop.eup %2097 }
 0x1cc   :  { %v1268_v59 = vpop.xlane.xlu1 %1267  ;;  %v686_v14 = vpop.f32.mrb[92].mxu1  ;;  %v3051_v3 = vsel %vm1184_vm0, %v1162_v52, -1e+30  ;;  %v1163_v17 = vadd.f32 %v2682_v23, %v1092_v21 }
 0x1cd   :  { %3690 = vst [vmem:[#allocation3_spill] sm:$0xff] %v3047_v55  ;;  %v1457_v5 = vmul.f32 1.442695, %v3047_v55  ;;  %v3055_v37 = vsub.f32 %v2770_v0, %v1268_v59  ;;  %v975_v11 = vpop.f32.mrb[92].mxu0  ;;  %v688_v24 = vpop.f32.mrb[93].mxu1 }
 0x1ce   :  { %v976_v8 = vadd.f32 %v975_v11, %v686_v14  ;;  %v977_v25 = vpop.f32.mrb[93].mxu0  ;;  %1579 = vadd.xlane.f32.xlu1 %v2098_v4  ;;  %1337 = vmax.xlane.f32.xlu0 %v3051_v3  ;;  %v689_v57 = vpop.f32.mrb[94].mxu1  ;;  %v3063_v24 = vsel %vm1184_vm0, %v1163_v17, -1e+30  ;;  %v3070_v14 = vld [vmem:[%s3671_s3] ss:$0 sm:$0xff] }
 0x1cf   :  { %3691 = vst [vmem:[#allocation4_spill] sm:$0xff] %v3055_v37  ;;  %2103 = vpow2.f32 %v1457_v5  ;;  %v1459_v45 = vmul.f32 1.442695, %v3055_v37  ;;  %v978_v27 = vpop.f32.mrb[94].mxu0  ;;  %v691_v42 = vpop.f32.mrb[95].mxu1 }
 0x1d0   :  { %v1093_v52 = vmul.f32 %v2675_v12, %v976_v8  ;;  %v979_v55 = vadd.f32 %v978_v27, %v689_v57  ;;  %v980_v0 = vpop.f32.mrb[95].mxu0 }
 0x1d1   :  { %v2100_v59 = vpop.eup %2099  ;;  %2105 = vpow2.f32 %v1459_v45 }
 0x1d2   :  { %v1094_v23 = vmul.f32 %v2675_v12, %v979_v55  ;;  %1339 = vmax.xlane.f32.xlu1 %v3063_v24  ;;  %1581 = vadd.xlane.f32.xlu0 %v2100_v59  ;;  %v1270_v21 = vpop.xlane.xlu0 %1269  ;;  %v1164_v4 = vadd.f32 %v3070_v14, %v1093_v52 }
 0x1d3   :  { %v3074_v5 = vsub.f32 %v2778_v10, %v1270_v21  ;;  %v2102_v8 = vpop.eup %2101 }
 0x1d4   :  { %v1272_v11 = vpop.xlane.xlu1 %1271  ;;  %v694_v17 = vpop.f32.mrb[96].mxu1  ;;  %v3078_v55 = vsel %vm1184_vm0, %v1164_v4, -1e+30  ;;  %v1165_v52 = vadd.f32 %v3070_v14, %v1094_v23 }
 0x1d5   :  { %3692 = vst [vmem:[#allocation5_spill] sm:$0xff] %v3074_v5  ;;  %v1461_v25 = vmul.f32 1.442695, %v3074_v5  ;;  %v3082_v57 = vsub.f32 %v2784_v20, %v1272_v11  ;;  %v983_v27 = vpop.f32.mrb[96].mxu0  ;;  %v696_v42 = vpop.f32.mrb[97].mxu1 }
 0x1d6   :  { %v984_v45 = vadd.f32 %v983_v27, %v694_v17  ;;  %v985_v0 = vpop.f32.mrb[97].mxu0  ;;  %1583 = vadd.xlane.f32.xlu1 %v2102_v8  ;;  %1341 = vmax.xlane.f32.xlu0 %v3078_v55  ;;  %v697_v10 = vpop.f32.mrb[98].mxu1  ;;  %v3090_v42 = vsel %vm1184_vm0, %v1165_v52, -1e+30 }
 0x1d7   :  { %3693 = vst [vmem:[#allocation6_spill] sm:$0xff] %v3082_v57  ;;  %2107 = vpow2.f32 %v1461_v25  ;;  %v1463_v59 = vmul.f32 1.442695, %v3082_v57  ;;  %v986_v21 = vpop.f32.mrb[98].mxu0  ;;  %v699_v4 = vpop.f32.mrb[99].mxu1 }
 0x1d8   :  { %v1095_v5 = vmul.f32 %v2675_v12, %v984_v45  ;;  %v987_v37 = vadd.f32 %v986_v21, %v697_v10  ;;  %v988_v20 = vpop.f32.mrb[99].mxu0 }
 0x1d9   :  { %v2104_v11 = vpop.eup %2103  ;;  %2109 = vpow2.f32 %v1463_v59 }
 0x1da   :  { %v1096_v23 = vmul.f32 %v2675_v12, %v987_v37  ;;  %1343 = vmax.xlane.f32.xlu1 %v3090_v42  ;;  %1585 = vadd.xlane.f32.xlu0 %v2104_v11  ;;  %v1274_v17 = vpop.xlane.xlu0 %1273  ;;  %v1166_v8 = vadd.f32 %v3070_v14, %v1095_v5 }
 0x1db   :  { %v3096_v25 = vsub.f32 %v2792_v31, %v1274_v17  ;;  %v2106_v52 = vpop.eup %2105 }
 0x1dc   :  { %v1276_v27 = vpop.xlane.xlu1 %1275  ;;  %v702_v45 = vpop.f32.mrb[100].mxu1  ;;  %v3100_v0 = vsel %vm1184_vm0, %v1166_v8, -1e+30  ;;  %v1167_v5 = vadd.f32 %v3070_v14, %v1096_v23 }
 0x1dd   :  { %3694 = vst [vmem:[#allocation7_spill] sm:$0xff] %v3096_v25  ;;  %v1465_v10 = vmul.f32 1.442695, %v3096_v25  ;;  %v3104_v37 = vsub.f32 %v2798_v40, %v1276_v27  ;;  %v991_v21 = vpop.f32.mrb[100].mxu0  ;;  %v704_v4 = vpop.f32.mrb[101].mxu1 }
 0x1de   :  { %v992_v59 = vadd.f32 %v991_v21, %v702_v45  ;;  %v993_v20 = vpop.f32.mrb[101].mxu0  ;;  %1587 = vadd.xlane.f32.xlu1 %v2106_v52  ;;  %1345 = vmax.xlane.f32.xlu0 %v3100_v0  ;;  %v705_v31 = vpop.f32.mrb[102].mxu1  ;;  %v3112_v4 = vsel %vm1184_vm0, %v1167_v5, -1e+30 }
 0x1df   :  { %3695 = vst [vmem:[#allocation8_spill] sm:$0xff] %v3104_v37  ;;  %2111 = vpow2.f32 %v1465_v10  ;;  %v1467_v11 = vmul.f32 1.442695, %v3104_v37  ;;  %v994_v17 = vpop.f32.mrb[102].mxu0  ;;  %v707_v8 = vpop.f32.mrb[103].mxu1 }
 0x1e0   :  { %v1097_v25 = vmul.f32 %v2675_v12, %v992_v59  ;;  %v995_v57 = vadd.f32 %v994_v17, %v705_v31  ;;  %v996_v40 = vpop.f32.mrb[103].mxu0 }
 0x1e1   :  { %v2108_v27 = vpop.eup %2107  ;;  %2113 = vpow2.f32 %v1467_v11 }
 0x1e2   :  { %v1098_v23 = vmul.f32 %v2675_v12, %v995_v57  ;;  %1347 = vmax.xlane.f32.xlu1 %v3112_v4  ;;  %1589 = vadd.xlane.f32.xlu0 %v2108_v27  ;;  %v1278_v45 = vpop.xlane.xlu0 %1277  ;;  %v1168_v52 = vadd.f32 %v3070_v14, %v1097_v25 }
 0x1e3   :  { %v3118_v10 = vsub.f32 %v2806_v51, %v1278_v45  ;;  %v2110_v5 = vpop.eup %2109 }
 0x1e4   :  { %v1280_v21 = vpop.xlane.xlu1 %1279  ;;  %v710_v59 = vpop.f32.mrb[104].mxu1  ;;  %v3122_v20 = vsel %vm1184_vm0, %v1168_v52, -1e+30  ;;  %v1169_v25 = vadd.f32 %v3070_v14, %v1098_v23 }
 0x1e5   :  { %3696 = vst [vmem:[#allocation9_spill] sm:$0xff] %v3118_v10  ;;  %v1469_v31 = vmul.f32 1.442695, %v3118_v10  ;;  %v3126_v57 = vsub.f32 %v2812_v60, %v1280_v21  ;;  %v999_v17 = vpop.f32.mrb[104].mxu0  ;;  %v712_v8 = vpop.f32.mrb[105].mxu1 }
 0x1e6   :  { %v1000_v11 = vadd.f32 %v999_v17, %v710_v59  ;;  %v1001_v40 = vpop.f32.mrb[105].mxu0  ;;  %1591 = vadd.xlane.f32.xlu1 %v2110_v5  ;;  %1349 = vmax.xlane.f32.xlu0 %v3122_v20  ;;  %v713_v51 = vpop.f32.mrb[106].mxu1  ;;  %v3134_v8 = vsel %vm1184_vm0, %v1169_v25, -1e+30 }
 0x1e7   :  { %3697 = vst [vmem:[#allocation10_spill] sm:$0xff] %v3126_v57  ;;  %2115 = vpow2.f32 %v1469_v31  ;;  %v1471_v27 = vmul.f32 1.442695, %v3126_v57  ;;  %v1002_v45 = vpop.f32.mrb[106].mxu0  ;;  %v715_v52 = vpop.f32.mrb[107].mxu1 }
 0x1e8   :  { %v1099_v10 = vmul.f32 %v2675_v12, %v1000_v11  ;;  %v1003_v37 = vadd.f32 %v1002_v45, %v713_v51  ;;  %v1004_v60 = vpop.f32.mrb[107].mxu0 }
 0x1e9   :  { %v2112_v21 = vpop.eup %2111  ;;  %2117 = vpow2.f32 %v1471_v27 }
 0x1ea   :  { %v1100_v23 = vmul.f32 %v2675_v12, %v1003_v37  ;;  %1351 = vmax.xlane.f32.xlu1 %v3134_v8  ;;  %1593 = vadd.xlane.f32.xlu0 %v2112_v21  ;;  %v1282_v59 = vpop.xlane.xlu0 %1281  ;;  %v1170_v5 = vadd.f32 %v3070_v14, %v1099_v10 }
 0x1eb   :  { %v3140_v31 = vsub.f32 %v2820_v6, %v1282_v59  ;;  %v2114_v25 = vpop.eup %2113 }
 0x1ec   :  { %v1284_v17 = vpop.xlane.xlu1 %1283  ;;  %v718_v11 = vpop.f32.mrb[108].mxu1  ;;  %v3144_v40 = vsel %vm1184_vm0, %v1170_v5, -1e+30  ;;  %v1171_v10 = vadd.f32 %v3070_v14, %v1100_v23 }
 0x1ed   :  { %3698 = vst [vmem:[#allocation11_spill] sm:$0xff] %v3140_v31  ;;  %v1473_v51 = vmul.f32 1.442695, %v3140_v31  ;;  %v3148_v37 = vsub.f32 %v2826_v18, %v1284_v17  ;;  %v1007_v45 = vpop.f32.mrb[108].mxu0  ;;  %v720_v52 = vpop.f32.mrb[109].mxu1 }
 0x1ee   :  { %v1008_v27 = vadd.f32 %v1007_v45, %v718_v11  ;;  %v1009_v60 = vpop.f32.mrb[109].mxu0  ;;  %1595 = vadd.xlane.f32.xlu1 %v2114_v25  ;;  %1353 = vmax.xlane.f32.xlu0 %v3144_v40  ;;  %v721_v6 = vpop.f32.mrb[110].mxu1  ;;  %v3156_v52 = vsel %vm1184_vm0, %v1171_v10, -1e+30 }
 0x1ef   :  { %3699 = vst [vmem:[#allocation12_spill] sm:$0xff] %v3148_v37  ;;  %2119 = vpow2.f32 %v1473_v51  ;;  %v1475_v21 = vmul.f32 1.442695, %v3148_v37  ;;  %v1010_v59 = vpop.f32.mrb[110].mxu0  ;;  %v723_v5 = vpop.f32.mrb[111].mxu1 }
 0x1f0   :  { %v1101_v31 = vmul.f32 %v2675_v12, %v1008_v27  ;;  %v1011_v57 = vadd.f32 %v1010_v59, %v721_v6  ;;  %v1012_v18 = vpop.f32.mrb[111].mxu0 }
 0x1f1   :  { %v2116_v17 = vpop.eup %2115  ;;  %2121 = vpow2.f32 %v1475_v21 }
 0x1f2   :  { %v1102_v23 = vmul.f32 %v2675_v12, %v1011_v57  ;;  %1355 = vmax.xlane.f32.xlu1 %v3156_v52  ;;  %1597 = vadd.xlane.f32.xlu0 %v2116_v17  ;;  %v1286_v11 = vpop.xlane.xlu0 %1285  ;;  %v1172_v25 = vadd.f32 %v3070_v14, %v1101_v31 }
 0x1f3   :  { %v3162_v51 = vsub.f32 %v2834_v30, %v1286_v11  ;;  %v2118_v10 = vpop.eup %2117 }
 0x1f4   :  { %v1288_v45 = vpop.xlane.xlu1 %1287  ;;  %v726_v27 = vpop.f32.mrb[112].mxu1  ;;  %v3166_v60 = vsel %vm1184_vm0, %v1172_v25, -1e+30  ;;  %v1173_v31 = vadd.f32 %v3070_v14, %v1102_v23 }
 0x1f5   :  { %3700 = vst [vmem:[#allocation13_spill] sm:$0xff] %v3162_v51  ;;  %3701 = vst [vmem:[#allocation14_spill] sm:$0xff] %v3166_v60  ;;  %v1477_v6 = vmul.f32 1.442695, %v3162_v51  ;;  %v3170_v57 = vsub.f32 %v2840_v41, %v1288_v45  ;;  %v1015_v59 = vpop.f32.mrb[112].mxu0  ;;  %v728_v5 = vpop.f32.mrb[113].mxu1 }
 0x1f6   :  { %v1016_v21 = vadd.f32 %v1015_v59, %v726_v27  ;;  %v1017_v18 = vpop.f32.mrb[113].mxu0  ;;  %1599 = vadd.xlane.f32.xlu1 %v2118_v10  ;;  %1357 = vmax.xlane.f32.xlu0 %v3166_v60  ;;  %v729_v30 = vpop.f32.mrb[114].mxu1  ;;  %v3178_v5 = vsel %vm1184_vm0, %v1173_v31, -1e+30 }
 0x1f7   :  { %3702 = vst [vmem:[#allocation15_spill] sm:$0xff] %v3170_v57  ;;  %2123 = vpow2.f32 %v1477_v6  ;;  %v1479_v17 = vmul.f32 1.442695, %v3170_v57  ;;  %v1018_v11 = vpop.f32.mrb[114].mxu0  ;;  %v731_v25 = vpop.f32.mrb[115].mxu1  ;;  %3703 = vst [vmem:[#allocation16_spill] sm:$0xff] %v3178_v5 }
 0x1f8   :  { %v1103_v51 = vmul.f32 %v2675_v12, %v1016_v21  ;;  %v1019_v37 = vadd.f32 %v1018_v11, %v729_v30  ;;  %v1020_v41 = vpop.f32.mrb[115].mxu0 }
 0x1f9   :  { %v2120_v45 = vpop.eup %2119  ;;  %2125 = vpow2.f32 %v1479_v17 }
 0x1fa   :  { %v1104_v23 = vmul.f32 %v2675_v12, %v1019_v37  ;;  %1359 = vmax.xlane.f32.xlu1 %v3178_v5  ;;  %1601 = vadd.xlane.f32.xlu0 %v2120_v45  ;;  %v1174_v27 = vadd.f32 %v3070_v14, %v1103_v51  ;;  %v1290_v51 = vpop.xlane.xlu0 %1289 }
 0x1fb   :  { %v2122_v59 = vpop.eup %2121 }
 0x1fc   :  { %v734_v10 = vpop.f32.mrb[116].mxu1  ;;  %v3185_v6 = vsel %vm1184_vm0, %v1174_v27, -1e+30  ;;  %v1175_v30 = vadd.f32 %v3070_v14, %v1104_v23 }
 0x1fd   :  { %3704 = vst [vmem:[#allocation17_spill] sm:$0xff] %v3185_v6  ;;  %v1023_v21 = vpop.f32.mrb[116].mxu0  ;;  %v736_v18 = vpop.f32.mrb[117].mxu1 }
 0x1fe   :  { %v1024_v31 = vadd.f32 %v1023_v21, %v734_v10  ;;  %v1025_v11 = vpop.f32.mrb[117].mxu0  ;;  %1603 = vadd.xlane.f32.xlu1 %v2122_v59  ;;  %1361 = vmax.xlane.f32.xlu0 %v3185_v6  ;;  %v737_v37 = vpop.f32.mrb[118].mxu1  ;;  %v3192_v5 = vsel %vm1184_vm0, %v1175_v30, -1e+30 }
 0x1ff   :  { %v1026_v25 = vpop.f32.mrb[118].mxu0  ;;  %v739_v41 = vpop.f32.mrb[119].mxu1  ;;  %3705 = vst [vmem:[#allocation18_spill] sm:$0xff] %v3192_v5  ;;  %v3202_v11 = vsub.f32 %v2848_v53, %v1290_v51 }
 0x200   :  { %v1105_v17 = vmul.f32 %v2675_v12, %v1024_v31  ;;  %v1027_v45 = vadd.f32 %v1026_v25, %v737_v37  ;;  %v1028_v57 = vpop.f32.mrb[119].mxu0  ;;  %v1292_v59 = vpop.xlane.xlu1 %1291 }
 0x201   :  { %v2124_v27 = vpop.eup %2123 }
 0x202   :  { %v1106_v23 = vmul.f32 %v2675_v12, %v1027_v45  ;;  %1363 = vmax.xlane.f32.xlu1 %v3192_v5  ;;  %1605 = vadd.xlane.f32.xlu0 %v2124_v27  ;;  %v1176_v10 = vadd.f32 %v3070_v14, %v1105_v17  ;;  %v1294_v21 = vpop.xlane.xlu0 %1293  ;;  %v3207_v27 = vsub.f32 %v2854_v63, %v1292_v59 }
 0x203   :  { %v2126_v57 = vpop.eup %2125 }
 0x204   :  { %v742_v18 = vpop.f32.mrb[120].mxu1  ;;  %v3199_v31 = vsel %vm1184_vm0, %v1176_v10, -1e+30  ;;  %v1177_v25 = vadd.f32 %v3070_v14, %v1106_v23  ;;  %v1296_v6 = vpop.xlane.xlu1 %1295  ;;  %v1483_v59 = vmul.f32 1.442695, %v3207_v27 }
 0x205   :  { %v1031_v30 = vpop.f32.mrb[120].mxu0  ;;  %v744_v37 = vpop.f32.mrb[121].mxu1 }
 0x206   :  { %v1032_v41 = vadd.f32 %v1031_v30, %v742_v18  ;;  %v1033_v45 = vpop.f32.mrb[121].mxu0  ;;  %1607 = vadd.xlane.f32.xlu1 %v2126_v57  ;;  %1365 = vmax.xlane.f32.xlu0 %v3199_v31  ;;  %v745_v17 = vpop.f32.mrb[122].mxu1  ;;  %v1481_v37 = vmul.f32 1.442695, %v3202_v11  ;;  %v3213_v23 = vsel %vm1184_vm0, %v1177_v25, -1e+30  ;;  %v3216_v18 = vsub.f32 %v2862_v13, %v1294_v21 }
 0x207   :  { %v1034_v5 = vpop.f32.mrb[122].mxu0  ;;  %v747_v10 = vpop.f32.mrb[123].mxu1 }
 0x208   :  { %v1107_v60 = vmul.f32 %v2675_v12, %v1032_v41  ;;  %v1035_v53 = vadd.f32 %v1034_v5, %v745_v17  ;;  %v1036_v51 = vpop.f32.mrb[123].mxu0  ;;  %3706 = vst [vmem:[#allocation19_spill] sm:$0xff] %v3216_v18  ;;  %v3223_v5 = vsub.f32 %v2868_v26, %v1296_v6  ;;  %2127 = vpow2.f32 %v1481_v37 }
 0x209   :  { %2129 = vpow2.f32 %v1483_v59 }
 0x20a   :  { %v1108_v57 = vmul.f32 %v2675_v12, %v1035_v53  ;;  %1367 = vmax.xlane.f32.xlu1 %v3213_v23  ;;  %v1178_v63 = vadd.f32 %v3070_v14, %v1107_v60  ;;  %v1298_v30 = vpop.xlane.xlu0 %1297  ;;  %v1485_v60 = vmul.f32 1.442695, %v3216_v18 }
 0x20b   :  { %v3233_v10 = vsub.f32 %v2876_v39, %v1298_v30 }
 0x20c   :  { %v1300_v41 = vpop.xlane.xlu1 %1299  ;;  %v750_v45 = vpop.f32.mrb[124].mxu1  ;;  %v3227_v25 = vsel %vm1184_vm0, %v1178_v63, -1e+30  ;;  %v1179_v13 = vadd.f32 %v3070_v14, %v1108_v57  ;;  %v1487_v57 = vmul.f32 1.442695, %v3223_v5  ;;  %2131 = vpow2.f32 %v1485_v60 }
 0x20d   :  { %v1039_v21 = vpop.f32.mrb[124].mxu0  ;;  %1369 = vmax.xlane.f32.xlu0 %v3227_v25  ;;  %v752_v17 = vpop.f32.mrb[125].mxu1 }
 0x20e   :  { %v1040_v26 = vadd.f32 %v1039_v21, %v750_v45  ;;  %v1041_v6 = vpop.f32.mrb[125].mxu0  ;;  %v753_v53 = vpop.f32.mrb[126].mxu1  ;;  %v3237_v51 = vsel %vm1184_vm0, %v1179_v13, -1e+30  ;;  %v3242_v17 = vsub.f32 %v2882_v50, %v1300_v41  ;;  %v1489_v21 = vmul.f32 1.442695, %v3233_v10 }
 0x20f   :  { %v1042_v63 = vpop.f32.mrb[126].mxu0  ;;  %1371 = vmax.xlane.f32.xlu1 %v3237_v51  ;;  %v755_v37 = vpop.f32.mrb[127].mxu1  ;;  %2133 = vpow2.f32 %v1487_v57 }
 0x210   :  { %v1109_v39 = vmul.f32 %v2675_v12, %v1040_v26  ;;  %v1043_v30 = vadd.f32 %v1042_v63, %v753_v53  ;;  %v1044_v45 = vpop.f32.mrb[127].mxu0  ;;  %v1491_v37 = vmul.f32 1.442695, %v3242_v17  ;;  %2135 = vpow2.f32 %v1489_v21 }
 0x212   :  { %v1110_v13 = vmul.f32 %v2675_v12, %v1043_v30  ;;  %v1302_v6 = vpop.xlane.xlu0 %1301  ;;  %v1180_v59 = vadd.f32 %v3070_v14, %v1109_v39  ;;  %v2128_v53 = vpop.eup %2127  ;;  %2137 = vpow2.f32 %v1491_v37 }
 0x213   :  { %v3249_v18 = vsub.f32 %v2890_v2, %v1302_v6  ;;  %v2130_v57 = vpop.eup %2129 }
 0x214   :  { %v1304_v50 = vpop.xlane.xlu1 %1303  ;;  %v3254_v41 = vsel %vm1184_vm0, %v1180_v59, -1e+30  ;;  %v1181_v60 = vadd.f32 %v3070_v14, %v1110_v13 }
 0x215   :  { %v3258_v26 = vsub.f32 %v2896_v16, %v1304_v50  ;;  %1373 = vmax.xlane.f32.xlu0 %v3254_v41  ;;  %v1493_v12 = vmul.f32 1.442695, %v3249_v18 }
 0x216   :  { %v3264_v2 = vsel %vm1184_vm0, %v1181_v60, -1e+30  ;;  %v2132_v39 = vpop.eup %2131 }
 0x217   :  { %1375 = vmax.xlane.f32.xlu1 %v3264_v2  ;;  %v1495_v63 = vmul.f32 1.442695, %v3258_v26  ;;  %2139 = vpow2.f32 %v1493_v12 }
 0x219   :  { %1609 = vadd.xlane.f32.xlu0 %v2128_v53  ;;  %2141 = vpow2.f32 %v1495_v63  ;;  %v2134_v21 = vpop.eup %2133 }
 0x21a   :  { %v1306_v16 = vpop.xlane.xlu0 %1305  ;;  %v2136_v6 = vpop.eup %2135 }
 0x21b   :  { %v3269_v14 = vsub.f32 %v2904_v32, %v1306_v16  ;;  %1611 = vadd.xlane.f32.xlu1 %v2130_v57 }
 0x21c   :  { %v1308_v30 = vpop.xlane.xlu1 %1307  ;;  %v2138_v32 = vpop.eup %2137 }
 0x21d   :  { %v1497_v15 = vmul.f32 1.442695, %v3269_v14  ;;  %v3273_v45 = vsub.f32 %v2910_v44, %v1308_v30  ;;  %1613 = vadd.xlane.f32.xlu0 %v2132_v39 }
 0x21f   :  { %2143 = vpow2.f32 %v1497_v15  ;;  %v1499_v13 = vmul.f32 1.442695, %v3273_v45  ;;  %1615 = vadd.xlane.f32.xlu1 %v2134_v21 }
 0x221   :  { %2145 = vpow2.f32 %v1499_v13  ;;  %1617 = vadd.xlane.f32.xlu0 %v2136_v6  ;;  %v2140_v50 = vpop.eup %2139 }
 0x222   :  { %v1310_v59 = vpop.xlane.xlu0 %1309 }
 0x223   :  { %v3277_v37 = vsub.f32 %v2918_v61, %v1310_v59  ;;  %1619 = vadd.xlane.f32.xlu1 %v2138_v32  ;;  %v2142_v53 = vpop.eup %2141 }
 0x224   :  { %v1312_v60 = vpop.xlane.xlu1 %1311 }
 0x225   :  { %v1501_v44 = vmul.f32 1.442695, %v3277_v37  ;;  %v3281_v12 = vsub.f32 %v2924_v9, %v1312_v60  ;;  %1621 = vadd.xlane.f32.xlu0 %v2140_v50 }
 0x227   :  { %2147 = vpow2.f32 %v1501_v44  ;;  %v1503_v63 = vmul.f32 1.442695, %v3281_v12  ;;  %1623 = vadd.xlane.f32.xlu1 %v2142_v53 }
 0x229   :  { %v2144_v57 = vpop.eup %2143  ;;  %2149 = vpow2.f32 %v1503_v63 }
 0x22a   :  { %1625 = vadd.xlane.f32.xlu0 %v2144_v57  ;;  %v1314_v16 = vpop.xlane.xlu0 %1313 }
 0x22b   :  { %v2146_v61 = vpop.eup %2145  ;;  %v3285_v39 = vsub.f32 %v2932_v29, %v1314_v16 }
 0x22c   :  { %v1316_v30 = vpop.xlane.xlu1 %1315  ;;  %1627 = vadd.xlane.f32.xlu1 %v2146_v61 }
 0x22d   :  { %v1505_v15 = vmul.f32 1.442695, %v3285_v39  ;;  %v3289_v9 = vsub.f32 %v2938_v46, %v1316_v30 }
 0x22f   :  { %2151 = vpow2.f32 %v1505_v15  ;;  %v1507_v21 = vmul.f32 1.442695, %v3289_v9 }
 0x231   :  { %v2148_v13 = vpop.eup %2147  ;;  %2153 = vpow2.f32 %v1507_v21 }
 0x232   :  { %1629 = vadd.xlane.f32.xlu0 %v2148_v13  ;;  %v1318_v6 = vpop.xlane.xlu0 %1317 }
 0x233   :  { %v2150_v32 = vpop.eup %2149  ;;  %v3293_v59 = vsub.f32 %v2946_v1, %v1318_v6 }
 0x234   :  { %v1320_v29 = vpop.xlane.xlu1 %1319  ;;  %1631 = vadd.xlane.f32.xlu1 %v2150_v32 }
 0x235   :  { %v1509_v50 = vmul.f32 1.442695, %v3293_v59  ;;  %v3297_v60 = vsub.f32 %v2952_v19, %v1320_v29 }
 0x237   :  { %2155 = vpow2.f32 %v1509_v50  ;;  %v1511_v46 = vmul.f32 1.442695, %v3297_v60 }
 0x239   :  { %v2152_v44 = vpop.eup %2151  ;;  %2157 = vpow2.f32 %v1511_v46 }
 0x23a   :  { %1633 = vadd.xlane.f32.xlu0 %v2152_v44  ;;  %v1322_v53 = vpop.xlane.xlu0 %1321 }
 0x23b   :  { %v2154_v63 = vpop.eup %2153  ;;  %v3301_v57 = vsub.f32 %v2963_v43, %v1322_v53 }
 0x23c   :  { %v1324_v1 = vpop.xlane.xlu1 %1323  ;;  %1635 = vadd.xlane.f32.xlu1 %v2154_v63 }
 0x23d   :  { %v1513_v16 = vmul.f32 1.442695, %v3301_v57  ;;  %v3305_v61 = vsub.f32 %v2970_v33, %v1324_v1 }
 0x23f   :  { %2159 = vpow2.f32 %v1513_v16  ;;  %v1515_v19 = vmul.f32 1.442695, %v3305_v61 }
 0x241   :  { %v2156_v30 = vpop.eup %2155  ;;  %2161 = vpow2.f32 %v1515_v19 }
 0x242   :  { %1637 = vadd.xlane.f32.xlu0 %v2156_v30  ;;  %v1326_v15 = vpop.xlane.xlu0 %1325 }
 0x243   :  { %v2158_v21 = vpop.eup %2157  ;;  %v3309_v13 = vsub.f32 %v2985_v34, %v1326_v15 }
 0x244   :  { %v1328_v43 = vpop.xlane.xlu1 %1327  ;;  %1639 = vadd.xlane.f32.xlu1 %v2158_v21 }
 0x245   :  { %v1517_v6 = vmul.f32 1.442695, %v3309_v13  ;;  %v3313_v32 = vsub.f32 %v2992_v54, %v1328_v43 }
 0x247   :  { %2163 = vpow2.f32 %v1517_v6  ;;  %v1519_v33 = vmul.f32 1.442695, %v3313_v32  ;;  %v1570_v29 = vpop.xlane.xlu0 %1569 }
 0x248   :  { %2165 = vlog2.f32 %v1570_v29 }
 0x249   :  { %v2160_v50 = vpop.eup %2159  ;;  %2167 = vpow2.f32 %v1519_v33 }
 0x24a   :  { %1641 = vadd.xlane.f32.xlu0 %v2160_v50 }
 0x24b   :  { %v2162_v46 = vpop.eup %2161  ;;  %v1572_v44 = vpop.xlane.xlu1 %1571 }
 0x24c   :  { %v1330_v53 = vpop.xlane.xlu0 %1329  ;;  %2169 = vlog2.f32 %v1572_v44  ;;  %1643 = vadd.xlane.f32.xlu1 %v2162_v46 }
 0x24d   :  { %v3317_v34 = vsub.f32 %v3007_v35, %v1330_v53 }
 0x24f   :  { %v1521_v63 = vmul.f32 1.442695, %v3317_v34  ;;  %v1332_v54 = vpop.xlane.xlu1 %1331 }
 0x250   :  { %v1574_v1 = vpop.xlane.xlu0 %1573  ;;  %v3321_v16 = vsub.f32 %v3019_v22, %v1332_v54 }
 0x251   :  { %2171 = vpow2.f32 %v1521_v63  ;;  %v2164_v19 = vpop.eup %2163 }
 0x252   :  { %2173 = vlog2.f32 %v1574_v1  ;;  %v2166_v30 = vpop.eup %2165  ;;  %v1523_v15 = vmul.f32 1.442695, %v3321_v16  ;;  %1645 = vadd.xlane.f32.xlu0 %v2164_v19 }
 0x253   :  { %v2168_v21 = vpop.eup %2167  ;;  %v1698_v43 = vmul.f32 0.6931472, %v2166_v30  ;;  %v1576_v6 = vpop.xlane.xlu1 %1575 }
 0x254   :  { %v1334_v35 = vpop.xlane.xlu0 %1333  ;;  %2175 = vpow2.f32 %v1523_v15  ;;  %1647 = vadd.xlane.f32.xlu1 %v2168_v21 }
 0x255   :  { %v3325_v33 = vsub.f32 %v3029_v48, %v1334_v35  ;;  %v1825_v29 = vsub.f32 %v2959_v38, %v1698_v43  ;;  %2177 = vlog2.f32 %v1576_v6 }
 0x256   :  { %v2170_v22 = vpop.eup %2169 }
 0x257   :  { %v1525_v50 = vmul.f32 1.442695, %v3325_v33  ;;  %1889 = vst [vmem:[%s3672_s4] sm:$0xff] %v1825_v29  ;;  %v1700_v46 = vmul.f32 0.6931472, %v2170_v22  ;;  %v1336_v44 = vpop.xlane.xlu1 %1335 }
 0x258   :  { %v1578_v53 = vpop.xlane.xlu0 %1577  ;;  %v3333_v63 = vsub.f32 %v3041_v36, %v1336_v44 }
 0x259   :  { %2179 = vpow2.f32 %v1525_v50  ;;  %v1826_v48 = vsub.f32 %v2973_v62, %v1700_v46 }
 0x25a   :  { %2181 = vlog2.f32 %v1578_v53  ;;  %v1527_v38 = vmul.f32 1.442695, %v3333_v63 }
 0x25b   :  { %v2172_v54 = vpop.eup %2171  ;;  %1890 = vst [vmem:[%s3672_s4 + $0x8] sm:$0xff] %v1826_v48  ;;  %v1580_v19 = vpop.xlane.xlu1 %1579 }
 0x25c   :  { %v2174_v1 = vpop.eup %2173  ;;  %1649 = vadd.xlane.f32.xlu0 %v2172_v54  ;;  %v1338_v30 = vpop.xlane.xlu0 %1337  ;;  %2183 = vpow2.f32 %v1527_v38 }
 0x25d   :  { %v1702_v15 = vmul.f32 0.6931472, %v2174_v1  ;;  %v3341_v21 = vsub.f32 %v3051_v3, %v1338_v30  ;;  %2185 = vlog2.f32 %v1580_v19 }
 0x25e   :  { %v2176_v36 = vpop.eup %2175 }
 0x25f   :  { %v1827_v62 = vsub.f32 %v2981_v49, %v1702_v15  ;;  %v1529_v43 = vmul.f32 1.442695, %v3341_v21  ;;  %v2178_v6 = vpop.eup %2177  ;;  %1651 = vadd.xlane.f32.xlu1 %v2176_v36  ;;  %v1340_v35 = vpop.xlane.xlu1 %1339 }
 0x260   :  { %v1582_v29 = vpop.xlane.xlu0 %1581  ;;  %v1704_v22 = vmul.f32 0.6931472, %v2178_v6  ;;  %v3349_v50 = vsub.f32 %v3063_v24, %v1340_v35 }
 0x261   :  { %1891 = vst [vmem:[%s3672_s4 + $0x10] sm:$0xff] %v1827_v62  ;;  %2187 = vpow2.f32 %v1529_v43 }
 0x262   :  { %2189 = vlog2.f32 %v1582_v29  ;;  %v1828_v46 = vsub.f32 %v2995_v56, %v1704_v22  ;;  %v1531_v49 = vmul.f32 1.442695, %v3349_v50 }
 0x263   :  { %v2180_v3 = vpop.eup %2179  ;;  %v1584_v53 = vpop.xlane.xlu1 %1583 }
 0x264   :  { %v2182_v44 = vpop.eup %2181  ;;  %1653 = vadd.xlane.f32.xlu0 %v2180_v3  ;;  %v1342_v48 = vpop.xlane.xlu0 %1341  ;;  %1892 = vst [vmem:[%s3672_s4 + $0x18] sm:$0xff] %v1828_v46  ;;  %2191 = vpow2.f32 %v1531_v49 }
 0x265   :  { %v1706_v54 = vmul.f32 0.6931472, %v2182_v44  ;;  %v3357_v38 = vsub.f32 %v3078_v55, %v1342_v48  ;;  %2193 = vlog2.f32 %v1584_v53 }
 0x266   :  { %v2184_v24 = vpop.eup %2183 }
 0x267   :  { %v1829_v1 = vsub.f32 %v3003_v7, %v1706_v54  ;;  %v1533_v56 = vmul.f32 1.442695, %v3357_v38  ;;  %v2186_v19 = vpop.eup %2185  ;;  %1655 = vadd.xlane.f32.xlu1 %v2184_v24  ;;  %v1344_v30 = vpop.xlane.xlu1 %1343 }
 0x268   :  { %v1586_v15 = vpop.xlane.xlu0 %1585  ;;  %v1708_v36 = vmul.f32 0.6931472, %v2186_v19  ;;  %v3365_v62 = vsub.f32 %v3090_v42, %v1344_v30 }
 0x269   :  { %1893 = vst [vmem:[%s3672_s4 + $0x20] sm:$0xff] %v1829_v1  ;;  %2195 = vpow2.f32 %v1533_v56 }
 0x26a   :  { %2197 = vlog2.f32 %v1586_v15  ;;  %v1830_v43 = vsub.f32 %v3011_v47, %v1708_v36  ;;  %v1535_v7 = vmul.f32 1.442695, %v3365_v62  ;;  %v3707_v36 = vld [vmem:[#allocation3_spill] sm:$0xff] }
 0x26b   :  { %v2188_v55 = vpop.eup %2187  ;;  %v1588_v35 = vpop.xlane.xlu1 %1587 }
 0x26c   :  { %v2190_v6 = vpop.eup %2189  ;;  %1657 = vadd.xlane.f32.xlu0 %v2188_v55  ;;  %v1346_v29 = vpop.xlane.xlu0 %1345  ;;  %1894 = vst [vmem:[%s3672_s4 + $0x28] sm:$0xff] %v1830_v43  ;;  %2199 = vpow2.f32 %v1535_v7 }
 0x26d   :  { %v1710_v22 = vmul.f32 0.6931472, %v2190_v6  ;;  %v3373_v3 = vsub.f32 %v3100_v0, %v1346_v29  ;;  %2201 = vlog2.f32 %v1588_v35 }
 0x26e   :  { %v2192_v42 = vpop.eup %2191 }
 0x26f   :  { %v1831_v46 = vsub.f32 %v3025_v28, %v1710_v22  ;;  %v1537_v47 = vmul.f32 1.442695, %v3373_v3  ;;  %v2194_v49 = vpop.eup %2193  ;;  %1659 = vadd.xlane.f32.xlu1 %v2192_v42  ;;  %v1348_v44 = vpop.xlane.xlu1 %1347  ;;  %v3708_v22 = vld [vmem:[#allocation4_spill] sm:$0xff] }
 0x270   :  { %v1590_v53 = vpop.xlane.xlu0 %1589  ;;  %v1712_v48 = vmul.f32 0.6931472, %v2194_v49  ;;  %v3381_v54 = vsub.f32 %v3112_v4, %v1348_v44 }
 0x271   :  { %1895 = vst [vmem:[%s3672_s4 + $0x30] sm:$0xff] %v1831_v46  ;;  %2203 = vpow2.f32 %v1537_v47 }
 0x272   :  { %2205 = vlog2.f32 %v1590_v53  ;;  %v1832_v24 = vsub.f32 %v3033_v58, %v1712_v48  ;;  %v1539_v28 = vmul.f32 1.442695, %v3381_v54 }
 0x273   :  { %v2196_v0 = vpop.eup %2195  ;;  %v1592_v56 = vpop.xlane.xlu1 %1591 }
 0x274   :  { %v2198_v1 = vpop.eup %2197  ;;  %1661 = vadd.xlane.f32.xlu0 %v2196_v0  ;;  %v1350_v19 = vpop.xlane.xlu0 %1349  ;;  %1896 = vst [vmem:[%s3672_s4 + $0x38] sm:$0xff] %v1832_v24  ;;  %2207 = vpow2.f32 %v1539_v28  ;;  %v3709_v0 = vld [vmem:[#allocation5_spill] sm:$0xff] }
 0x275   :  { %v1714_v30 = vmul.f32 0.6931472, %v2198_v1  ;;  %v3389_v15 = vsub.f32 %v3122_v20, %v1350_v19  ;;  %2209 = vlog2.f32 %v1592_v56 }
 0x276   :  { %v2200_v4 = vpop.eup %2199 }
 0x277   :  { %v1833_v55 = vsub.f32 %v3707_v36, %v1714_v30  ;;  %v1541_v58 = vmul.f32 1.442695, %v3389_v15  ;;  %v2202_v43 = vpop.eup %2201  ;;  %1663 = vadd.xlane.f32.xlu1 %v2200_v4  ;;  %v1352_v7 = vpop.xlane.xlu1 %1351  ;;  %v3710_v36 = vld [vmem:[#allocation6_spill] sm:$0xff] }
 0x278   :  { %v1594_v6 = vpop.xlane.xlu0 %1593  ;;  %v1716_v35 = vmul.f32 0.6931472, %v2202_v43  ;;  %v3397_v29 = vsub.f32 %v3134_v8, %v1352_v7 }
 0x279   :  { %1897 = vst [vmem:[%s3672_s4 + $0x40] sm:$0xff] %v1833_v55  ;;  %2211 = vpow2.f32 %v1541_v58 }
 0x27a   :  { %2213 = vlog2.f32 %v1594_v6  ;;  %v1834_v42 = vsub.f32 %v3708_v22, %v1716_v35  ;;  %v1543_v46 = vmul.f32 1.442695, %v3397_v29 }
 0x27b   :  { %v2204_v20 = vpop.eup %2203  ;;  %v1596_v49 = vpop.xlane.xlu1 %1595 }
 0x27c   :  { %v2206_v47 = vpop.eup %2205  ;;  %1665 = vadd.xlane.f32.xlu0 %v2204_v20  ;;  %v1354_v44 = vpop.xlane.xlu0 %1353  ;;  %1898 = vst [vmem:[%s3672_s4 + $0x48] sm:$0xff] %v1834_v42  ;;  %2215 = vpow2.f32 %v1543_v46  ;;  %v3711_v20 = vld [vmem:[#allocation14_spill] sm:$0xff]  ;;  %v3712_v42 = vld [vmem:[#allocation7_spill] sm:$0xff] }
 0x27d   :  { %v1718_v53 = vmul.f32 0.6931472, %v2206_v47  ;;  %v3405_v48 = vsub.f32 %v3144_v40, %v1354_v44  ;;  %2217 = vlog2.f32 %v1596_v49 }
 0x27e   :  { %v2208_v8 = vpop.eup %2207 }
 0x27f   :  { %v1835_v24 = vsub.f32 %v3709_v0, %v1718_v53  ;;  %v1545_v28 = vmul.f32 1.442695, %v3405_v48  ;;  %v2210_v1 = vpop.eup %2209  ;;  %1667 = vadd.xlane.f32.xlu1 %v2208_v8  ;;  %v1356_v56 = vpop.xlane.xlu1 %1355  ;;  %v3713_v0 = vld [vmem:[#allocation16_spill] sm:$0xff] }
 0x280   :  { %v1598_v19 = vpop.xlane.xlu0 %1597  ;;  %v1720_v30 = vmul.f32 0.6931472, %v2210_v1  ;;  %v3413_v4 = vsub.f32 %v3156_v52, %v1356_v56  ;;  %v3714_v1 = vld [vmem:[#allocation8_spill] sm:$0xff] }
 0x281   :  { %1899 = vst [vmem:[%s3672_s4 + $0x50] sm:$0xff] %v1835_v24  ;;  %2219 = vpow2.f32 %v1545_v28 }
 0x282   :  { %2221 = vlog2.f32 %v1598_v19  ;;  %v1836_v55 = vsub.f32 %v3710_v36, %v1720_v30  ;;  %v1547_v58 = vmul.f32 1.442695, %v3413_v4 }
 0x283   :  { %v2212_v40 = vpop.eup %2211  ;;  %v1600_v7 = vpop.xlane.xlu1 %1599 }
 0x284   :  { %v2214_v43 = vpop.eup %2213  ;;  %1669 = vadd.xlane.f32.xlu0 %v2212_v40  ;;  %v1358_v6 = vpop.xlane.xlu0 %1357  ;;  %1900 = vst [vmem:[%s3672_s4 + $0x58] sm:$0xff] %v1836_v55  ;;  %2223 = vpow2.f32 %v1547_v58  ;;  %v3715_v58 = vld [vmem:[#allocation17_spill] sm:$0xff] }
 0x285   :  { %v1722_v35 = vmul.f32 0.6931472, %v2214_v43  ;;  %v3421_v22 = vsub.f32 %v3711_v20, %v1358_v6  ;;  %2225 = vlog2.f32 %v1600_v7  ;;  %v3716_v6 = vld [vmem:[#allocation9_spill] sm:$0xff] }
 0x286   :  { %v2216_v52 = vpop.eup %2215 }
 0x287   :  { %v1837_v46 = vsub.f32 %v3712_v42, %v1722_v35  ;;  %v1549_v47 = vmul.f32 1.442695, %v3421_v22  ;;  %v2218_v49 = vpop.eup %2217  ;;  %1671 = vadd.xlane.f32.xlu1 %v2216_v52  ;;  %v1360_v44 = vpop.xlane.xlu1 %1359 }
 0x288   :  { %v1602_v53 = vpop.xlane.xlu0 %1601  ;;  %v1724_v8 = vmul.f32 0.6931472, %v2218_v49  ;;  %v3429_v24 = vsub.f32 %v3713_v0, %v1360_v44  ;;  %v3717_v49 = vld [vmem:[#allocation18_spill] sm:$0xff] }
 0x289   :  { %1901 = vst [vmem:[%s3672_s4 + $0x60] sm:$0xff] %v1837_v46  ;;  %2227 = vpow2.f32 %v1549_v47 }
 0x28a   :  { %2229 = vlog2.f32 %v1602_v53  ;;  %v1838_v56 = vsub.f32 %v3714_v1, %v1724_v8  ;;  %v1551_v19 = vmul.f32 1.442695, %v3429_v24  ;;  %v3718_v8 = vld [vmem:[#allocation10_spill] sm:$0xff] }
 0x28b   :  { %v2220_v28 = vpop.eup %2219  ;;  %v1604_v40 = vpop.xlane.xlu1 %1603 }
 0x28c   :  { %v2222_v30 = vpop.eup %2221  ;;  %1673 = vadd.xlane.f32.xlu0 %v2220_v28  ;;  %v1362_v36 = vpop.xlane.xlu0 %1361  ;;  %1902 = vst [vmem:[%s3672_s4 + $0x68] sm:$0xff] %v1838_v56  ;;  %2231 = vpow2.f32 %v1551_v19 }
 0x28d   :  { %v1726_v55 = vmul.f32 0.6931472, %v2222_v30  ;;  %v3437_v43 = vsub.f32 %v3715_v58, %v1362_v36  ;;  %2233 = vlog2.f32 %v1604_v40 }
 0x28e   :  { %v2224_v7 = vpop.eup %2223 }
 0x28f   :  { %v1839_v35 = vsub.f32 %v3716_v6, %v1726_v55  ;;  %v1553_v20 = vmul.f32 1.442695, %v3437_v43  ;;  %v2226_v52 = vpop.eup %2225  ;;  %1675 = vadd.xlane.f32.xlu1 %v2224_v7  ;;  %v1364_v42 = vpop.xlane.xlu1 %1363  ;;  %v3719_v55 = vld [vmem:[#allocation11_spill] sm:$0xff] }
 0x290   :  { %v1606_v46 = vpop.xlane.xlu0 %1605  ;;  %v1728_v47 = vmul.f32 0.6931472, %v2226_v52  ;;  %v3445_v44 = vsub.f32 %v3717_v49, %v1364_v42  ;;  %v3720_v42 = vld [vmem:[#allocation12_spill] sm:$0xff] }
 0x291   :  { %1903 = vst [vmem:[%s3672_s4 + $0x70] sm:$0xff] %v1839_v35  ;;  %2235 = vpow2.f32 %v1553_v20 }
 0x292   :  { %2237 = vlog2.f32 %v1606_v46  ;;  %v1840_v0 = vsub.f32 %v3718_v8, %v1728_v47  ;;  %v1555_v28 = vmul.f32 1.442695, %v3445_v44 }
 0x293   :  { %v2228_v53 = vpop.eup %2227  ;;  %v1608_v56 = vpop.xlane.xlu1 %1607 }
 0x294   :  { %v2230_v1 = vpop.eup %2229  ;;  %1677 = vadd.xlane.f32.xlu0 %v2228_v53  ;;  %v1366_v19 = vpop.xlane.xlu0 %1365  ;;  %1904 = vst [vmem:[%s3672_s4 + $0x78] sm:$0xff] %v1840_v0  ;;  %2239 = vpow2.f32 %v1555_v28 }
 0x295   :  { %v1730_v30 = vmul.f32 0.6931472, %v2230_v1  ;;  %v3453_v40 = vsub.f32 %v3199_v31, %v1366_v19  ;;  %2241 = vlog2.f32 %v1608_v56  ;;  %v3721_v19 = vld [vmem:[#allocation13_spill] sm:$0xff] }
 0x296   :  { %v2232_v36 = vpop.eup %2231 }
 0x297   :  { %v1841_v58 = vsub.f32 %v3719_v55, %v1730_v30  ;;  %v1557_v7 = vmul.f32 1.442695, %v3453_v40  ;;  %v2234_v6 = vpop.eup %2233  ;;  %1679 = vadd.xlane.f32.xlu1 %v2232_v36  ;;  %v1368_v35 = vpop.xlane.xlu1 %1367 }
 0x298   :  { %v1732_v20 = vmul.f32 0.6931472, %v2234_v6  ;;  %v3461_v52 = vsub.f32 %v3213_v23, %v1368_v35 }
 0x299   :  { %1905 = vst [vmem:[%s3672_s4 + $0x80] sm:$0xff] %v1841_v58  ;;  %2243 = vpow2.f32 %v1557_v7  ;;  %v3722_v7 = vld [vmem:[#allocation15_spill] sm:$0xff] }
 0x29a   :  { %v1842_v46 = vsub.f32 %v3720_v42, %v1732_v20  ;;  %v1559_v47 = vmul.f32 1.442695, %v3461_v52  ;;  %v1370_v49 = vpop.xlane.xlu0 %1369 }
 0x29b   :  { %v2236_v31 = vpop.eup %2235  ;;  %v3466_v8 = vsub.f32 %v3227_v25, %v1370_v49 }
 0x29c   :  { %v2238_v53 = vpop.eup %2237  ;;  %1681 = vadd.xlane.f32.xlu0 %v2236_v31  ;;  %1906 = vst [vmem:[%s3672_s4 + $0x88] sm:$0xff] %v1842_v46  ;;  %2245 = vpow2.f32 %v1559_v47  ;;  %v1372_v28 = vpop.xlane.xlu1 %1371 }
 0x29d   :  { %v1734_v0 = vmul.f32 0.6931472, %v2238_v53  ;;  %v1561_v23 = vmul.f32 1.442695, %v3466_v8  ;;  %v3473_v1 = vsub.f32 %v3237_v51, %v1372_v28 }
 0x29e   :  { %v2240_v56 = vpop.eup %2239 }
 0x29f   :  { %v1843_v30 = vsub.f32 %v3721_v19, %v1734_v0  ;;  %v2242_v36 = vpop.eup %2241  ;;  %2247 = vpow2.f32 %v1561_v23  ;;  %v1563_v25 = vmul.f32 1.442695, %v3473_v1  ;;  %1683 = vadd.xlane.f32.xlu1 %v2240_v56 }
 0x2a0   :  { %v1736_v55 = vmul.f32 0.6931472, %v2242_v36 }
 0x2a1   :  { %1907 = vst [vmem:[%s3672_s4 + $0x90] sm:$0xff] %v1843_v30  ;;  %2249 = vpow2.f32 %v1563_v25 }
 0x2a2   :  { %v1844_v6 = vsub.f32 %v3722_v7, %v1736_v55  ;;  %v1374_v35 = vpop.xlane.xlu0 %1373 }
 0x2a3   :  { %v2244_v58 = vpop.eup %2243  ;;  %v3482_v51 = vsub.f32 %v3254_v41, %v1374_v35 }
 0x2a4   :  { %1685 = vadd.xlane.f32.xlu0 %v2244_v58  ;;  %1908 = vst [vmem:[%s3672_s4 + $0x98] sm:$0xff] %v1844_v6  ;;  %v1376_v20 = vpop.xlane.xlu1 %1375 }
 0x2a5   :  { %v1565_v31 = vmul.f32 1.442695, %v3482_v51  ;;  %v3489_v42 = vsub.f32 %v3264_v2, %v1376_v20 }
 0x2a6   :  { %v2246_v46 = vpop.eup %2245  ;;  %v1610_v47 = vpop.xlane.xlu0 %1609 }
 0x2a7   :  { %2251 = vpow2.f32 %v1565_v31  ;;  %v1567_v49 = vmul.f32 1.442695, %v3489_v42  ;;  %1687 = vadd.xlane.f32.xlu1 %v2246_v46 }
 0x2a8   :  { %2253 = vlog2.f32 %v1610_v47  ;;  %v1612_v41 = vpop.xlane.xlu1 %1611 }
 0x2a9   :  { %v2248_v53 = vpop.eup %2247  ;;  %2255 = vpow2.f32 %v1567_v49 }
 0x2aa   :  { %2257 = vlog2.f32 %v1612_v41  ;;  %1689 = vadd.xlane.f32.xlu0 %v2248_v53  ;;  %v1614_v0 = vpop.xlane.xlu0 %1613  ;;  %v3723_v41 = vld [vmem:[#allocation19_spill] sm:$0xff] }
 0x2ab   :  { %v2250_v28 = vpop.eup %2249  ;;  %2259 = vlog2.f32 %v1614_v0 }
 0x2ac   :  { %1691 = vadd.xlane.f32.xlu1 %v2250_v28  ;;  %v1616_v23 = vpop.xlane.xlu1 %1615 }
 0x2ad   :  { %2261 = vlog2.f32 %v1616_v23 }
 0x2ae   :  { %v1618_v2 = vpop.xlane.xlu0 %1617 }
 0x2af   :  { %2263 = vlog2.f32 %v1618_v2 }
 0x2b0   :  { %v1620_v56 = vpop.xlane.xlu1 %1619 }
 0x2b1   :  { %v2252_v19 = vpop.eup %2251  ;;  %2265 = vlog2.f32 %v1620_v56 }
 0x2b2   :  { %v2254_v30 = vpop.eup %2253  ;;  %1693 = vadd.xlane.f32.xlu0 %v2252_v19  ;;  %v1622_v36 = vpop.xlane.xlu0 %1621 }
 0x2b3   :  { %v2256_v25 = vpop.eup %2255  ;;  %v1738_v55 = vmul.f32 0.6931472, %v2254_v30  ;;  %2267 = vlog2.f32 %v1622_v36 }
 0x2b4   :  { %v2258_v58 = vpop.eup %2257  ;;  %1695 = vadd.xlane.f32.xlu1 %v2256_v25  ;;  %v1624_v7 = vpop.xlane.xlu1 %1623 }
 0x2b5   :  { %v2260_v6 = vpop.eup %2259  ;;  %v1845_v35 = vsub.f32 %v3202_v11, %v1738_v55  ;;  %v1740_v20 = vmul.f32 0.6931472, %v2258_v58  ;;  %2269 = vlog2.f32 %v1624_v7 }
 0x2b6   :  { %v1742_v31 = vmul.f32 0.6931472, %v2260_v6 }
 0x2b7   :  { %v2262_v46 = vpop.eup %2261  ;;  %1909 = vst [vmem:[%s3672_s4 + $0xa0] sm:$0xff] %v1845_v35  ;;  %v1846_v47 = vsub.f32 %v3207_v27, %v1740_v20  ;;  %v1626_v49 = vpop.xlane.xlu0 %1625 }
 0x2b8   :  { %v1847_v53 = vsub.f32 %v3723_v41, %v1742_v31  ;;  %v1744_v0 = vmul.f32 0.6931472, %v2262_v46  ;;  %2271 = vlog2.f32 %v1626_v49 }
 0x2b9   :  { %v2264_v28 = vpop.eup %2263  ;;  %1910 = vst [vmem:[%s3672_s4 + $0xa8] sm:$0xff] %v1846_v47  ;;  %v1628_v11 = vpop.xlane.xlu1 %1627 }
 0x2ba   :  { %1911 = vst [vmem:[%s3672_s4 + $0xb0] sm:$0xff] %v1847_v53  ;;  %v1848_v23 = vsub.f32 %v3223_v5, %v1744_v0  ;;  %v1746_v2 = vmul.f32 0.6931472, %v2264_v28  ;;  %2273 = vlog2.f32 %v1628_v11 }
 0x2bb   :  { %v2266_v27 = vpop.eup %2265 }
 0x2bc   :  { %1912 = vst [vmem:[%s3672_s4 + $0xb8] sm:$0xff] %v1848_v23  ;;  %v1849_v56 = vsub.f32 %v3233_v10, %v1746_v2  ;;  %v1748_v19 = vmul.f32 0.6931472, %v2266_v27 }
 0x2bd   :  { %v2268_v30 = vpop.eup %2267 }
 0x2be   :  { %1913 = vst [vmem:[%s3672_s4 + $0xc0] sm:$0xff] %v1849_v56  ;;  %v1850_v36 = vsub.f32 %v3242_v17, %v1748_v19  ;;  %v1750_v25 = vmul.f32 0.6931472, %v2268_v30 }
 0x2bf   :  { %v2270_v55 = vpop.eup %2269  ;;  %v1630_v5 = vpop.xlane.xlu0 %1629 }
 0x2c0   :  { %1914 = vst [vmem:[%s3672_s4 + $0xc8] sm:$0xff] %v1850_v36  ;;  %v1851_v58 = vsub.f32 %v3249_v18, %v1750_v25  ;;  %v1752_v7 = vmul.f32 0.6931472, %v2270_v55  ;;  %2275 = vlog2.f32 %v1630_v5 }
 0x2c1   :  { %v1632_v10 = vpop.xlane.xlu1 %1631 }
 0x2c2   :  { %v2272_v6 = vpop.eup %2271  ;;  %1915 = vst [vmem:[%s3672_s4 + $0xd0] sm:$0xff] %v1851_v58  ;;  %v1852_v35 = vsub.f32 %v3258_v26, %v1752_v7  ;;  %2277 = vlog2.f32 %v1632_v10 }
 0x2c3   :  { %v1754_v17 = vmul.f32 0.6931472, %v2272_v6 }
 0x2c4   :  { %v2274_v20 = vpop.eup %2273  ;;  %1916 = vst [vmem:[%s3672_s4 + $0xd8] sm:$0xff] %v1852_v35 }
 0x2c5   :  { %v1853_v31 = vsub.f32 %v3269_v14, %v1754_v17  ;;  %v1756_v18 = vmul.f32 0.6931472, %v2274_v20 }
 0x2c7   :  { %1917 = vst [vmem:[%s3672_s4 + $0xe0] sm:$0xff] %v1853_v31  ;;  %v1854_v46 = vsub.f32 %v3273_v45, %v1756_v18  ;;  %v1634_v47 = vpop.xlane.xlu0 %1633 }
 0x2c8   :  { %2279 = vlog2.f32 %v1634_v47 }
 0x2c9   :  { %1918 = vst [vmem:[%s3672_s4 + $0xe8] sm:$0xff] %v1854_v46  ;;  %v1636_v26 = vpop.xlane.xlu1 %1635 }
 0x2ca   :  { %v2276_v49 = vpop.eup %2275  ;;  %2281 = vlog2.f32 %v1636_v26 }
 0x2cb   :  { %v1758_v41 = vmul.f32 0.6931472, %v2276_v49 }
 0x2cc   :  { %v2278_v53 = vpop.eup %2277 }
 0x2cd   :  { %v1855_v14 = vsub.f32 %v3277_v37, %v1758_v41  ;;  %v1760_v0 = vmul.f32 0.6931472, %v2278_v53 }
 0x2cf   :  { %1919 = vst [vmem:[%s3672_s4 + $0xf0] sm:$0xff] %v1855_v14  ;;  %v1856_v45 = vsub.f32 %v3281_v12, %v1760_v0  ;;  %v1638_v28 = vpop.xlane.xlu0 %1637 }
 0x2d0   :  { %2283 = vlog2.f32 %v1638_v28 }
 0x2d1   :  { %1920 = vst [vmem:[%s3672_s4 + $0xf8] sm:$0xff] %v1856_v45  ;;  %v1640_v11 = vpop.xlane.xlu1 %1639 }
 0x2d2   :  { %v2280_v23 = vpop.eup %2279  ;;  %2285 = vlog2.f32 %v1640_v11 }
 0x2d3   :  { %v1762_v2 = vmul.f32 0.6931472, %v2280_v23 }
 0x2d4   :  { %v2282_v27 = vpop.eup %2281 }
 0x2d5   :  { %v1857_v37 = vsub.f32 %v3285_v39, %v1762_v2  ;;  %v1764_v56 = vmul.f32 0.6931472, %v2282_v27 }
 0x2d7   :  { %1921 = vst [vmem:[%s3672_s4 + $0x100] sm:$0xff] %v1857_v37  ;;  %v1858_v12 = vsub.f32 %v3289_v9, %v1764_v56  ;;  %v1642_v19 = vpop.xlane.xlu0 %1641 }
 0x2d8   :  { %2287 = vlog2.f32 %v1642_v19 }
 0x2d9   :  { %1922 = vst [vmem:[%s3672_s4 + $0x108] sm:$0xff] %v1858_v12  ;;  %v1644_v30 = vpop.xlane.xlu1 %1643 }
 0x2da   :  { %v2284_v36 = vpop.eup %2283  ;;  %2289 = vlog2.f32 %v1644_v30 }
 0x2db   :  { %v1766_v25 = vmul.f32 0.6931472, %v2284_v36 }
 0x2dc   :  { %v2286_v55 = vpop.eup %2285 }
 0x2dd   :  { %v1859_v39 = vsub.f32 %v3293_v59, %v1766_v25  ;;  %v1768_v5 = vmul.f32 0.6931472, %v2286_v55 }
 0x2df   :  { %1923 = vst [vmem:[%s3672_s4 + $0x110] sm:$0xff] %v1859_v39  ;;  %v1860_v9 = vsub.f32 %v3297_v60, %v1768_v5  ;;  %v1646_v58 = vpop.xlane.xlu0 %1645 }
 0x2e0   :  { %2291 = vlog2.f32 %v1646_v58 }
 0x2e1   :  { %1924 = vst [vmem:[%s3672_s4 + $0x118] sm:$0xff] %v1860_v9  ;;  %v1648_v7 = vpop.xlane.xlu1 %1647 }
 0x2e2   :  { %v2288_v10 = vpop.eup %2287  ;;  %2293 = vlog2.f32 %v1648_v7 }
 0x2e3   :  { %v1770_v6 = vmul.f32 0.6931472, %v2288_v10 }
 0x2e4   :  { %v2290_v35 = vpop.eup %2289 }
 0x2e5   :  { %v1861_v59 = vsub.f32 %v3301_v57, %v1770_v6  ;;  %v1772_v17 = vmul.f32 0.6931472, %v2290_v35 }
 0x2e7   :  { %1925 = vst [vmem:[%s3672_s4 + $0x120] sm:$0xff] %v1861_v59  ;;  %v1862_v60 = vsub.f32 %v3305_v61, %v1772_v17 }
 0x2e9   :  { %v1650_v20 = vpop.xlane.xlu0 %1649  ;;  %1926 = vst [vmem:[%s3672_s4 + $0x128] sm:$0xff] %v1862_v60 }
 0x2ea   :  { %2295 = vlog2.f32 %v1650_v20  ;;  %v2292_v31 = vpop.eup %2291 }
 0x2eb   :  { %v1774_v18 = vmul.f32 0.6931472, %v2292_v31 }
 0x2ec   :  { %v2294_v46 = vpop.eup %2293  ;;  %v1652_v47 = vpop.xlane.xlu1 %1651 }
 0x2ed   :  { %v1863_v26 = vsub.f32 %v3309_v13, %v1774_v18  ;;  %v1776_v57 = vmul.f32 0.6931472, %v2294_v46  ;;  %2297 = vlog2.f32 %v1652_v47 }
 0x2ef   :  { %1927 = vst [vmem:[%s3672_s4 + $0x130] sm:$0xff] %v1863_v26  ;;  %v1864_v61 = vsub.f32 %v3313_v32, %v1776_v57 }
 0x2f1   :  { %v1654_v49 = vpop.xlane.xlu0 %1653  ;;  %1928 = vst [vmem:[%s3672_s4 + $0x138] sm:$0xff] %v1864_v61 }
 0x2f2   :  { %2299 = vlog2.f32 %v1654_v49 }
 0x2f4   :  { %v2296_v41 = vpop.eup %2295  ;;  %v1656_v14 = vpop.xlane.xlu1 %1655 }
 0x2f5   :  { %v1778_v53 = vmul.f32 0.6931472, %v2296_v41  ;;  %2301 = vlog2.f32 %v1656_v14 }
 0x2f7   :  { %v1865_v13 = vsub.f32 %v3317_v34, %v1778_v53  ;;  %v2298_v0 = vpop.eup %2297 }
 0x2f8   :  { %v1780_v45 = vmul.f32 0.6931472, %v2298_v0 }
 0x2f9   :  { %1929 = vst [vmem:[%s3672_s4 + $0x140] sm:$0xff] %v1865_v13  ;;  %v1658_v28 = vpop.xlane.xlu0 %1657 }
 0x2fa   :  { %2303 = vlog2.f32 %v1658_v28  ;;  %v1866_v32 = vsub.f32 %v3321_v16, %v1780_v45 }
 0x2fc   :  { %v2300_v11 = vpop.eup %2299  ;;  %1930 = vst [vmem:[%s3672_s4 + $0x148] sm:$0xff] %v1866_v32  ;;  %v1660_v2 = vpop.xlane.xlu1 %1659 }
 0x2fd   :  { %v1782_v23 = vmul.f32 0.6931472, %v2300_v11  ;;  %2305 = vlog2.f32 %v1660_v2 }
 0x2ff   :  { %v1867_v34 = vsub.f32 %v3325_v33, %v1782_v23  ;;  %v2302_v27 = vpop.eup %2301 }
 0x300   :  { %v1784_v37 = vmul.f32 0.6931472, %v2302_v27 }
 0x301   :  { %1931 = vst [vmem:[%s3672_s4 + $0x150] sm:$0xff] %v1867_v34  ;;  %v1662_v56 = vpop.xlane.xlu0 %1661 }
 0x302   :  { %2307 = vlog2.f32 %v1662_v56  ;;  %v1868_v16 = vsub.f32 %v3333_v63, %v1784_v37 }
 0x304   :  { %v2304_v12 = vpop.eup %2303  ;;  %1932 = vst [vmem:[%s3672_s4 + $0x158] sm:$0xff] %v1868_v16  ;;  %v1664_v30 = vpop.xlane.xlu1 %1663 }
 0x305   :  { %v1786_v19 = vmul.f32 0.6931472, %v2304_v12  ;;  %2309 = vlog2.f32 %v1664_v30 }
 0x307   :  { %v1869_v33 = vsub.f32 %v3341_v21, %v1786_v19  ;;  %v2306_v36 = vpop.eup %2305 }
 0x308   :  { %v1788_v25 = vmul.f32 0.6931472, %v2306_v36 }
 0x309   :  { %1933 = vst [vmem:[%s3672_s4 + $0x160] sm:$0xff] %v1869_v33  ;;  %v1666_v55 = vpop.xlane.xlu0 %1665 }
 0x30a   :  { %2311 = vlog2.f32 %v1666_v55  ;;  %v1870_v63 = vsub.f32 %v3349_v50, %v1788_v25 }
 0x30c   :  { %v2308_v39 = vpop.eup %2307  ;;  %1934 = vst [vmem:[%s3672_s4 + $0x168] sm:$0xff] %v1870_v63  ;;  %v1668_v9 = vpop.xlane.xlu1 %1667 }
 0x30d   :  { %v1790_v5 = vmul.f32 0.6931472, %v2308_v39  ;;  %2313 = vlog2.f32 %v1668_v9 }
 0x30f   :  { %v1871_v21 = vsub.f32 %v3357_v38, %v1790_v5  ;;  %v2310_v58 = vpop.eup %2309 }
 0x310   :  { %v1792_v7 = vmul.f32 0.6931472, %v2310_v58 }
 0x311   :  { %1935 = vst [vmem:[%s3672_s4 + $0x170] sm:$0xff] %v1871_v21  ;;  %v1670_v10 = vpop.xlane.xlu0 %1669 }
 0x312   :  { %2315 = vlog2.f32 %v1670_v10  ;;  %v1872_v50 = vsub.f32 %v3365_v62, %v1792_v7 }
 0x314   :  { %v2312_v6 = vpop.eup %2311  ;;  %1936 = vst [vmem:[%s3672_s4 + $0x178] sm:$0xff] %v1872_v50  ;;  %v1672_v59 = vpop.xlane.xlu1 %1671 }
 0x315   :  { %v1794_v35 = vmul.f32 0.6931472, %v2312_v6  ;;  %2317 = vlog2.f32 %v1672_v59 }
 0x317   :  { %v1873_v38 = vsub.f32 %v3373_v3, %v1794_v35  ;;  %v2314_v17 = vpop.eup %2313 }
 0x318   :  { %v1796_v60 = vmul.f32 0.6931472, %v2314_v17 }
 0x319   :  { %1937 = vst [vmem:[%s3672_s4 + $0x180] sm:$0xff] %v1873_v38  ;;  %v1674_v20 = vpop.xlane.xlu0 %1673 }
 0x31a   :  { %2319 = vlog2.f32 %v1674_v20  ;;  %v1874_v62 = vsub.f32 %v3381_v54, %v1796_v60 }
 0x31c   :  { %v2316_v31 = vpop.eup %2315  ;;  %1938 = vst [vmem:[%s3672_s4 + $0x188] sm:$0xff] %v1874_v62  ;;  %v1676_v46 = vpop.xlane.xlu1 %1675 }
 0x31d   :  { %v1798_v18 = vmul.f32 0.6931472, %v2316_v31  ;;  %2321 = vlog2.f32 %v1676_v46 }
 0x31f   :  { %v1875_v3 = vsub.f32 %v3389_v15, %v1798_v18  ;;  %v2318_v47 = vpop.eup %2317 }
 0x320   :  { %v1800_v26 = vmul.f32 0.6931472, %v2318_v47 }
 0x321   :  { %1939 = vst [vmem:[%s3672_s4 + $0x190] sm:$0xff] %v1875_v3  ;;  %v1678_v57 = vpop.xlane.xlu0 %1677 }
 0x322   :  { %2323 = vlog2.f32 %v1678_v57  ;;  %v1876_v54 = vsub.f32 %v3397_v29, %v1800_v26 }
 0x324   :  { %v2320_v61 = vpop.eup %2319  ;;  %1940 = vst [vmem:[%s3672_s4 + $0x198] sm:$0xff] %v1876_v54  ;;  %v1680_v41 = vpop.xlane.xlu1 %1679 }
 0x325   :  { %v1802_v49 = vmul.f32 0.6931472, %v2320_v61  ;;  %2325 = vlog2.f32 %v1680_v41 }
 0x327   :  { %v1877_v15 = vsub.f32 %v3405_v48, %v1802_v49  ;;  %v2322_v53 = vpop.eup %2321 }
 0x328   :  { %v1804_v14 = vmul.f32 0.6931472, %v2322_v53 }
 0x329   :  { %1941 = vst [vmem:[%s3672_s4 + $0x1a0] sm:$0xff] %v1877_v15  ;;  %v1682_v13 = vpop.xlane.xlu0 %1681 }
 0x32a   :  { %2327 = vlog2.f32 %v1682_v13  ;;  %v1878_v29 = vsub.f32 %v3413_v4, %v1804_v14 }
 0x32c   :  { %v2324_v0 = vpop.eup %2323  ;;  %1942 = vst [vmem:[%s3672_s4 + $0x1a8] sm:$0xff] %v1878_v29  ;;  %v1684_v28 = vpop.xlane.xlu1 %1683 }
 0x32d   :  { %v1806_v45 = vmul.f32 0.6931472, %v2324_v0  ;;  %2329 = vlog2.f32 %v1684_v28 }
 0x32f   :  { %v1879_v48 = vsub.f32 %v3421_v22, %v1806_v45  ;;  %v2326_v32 = vpop.eup %2325 }
 0x330   :  { %v1808_v11 = vmul.f32 0.6931472, %v2326_v32 }
 0x331   :  { %1943 = vst [vmem:[%s3672_s4 + $0x1b0] sm:$0xff] %v1879_v48  ;;  %v1686_v23 = vpop.xlane.xlu0 %1685 }
 0x332   :  { %2331 = vlog2.f32 %v1686_v23  ;;  %v1880_v4 = vsub.f32 %v3429_v24, %v1808_v11 }
 0x334   :  { %v2328_v2 = vpop.eup %2327  ;;  %1944 = vst [vmem:[%s3672_s4 + $0x1b8] sm:$0xff] %v1880_v4  ;;  %v1688_v27 = vpop.xlane.xlu1 %1687 }
 0x335   :  { %v1810_v34 = vmul.f32 0.6931472, %v2328_v2  ;;  %2333 = vlog2.f32 %v1688_v27 }
 0x337   :  { %v1881_v22 = vsub.f32 %v3437_v43, %v1810_v34  ;;  %v2330_v37 = vpop.eup %2329  ;;  %v1690_v56 = vpop.xlane.xlu0 %1689 }
 0x338   :  { %v1812_v16 = vmul.f32 0.6931472, %v2330_v37  ;;  %2335 = vlog2.f32 %v1690_v56 }
 0x339   :  { %1945 = vst [vmem:[%s3672_s4 + $0x1c0] sm:$0xff] %v1881_v22  ;;  %v1692_v12 = vpop.xlane.xlu1 %1691 }
 0x33a   :  { %v1882_v24 = vsub.f32 %v3445_v44, %v1812_v16  ;;  %2337 = vlog2.f32 %v1692_v12 }
 0x33c   :  { %v2332_v19 = vpop.eup %2331  ;;  %1946 = vst [vmem:[%s3672_s4 + $0x1c8] sm:$0xff] %v1882_v24 }
 0x33d   :  { %v1814_v30 = vmul.f32 0.6931472, %v2332_v19 }
 0x33f   :  { %v1883_v43 = vsub.f32 %v3453_v40, %v1814_v30  ;;  %v2334_v33 = vpop.eup %2333  ;;  %v1694_v36 = vpop.xlane.xlu0 %1693 }
 0x340   :  { %v1816_v25 = vmul.f32 0.6931472, %v2334_v33  ;;  %2339 = vlog2.f32 %v1694_v36 }
 0x341   :  { %1947 = vst [vmem:[%s3672_s4 + $0x1d0] sm:$0xff] %v1883_v43  ;;  %v1696_v55 = vpop.xlane.xlu1 %1695 }
 0x342   :  { %v2336_v63 = vpop.eup %2335  ;;  %v1884_v44 = vsub.f32 %v3461_v52, %v1816_v25  ;;  %2341 = vlog2.f32 %v1696_v55 }
 0x343   :  { %v1818_v39 = vmul.f32 0.6931472, %v2336_v63 }
 0x344   :  { %v2338_v5 = vpop.eup %2337  ;;  %1948 = vst [vmem:[%s3672_s4 + $0x1d8] sm:$0xff] %v1884_v44 }
 0x345   :  { %v1885_v40 = vsub.f32 %v3466_v8, %v1818_v39  ;;  %v1820_v9 = vmul.f32 0.6931472, %v2338_v5 }
 0x347   :  { %1949 = vst [vmem:[%s3672_s4 + $0x1e0] sm:$0xff] %v1885_v40  ;;  %v1886_v21 = vsub.f32 %v3473_v1, %v1820_v9 }
 0x349   :  { %1950 = vst [vmem:[%s3672_s4 + $0x1e8] sm:$0xff] %v1886_v21 }
 0x34a   :  { %v2340_v52 = vpop.eup %2339 }
 0x34b   :  { %v1822_v58 = vmul.f32 0.6931472, %v2340_v52 }
 0x34c   :  { %v2342_v7 = vpop.eup %2341 }
 0x34d   :  { %v1887_v10 = vsub.f32 %v3482_v51, %v1822_v58  ;;  %v1824_v50 = vmul.f32 0.6931472, %v2342_v7 }
 0x34f   :  { %1951 = vst [vmem:[%s3672_s4 + $0x1f0] sm:$0xff] %v1887_v10  ;;  %v1888_v8 = vsub.f32 %v3489_v42, %v1824_v50 }
 0x351   :  { %1952 = vst [vmem:[%s3672_s4 + $0x1f8] sm:$0xff] %v1888_v8 }

</bundles_post_ra>
